<compile_context>
chip_gen: v6e
topology: v6e:2x2x1
jax: 0.10.0
libtpu: 0.0.40
codegen_flags: <defaults>
</compile_context>

<pallas_src>
import jax
import jax.numpy as jnp
from jax.experimental import pallas as pl
from jax.experimental.pallas import tpu as pltpu

# Model dimensions (from BasicModel.__init__)
SEQ_LEN = 500        # self.input_seq_len
C_IN = 4
CONV_K = 20
C_OUT = 240          # num_conv_filters
C_PAD = 256          # C_OUT padded to a multiple of 128 (lane-dense)
POOL_K = 15
POOL_S = 15
LSTM_H = 32          # lstm_hidden_units
FC1 = 1024
FC2 = 512

CONV_LEN = SEQ_LEN - CONV_K + 1                      # 481
POOL_T = (CONV_LEN - POOL_K) // POOL_S + 1           # 32  (floor; last conv pos dropped)
USED = POOL_T * POOL_S                               # 480 conv positions consumed
KCIN = CONV_K * C_IN                                 # 80  im2col contraction depth

TB_MAX = 8                                           # samples per grid step


# ---------------------------------------------------------------------------
# Fused kernel: one grid step == TB batch samples, end to end.
# ---------------------------------------------------------------------------
def _fused_forward_kernel(patches_ref,               # (1, 15, 32*TB, 80) bf16
                          cw_ref, cb_ref,            # (80, 256) bf16, (1, 256) f32
                          wih_ref, whh_ref, lb_ref,  # (256,128) bf16, (32,128) f32, (1,128) f32
                          w1_ref, b1_ref,            # (32, 1024) bf16, (1, 1024) f32
                          w2_ref, b2_ref,            # (1024, 512) bf16, (1, 512) f32
                          w3_ref, b3_ref,            # (1, 512) f32,   (1, 1) f32
                          o_ref):                    # (TB, 1) f32
    tb = o_ref.shape[0]
    H = LSTM_H

    # ---- Conv1d(4->240,k=20) + bias + ReLU + MaxPool1d(15,15), fused --------
    # patches_ref[0, k] holds the im2col rows for pooling-window offset k,
    # rows ordered (t*TB + b).  Running max over k == MaxPool1d(15, 15);
    # constant bias + ReLU commute with the max and are applied once.
    cw = cw_ref[...]
    pooled = None
    for k in range(POOL_K):
        chunk = patches_ref[0, k, :, :]                          # (32*TB, 80) bf16
        a = jnp.dot(chunk, cw, preferred_element_type=jnp.float32)   # (32*TB, 256)
        pooled = a if pooled is None else jnp.maximum(pooled, a)
    pooled = jnp.maximum(pooled + cb_ref[...], 0.0)              # bias + ReLU, (32*TB, 256)

    # ---- LSTM input projection, hoisted out of the recurrence ---------------
    # PyTorch gate order i, f, g, o; bias_ih + bias_hh folded in here.
    # Rows stay time-major: xp[t*TB + b, :] = gates_x for sample b at step t.
    xp = (jnp.dot(pooled.astype(jnp.bfloat16), wih_ref[...],
                  preferred_element_type=jnp.float32)
          + lb_ref[...])                                         # (32*TB, 128)

    # ---- LSTM recurrence: fully unrolled, (TB,32) f32 state -----------------
    whh = whh_ref[...]                                           # (32, 128) f32
    h = jnp.zeros((tb, H), jnp.float32)
    c = jnp.zeros((tb, H), jnp.float32)
    for t in range(POOL_T):                                      # static, unrolled
        gates = xp[t * tb:(t + 1) * tb, :] + jnp.dot(
            h, whh, preferred_element_type=jnp.float32)          # (TB, 128)
        sg = jax.nn.sigmoid(gates)                               # one full-width EUP pass
        th = jnp.tanh(gates)                                     # one full-width EUP pass
        i_g = sg[:, 0:H]
        f_g = sg[:, H:2 * H]
        g_g = th[:, 2 * H:3 * H]
        o_g = sg[:, 3 * H:4 * H]
        c = f_g * c + i_g * g_g
        h = o_g * jnp.tanh(c)
    # h: (TB, 32) == LSTM output at the last time step.

    # ---- MLP head: fc1+ReLU -> (dropout) -> fc2+sigmoid -> fc_final+sigmoid --
    x1 = jnp.maximum(
        jnp.dot(h.astype(jnp.bfloat16), w1_ref[...],
                preferred_element_type=jnp.float32) + b1_ref[...], 0.0)   # (TB, 1024)
    # TODO(synk): nn.Dropout(p=0.5) is identity in eval mode; training-mode
    # random masking/scaling is intentionally not modeled here.
    x2 = jax.nn.sigmoid(
        jnp.dot(x1.astype(jnp.bfloat16), w2_ref[...],
                preferred_element_type=jnp.float32) + b2_ref[...])        # (TB, 512)
    # fc_final has N=1: VPU multiply + cross-lane sum instead of an MXU pass.
    y = jax.nn.sigmoid(jnp.sum(x2 * w3_ref[...], axis=-1, keepdims=True)
                       + b3_ref[...])                                     # (TB, 1)
    o_ref[...] = y


# ---------------------------------------------------------------------------
# Parameters (deterministic synthetic init; shapes map 1:1 to BasicModel).
# Kernel-friendly layouts: conv weight im2col-flattened (K*Cin, Cout) and
# channel-padded to 256; LSTM/linear weights transposed to (in, out); big
# matmul weights bf16; biases, recurrent weight and fc_final row in f32.
# ---------------------------------------------------------------------------
def init_params(key):
    ks = jax.random.split(key, 10)

    def w(k, shape, fan_in):
        return jax.random.normal(k, shape, jnp.float32) / jnp.sqrt(fan_in)

    # Conv1d(4, 240, 20): PyTorch weight (Cout, Cin, K).  Kernel layout:
    #   w_flat[k*Cin + c, co] = w_pt[co, c, k]  (== w_pt.transpose(2,1,0).reshape(80,240))
    conv_w = w(ks[0], (CONV_K, C_IN, C_OUT), CONV_K * C_IN)        # (20, 4, 240)
    conv_wf = conv_w.reshape(KCIN, C_OUT)                          # (80, 240)
    conv_wf = jnp.pad(conv_wf, ((0, 0), (0, C_PAD - C_OUT))).astype(jnp.bfloat16)
    conv_b = jnp.pad(0.01 * jax.random.normal(ks[1], (1, C_OUT), jnp.float32),
                     ((0, 0), (0, C_PAD - C_OUT)))                 # (1, 256) f32

    # LSTM(240 -> 32): weight_ih (4H,240)^T padded to 256 input rows (zero rows
    # absorb the zero pad channels); weight_hh (4H,32)^T; bias = b_ih + b_hh.
    lstm_wih = jnp.pad(w(ks[2], (C_OUT, 4 * LSTM_H), C_OUT),
                       ((0, C_PAD - C_OUT), (0, 0))).astype(jnp.bfloat16)  # (256,128)
    lstm_whh = w(ks[3], (LSTM_H, 4 * LSTM_H), LSTM_H)              # (32, 128) f32
    lstm_b = 0.01 * jax.random.normal(ks[4], (1, 4 * LSTM_H), jnp.float32)

    params = {
        "conv_wf": conv_wf, "conv_b": conv_b,
        "lstm_wih": lstm_wih, "lstm_whh": lstm_whh, "lstm_b": lstm_b,
        "fc1_w": w(ks[5], (LSTM_H, FC1), LSTM_H).astype(jnp.bfloat16),
        "fc1_b": 0.01 * jax.random.normal(ks[6], (1, FC1), jnp.float32),
        "fc2_w": w(ks[7], (FC1, FC2), FC1).astype(jnp.bfloat16),
        "fc2_b": 0.01 * jax.random.normal(ks[8], (1, FC2), jnp.float32),
        "fc3_w": w(ks[9], (1, FC2), FC2),                          # (1, 512) f32 (fc_final row)
        "fc3_b": jnp.zeros((1, 1), jnp.float32),
    }
    return params


def _cost_estimate(batch):
    flops_per_sample = (
        2 * USED * KCIN * C_PAD                   # conv im2col matmuls
        + 2 * POOL_T * C_PAD * 4 * LSTM_H         # LSTM input projection
        + POOL_T * 2 * LSTM_H * 4 * LSTM_H        # LSTM recurrence matmuls
        + 2 * (LSTM_H * FC1 + FC1 * FC2 + FC2))   # MLP head
    transcendentals_per_sample = POOL_T * (2 * 4 * LSTM_H + LSTM_H) + FC2 + 1
    weight_bytes = (KCIN * C_PAD * 2 + C_PAD * 4
                    + C_PAD * 4 * LSTM_H * 2 + LSTM_H * 4 * LSTM_H * 4
                    + 4 * LSTM_H * 4
                    + LSTM_H * FC1 * 2 + FC1 * 4
                    + FC1 * FC2 * 2 + FC2 * 4
                    + FC2 * 4 + 4)
    bytes_accessed = batch * (USED * KCIN * 2 + 4) + weight_bytes
    return pl.CostEstimate(flops=batch * flops_per_sample,
                           transcendentals=batch * transcendentals_per_sample,
                           bytes_accessed=bytes_accessed)


# ---------------------------------------------------------------------------
# Full forward pass (matches BasicModel.forward), single pallas_call.
# ---------------------------------------------------------------------------
@jax.jit
def basic_model_forward(x_ncw, params):
    """x_ncw: (B, 4, 500) float32, NCW like the PyTorch module. Returns (B,)."""
    B = x_ncw.shape[0]
    TB = min(TB_MAX, B)                       # samples per grid step
    NT = -(-B // TB)                          # number of batch tiles
    B_pad = NT * TB
    rows = POOL_T * TB                        # matmul M per tile (256 for TB=8)

    # XLA-side layout plumbing (cheap): NCW -> NLC, im2col patches in
    # pooling-window-major / time-major order so in-kernel pooling is a
    # sublane-aligned running max and the LSTM input is already time-major.
    x_nlc = jnp.transpose(x_ncw, (0, 2, 1)).astype(jnp.float32)    # (B, 500, 4)
    if B_pad != B:
        x_nlc = jnp.pad(x_nlc, ((0, B_pad - B), (0, 0), (0, 0)))
    taps = [x_nlc[:, k:k + USED, :] for k in range(CONV_K)]
    patches = jnp.concatenate(taps, axis=-1)                       # (B_pad,480,80), elem = k*4+c
    patches = patches.reshape(B_pad, POOL_T, POOL_K, KCIN)         # pos p = t*15 + k
    patches = patches.reshape(NT, TB, POOL_T, POOL_K, KCIN)
    patches = jnp.transpose(patches, (0, 3, 2, 1, 4))              # (NT, 15, 32, TB, 80)
    patches = patches.reshape(NT, POOL_K, rows, KCIN).astype(jnp.bfloat16)

    out = pl.pallas_call(
        _fused_forward_kernel,
        out_shape=jax.ShapeDtypeStruct((B_pad, 1), jnp.float32),
        grid=(NT,),
        in_specs=[
            pl.BlockSpec((1, POOL_K, rows, KCIN), lambda i: (i, 0, 0, 0)),
            pl.BlockSpec((KCIN, C_PAD), lambda i: (0, 0)),
            pl.BlockSpec((1, C_PAD), lambda i: (0, 0)),
            pl.BlockSpec((C_PAD, 4 * LSTM_H), lambda i: (0, 0)),
            pl.BlockSpec((LSTM_H, 4 * LSTM_H), lambda i: (0, 0)),
            pl.BlockSpec((1, 4 * LSTM_H), lambda i: (0, 0)),
            pl.BlockSpec((LSTM_H, FC1), lambda i: (0, 0)),
            pl.BlockSpec((1, FC1), lambda i: (0, 0)),
            pl.BlockSpec((FC1, FC2), lambda i: (0, 0)),
            pl.BlockSpec((1, FC2), lambda i: (0, 0)),
            pl.BlockSpec((1, FC2), lambda i: (0, 0)),
            pl.BlockSpec((1, 1), lambda i: (0, 0)),
        ],
        out_specs=pl.BlockSpec((TB, 1), lambda i: (i, 0)),
        compiler_params=pltpu.CompilerParams(
            dimension_semantics=("parallel",),
            vmem_limit_bytes=32 * 1024 * 1024),
        cost_estimate=_cost_estimate(B_pad),
    )(patches,
      params["conv_wf"], params["conv_b"],
      params["lstm_wih"], params["lstm_whh"], params["lstm_b"],
      params["fc1_w"], params["fc1_b"],
      params["fc2_w"], params["fc2_b"],
      params["fc3_w"], params["fc3_b"])
    return out[:B, 0]                                              # .squeeze()


if __name__ == "__main__":
    key = jax.random.PRNGKey(0)
    pkey, xkey = jax.random.split(key)
    params = init_params(pkey)

    # Small primary check (single batch tile).
    B = 2
    x = jax.random.normal(xkey, (B, C_IN, SEQ_LEN), jnp.float32)   # (2, 4, 500)
    y = jax.block_until_ready(basic_model_forward(x, params))
    assert y.shape == (B,), y.shape
    assert bool(jnp.all(jnp.isfinite(y)))
    assert bool(jnp.all((y >= 0.0) & (y <= 1.0)))                  # sigmoid output

    # Also exercise the batched multi-tile path (TB=8, batch padded 12 -> 16).
    B2 = 12
    x2 = jax.random.normal(jax.random.PRNGKey(1), (B2, C_IN, SEQ_LEN), jnp.float32)
    y2 = jax.block_until_ready(basic_model_forward(x2, params))
    assert y2.shape == (B2,), y2.shape
    assert bool(jnp.all(jnp.isfinite(y2)))
    assert bool(jnp.all((y2 >= 0.0) & (y2 <= 1.0)))

    print("KERNEL_OK")
</pallas_src>

<mosaic_0001>
module attributes {stable_mosaic.version = 11 : i64} {
  func.func @_fused_forward_kernel(%arg0: i32, %arg1: memref<1x15x64x80xbf16, #tpu.memory_space<vmem>>, %arg2: memref<80x256xbf16, #tpu.memory_space<vmem>>, %arg3: memref<1x256xf32, #tpu.memory_space<vmem>>, %arg4: memref<256x128xbf16, #tpu.memory_space<vmem>>, %arg5: memref<32x128xf32, #tpu.memory_space<vmem>>, %arg6: memref<1x128xf32, #tpu.memory_space<vmem>>, %arg7: memref<32x1024xbf16, #tpu.memory_space<vmem>>, %arg8: memref<1x1024xf32, #tpu.memory_space<vmem>>, %arg9: memref<1024x512xbf16, #tpu.memory_space<vmem>>, %arg10: memref<1x512xf32, #tpu.memory_space<vmem>>, %arg11: memref<1x512xf32, #tpu.memory_space<vmem>>, %arg12: memref<1x1xf32, #tpu.memory_space<vmem>>, %arg13: memref<2x1xf32, #tpu.memory_space<vmem>>) attributes {dimension_semantics = [#tpu.dimension_semantics<parallel>], iteration_bounds = array<i64: 1>, scalar_prefetch = 0 : i64, scratch_operands = 0 : i64, tpu.core_type = #tpu.core_type<tc>, window_params = [{transform_indices = @transform_0, window_bounds = array<i64: 1, 15, 64, 80>}, {pipeline_mode = #tpu.pipeline_mode<synchronous>, transform_indices = @transform_1, window_bounds = array<i64: 80, 256>}, {pipeline_mode = #tpu.pipeline_mode<synchronous>, transform_indices = @transform_2, window_bounds = array<i64: 1, 256>}, {pipeline_mode = #tpu.pipeline_mode<synchronous>, transform_indices = @transform_3, window_bounds = array<i64: 256, 128>}, {pipeline_mode = #tpu.pipeline_mode<synchronous>, transform_indices = @transform_4, window_bounds = array<i64: 32, 128>}, {pipeline_mode = #tpu.pipeline_mode<synchronous>, transform_indices = @transform_5, window_bounds = array<i64: 1, 128>}, {pipeline_mode = #tpu.pipeline_mode<synchronous>, transform_indices = @transform_6, window_bounds = array<i64: 32, 1024>}, {pipeline_mode = #tpu.pipeline_mode<synchronous>, transform_indices = @transform_7, window_bounds = array<i64: 1, 1024>}, {pipeline_mode = #tpu.pipeline_mode<synchronous>, transform_indices = @transform_8, window_bounds = array<i64: 1024, 512>}, {pipeline_mode = #tpu.pipeline_mode<synchronous>, transform_indices = @transform_9, window_bounds = array<i64: 1, 512>}, {pipeline_mode = #tpu.pipeline_mode<synchronous>, transform_indices = @transform_10, window_bounds = array<i64: 1, 512>}, {pipeline_mode = #tpu.pipeline_mode<synchronous>, transform_indices = @transform_11, window_bounds = array<i64: 1, 1>}, {transform_indices = @transform_12, window_bounds = array<i64: 2, 1>}]} {
    %c0 = arith.constant 0 : index
    %c0_0 = arith.constant 0 : index
    %0 = vector.load %arg2[%c0, %c0_0] : memref<80x256xbf16, #tpu.memory_space<vmem>>, vector<80x256xbf16>
    %c0_1 = arith.constant 0 : index
    %c0_2 = arith.constant 0 : index
    %c0_3 = arith.constant 0 : index
    %c0_4 = arith.constant 0 : index
    %1 = vector.load %arg1[%c0_1, %c0_2, %c0_3, %c0_4] : memref<1x15x64x80xbf16, #tpu.memory_space<vmem>>, vector<1x1x64x80xbf16>
    %2 = vector.shape_cast %1 : vector<1x1x64x80xbf16> to vector<64x80xbf16>
    %cst = arith.constant dense<0.000000e+00> : vector<64x256xf32>
    %3 = tpu.matmul %2, %0, %cst {dimension_numbers = #tpu.dot_dimension_numbers<[1], [0], [0], [1], [0, 0, 1, 1], [], []>} : vector<64x80xbf16>, vector<80x256xbf16>, vector<64x256xf32> -> vector<64x256xf32>
    %c0_5 = arith.constant 0 : index
    %c1 = arith.constant 1 : index
    %c0_6 = arith.constant 0 : index
    %c0_7 = arith.constant 0 : index
    %4 = vector.load %arg1[%c0_5, %c1, %c0_6, %c0_7] : memref<1x15x64x80xbf16, #tpu.memory_space<vmem>>, vector<1x1x64x80xbf16>
    %5 = vector.shape_cast %4 : vector<1x1x64x80xbf16> to vector<64x80xbf16>
    %cst_8 = arith.constant dense<0.000000e+00> : vector<64x256xf32>
    %6 = tpu.matmul %5, %0, %cst_8 {dimension_numbers = #tpu.dot_dimension_numbers<[1], [0], [0], [1], [0, 0, 1, 1], [], []>} : vector<64x80xbf16>, vector<80x256xbf16>, vector<64x256xf32> -> vector<64x256xf32>
    %7 = arith.maximumf %3, %6 : vector<64x256xf32>
    %c0_9 = arith.constant 0 : index
    %c2 = arith.constant 2 : index
    %c0_10 = arith.constant 0 : index
    %c0_11 = arith.constant 0 : index
    %8 = vector.load %arg1[%c0_9, %c2, %c0_10, %c0_11] : memref<1x15x64x80xbf16, #tpu.memory_space<vmem>>, vector<1x1x64x80xbf16>
    %9 = vector.shape_cast %8 : vector<1x1x64x80xbf16> to vector<64x80xbf16>
    %cst_12 = arith.constant dense<0.000000e+00> : vector<64x256xf32>
    %10 = tpu.matmul %9, %0, %cst_12 {dimension_numbers = #tpu.dot_dimension_numbers<[1], [0], [0], [1], [0, 0, 1, 1], [], []>} : vector<64x80xbf16>, vector<80x256xbf16>, vector<64x256xf32> -> vector<64x256xf32>
    %11 = arith.maximumf %7, %10 : vector<64x256xf32>
    %c0_13 = arith.constant 0 : index
    %c3 = arith.constant 3 : index
    %c0_14 = arith.constant 0 : index
    %c0_15 = arith.constant 0 : index
    %12 = vector.load %arg1[%c0_13, %c3, %c0_14, %c0_15] : memref<1x15x64x80xbf16, #tpu.memory_space<vmem>>, vector<1x1x64x80xbf16>
    %13 = vector.shape_cast %12 : vector<1x1x64x80xbf16> to vector<64x80xbf16>
    %cst_16 = arith.constant dense<0.000000e+00> : vector<64x256xf32>
    %14 = tpu.matmul %13, %0, %cst_16 {dimension_numbers = #tpu.dot_dimension_numbers<[1], [0], [0], [1], [0, 0, 1, 1], [], []>} : vector<64x80xbf16>, vector<80x256xbf16>, vector<64x256xf32> -> vector<64x256xf32>
    %15 = arith.maximumf %11, %14 : vector<64x256xf32>
    %c0_17 = arith.constant 0 : index
    %c4 = arith.constant 4 : index
    %c0_18 = arith.constant 0 : index
    %c0_19 = arith.constant 0 : index
    %16 = vector.load %arg1[%c0_17, %c4, %c0_18, %c0_19] : memref<1x15x64x80xbf16, #tpu.memory_space<vmem>>, vector<1x1x64x80xbf16>
    %17 = vector.shape_cast %16 : vector<1x1x64x80xbf16> to vector<64x80xbf16>
    %cst_20 = arith.constant dense<0.000000e+00> : vector<64x256xf32>
    %18 = tpu.matmul %17, %0, %cst_20 {dimension_numbers = #tpu.dot_dimension_numbers<[1], [0], [0], [1], [0, 0, 1, 1], [], []>} : vector<64x80xbf16>, vector<80x256xbf16>, vector<64x256xf32> -> vector<64x256xf32>
    %19 = arith.maximumf %15, %18 : vector<64x256xf32>
    %c0_21 = arith.constant 0 : index
    %c5 = arith.constant 5 : index
    %c0_22 = arith.constant 0 : index
    %c0_23 = arith.constant 0 : index
    %20 = vector.load %arg1[%c0_21, %c5, %c0_22, %c0_23] : memref<1x15x64x80xbf16, #tpu.memory_space<vmem>>, vector<1x1x64x80xbf16>
    %21 = vector.shape_cast %20 : vector<1x1x64x80xbf16> to vector<64x80xbf16>
    %cst_24 = arith.constant dense<0.000000e+00> : vector<64x256xf32>
    %22 = tpu.matmul %21, %0, %cst_24 {dimension_numbers = #tpu.dot_dimension_numbers<[1], [0], [0], [1], [0, 0, 1, 1], [], []>} : vector<64x80xbf16>, vector<80x256xbf16>, vector<64x256xf32> -> vector<64x256xf32>
    %23 = arith.maximumf %19, %22 : vector<64x256xf32>
    %c0_25 = arith.constant 0 : index
    %c6 = arith.constant 6 : index
    %c0_26 = arith.constant 0 : index
    %c0_27 = arith.constant 0 : index
    %24 = vector.load %arg1[%c0_25, %c6, %c0_26, %c0_27] : memref<1x15x64x80xbf16, #tpu.memory_space<vmem>>, vector<1x1x64x80xbf16>
    %25 = vector.shape_cast %24 : vector<1x1x64x80xbf16> to vector<64x80xbf16>
    %cst_28 = arith.constant dense<0.000000e+00> : vector<64x256xf32>
    %26 = tpu.matmul %25, %0, %cst_28 {dimension_numbers = #tpu.dot_dimension_numbers<[1], [0], [0], [1], [0, 0, 1, 1], [], []>} : vector<64x80xbf16>, vector<80x256xbf16>, vector<64x256xf32> -> vector<64x256xf32>
    %27 = arith.maximumf %23, %26 : vector<64x256xf32>
    %c0_29 = arith.constant 0 : index
    %c7 = arith.constant 7 : index
    %c0_30 = arith.constant 0 : index
    %c0_31 = arith.constant 0 : index
    %28 = vector.load %arg1[%c0_29, %c7, %c0_30, %c0_31] : memref<1x15x64x80xbf16, #tpu.memory_space<vmem>>, vector<1x1x64x80xbf16>
    %29 = vector.shape_cast %28 : vector<1x1x64x80xbf16> to vector<64x80xbf16>
    %cst_32 = arith.constant dense<0.000000e+00> : vector<64x256xf32>
    %30 = tpu.matmul %29, %0, %cst_32 {dimension_numbers = #tpu.dot_dimension_numbers<[1], [0], [0], [1], [0, 0, 1, 1], [], []>} : vector<64x80xbf16>, vector<80x256xbf16>, vector<64x256xf32> -> vector<64x256xf32>
    %31 = arith.maximumf %27, %30 : vector<64x256xf32>
    %c0_33 = arith.constant 0 : index
    %c8 = arith.constant 8 : index
    %c0_34 = arith.constant 0 : index
    %c0_35 = arith.constant 0 : index
    %32 = vector.load %arg1[%c0_33, %c8, %c0_34, %c0_35] : memref<1x15x64x80xbf16, #tpu.memory_space<vmem>>, vector<1x1x64x80xbf16>
    %33 = vector.shape_cast %32 : vector<1x1x64x80xbf16> to vector<64x80xbf16>
    %cst_36 = arith.constant dense<0.000000e+00> : vector<64x256xf32>
    %34 = tpu.matmul %33, %0, %cst_36 {dimension_numbers = #tpu.dot_dimension_numbers<[1], [0], [0], [1], [0, 0, 1, 1], [], []>} : vector<64x80xbf16>, vector<80x256xbf16>, vector<64x256xf32> -> vector<64x256xf32>
    %35 = arith.maximumf %31, %34 : vector<64x256xf32>
    %c0_37 = arith.constant 0 : index
    %c9 = arith.constant 9 : index
    %c0_38 = arith.constant 0 : index
    %c0_39 = arith.constant 0 : index
    %36 = vector.load %arg1[%c0_37, %c9, %c0_38, %c0_39] : memref<1x15x64x80xbf16, #tpu.memory_space<vmem>>, vector<1x1x64x80xbf16>
    %37 = vector.shape_cast %36 : vector<1x1x64x80xbf16> to vector<64x80xbf16>
    %cst_40 = arith.constant dense<0.000000e+00> : vector<64x256xf32>
    %38 = tpu.matmul %37, %0, %cst_40 {dimension_numbers = #tpu.dot_dimension_numbers<[1], [0], [0], [1], [0, 0, 1, 1], [], []>} : vector<64x80xbf16>, vector<80x256xbf16>, vector<64x256xf32> -> vector<64x256xf32>
    %39 = arith.maximumf %35, %38 : vector<64x256xf32>
    %c0_41 = arith.constant 0 : index
    %c10 = arith.constant 10 : index
    %c0_42 = arith.constant 0 : index
    %c0_43 = arith.constant 0 : index
    %40 = vector.load %arg1[%c0_41, %c10, %c0_42, %c0_43] : memref<1x15x64x80xbf16, #tpu.memory_space<vmem>>, vector<1x1x64x80xbf16>
    %41 = vector.shape_cast %40 : vector<1x1x64x80xbf16> to vector<64x80xbf16>
    %cst_44 = arith.constant dense<0.000000e+00> : vector<64x256xf32>
    %42 = tpu.matmul %41, %0, %cst_44 {dimension_numbers = #tpu.dot_dimension_numbers<[1], [0], [0], [1], [0, 0, 1, 1], [], []>} : vector<64x80xbf16>, vector<80x256xbf16>, vector<64x256xf32> -> vector<64x256xf32>
    %43 = arith.maximumf %39, %42 : vector<64x256xf32>
    %c0_45 = arith.constant 0 : index
    %c11 = arith.constant 11 : index
    %c0_46 = arith.constant 0 : index
    %c0_47 = arith.constant 0 : index
    %44 = vector.load %arg1[%c0_45, %c11, %c0_46, %c0_47] : memref<1x15x64x80xbf16, #tpu.memory_space<vmem>>, vector<1x1x64x80xbf16>
    %45 = vector.shape_cast %44 : vector<1x1x64x80xbf16> to vector<64x80xbf16>
    %cst_48 = arith.constant dense<0.000000e+00> : vector<64x256xf32>
    %46 = tpu.matmul %45, %0, %cst_48 {dimension_numbers = #tpu.dot_dimension_numbers<[1], [0], [0], [1], [0, 0, 1, 1], [], []>} : vector<64x80xbf16>, vector<80x256xbf16>, vector<64x256xf32> -> vector<64x256xf32>
    %47 = arith.maximumf %43, %46 : vector<64x256xf32>
    %c0_49 = arith.constant 0 : index
    %c12 = arith.constant 12 : index
    %c0_50 = arith.constant 0 : index
    %c0_51 = arith.constant 0 : index
    %48 = vector.load %arg1[%c0_49, %c12, %c0_50, %c0_51] : memref<1x15x64x80xbf16, #tpu.memory_space<vmem>>, vector<1x1x64x80xbf16>
    %49 = vector.shape_cast %48 : vector<1x1x64x80xbf16> to vector<64x80xbf16>
    %cst_52 = arith.constant dense<0.000000e+00> : vector<64x256xf32>
    %50 = tpu.matmul %49, %0, %cst_52 {dimension_numbers = #tpu.dot_dimension_numbers<[1], [0], [0], [1], [0, 0, 1, 1], [], []>} : vector<64x80xbf16>, vector<80x256xbf16>, vector<64x256xf32> -> vector<64x256xf32>
    %51 = arith.maximumf %47, %50 : vector<64x256xf32>
    %c0_53 = arith.constant 0 : index
    %c13 = arith.constant 13 : index
    %c0_54 = arith.constant 0 : index
    %c0_55 = arith.constant 0 : index
    %52 = vector.load %arg1[%c0_53, %c13, %c0_54, %c0_55] : memref<1x15x64x80xbf16, #tpu.memory_space<vmem>>, vector<1x1x64x80xbf16>
    %53 = vector.shape_cast %52 : vector<1x1x64x80xbf16> to vector<64x80xbf16>
    %cst_56 = arith.constant dense<0.000000e+00> : vector<64x256xf32>
    %54 = tpu.matmul %53, %0, %cst_56 {dimension_numbers = #tpu.dot_dimension_numbers<[1], [0], [0], [1], [0, 0, 1, 1], [], []>} : vector<64x80xbf16>, vector<80x256xbf16>, vector<64x256xf32> -> vector<64x256xf32>
    %55 = arith.maximumf %51, %54 : vector<64x256xf32>
    %c0_57 = arith.constant 0 : index
    %c14 = arith.constant 14 : index
    %c0_58 = arith.constant 0 : index
    %c0_59 = arith.constant 0 : index
    %56 = vector.load %arg1[%c0_57, %c14, %c0_58, %c0_59] : memref<1x15x64x80xbf16, #tpu.memory_space<vmem>>, vector<1x1x64x80xbf16>
    %57 = vector.shape_cast %56 : vector<1x1x64x80xbf16> to vector<64x80xbf16>
    %cst_60 = arith.constant dense<0.000000e+00> : vector<64x256xf32>
    %58 = tpu.matmul %57, %0, %cst_60 {dimension_numbers = #tpu.dot_dimension_numbers<[1], [0], [0], [1], [0, 0, 1, 1], [], []>} : vector<64x80xbf16>, vector<80x256xbf16>, vector<64x256xf32> -> vector<64x256xf32>
    %59 = arith.maximumf %55, %58 : vector<64x256xf32>
    %c0_61 = arith.constant 0 : index
    %c0_62 = arith.constant 0 : index
    %60 = vector.load %arg3[%c0_61, %c0_62] : memref<1x256xf32, #tpu.memory_space<vmem>>, vector<1x256xf32>
    %61 = vector.broadcast %60 : vector<1x256xf32> to vector<64x256xf32>
    %62 = arith.addf %59, %61 : vector<64x256xf32>
    %cst_63 = arith.constant 0.000000e+00 : f32
    %63 = vector.broadcast %cst_63 : f32 to vector<64x256xf32>
    %64 = arith.maximumf %62, %63 : vector<64x256xf32>
    %65 = arith.truncf %64 : vector<64x256xf32> to vector<64x256xbf16>
    %c0_64 = arith.constant 0 : index
    %c0_65 = arith.constant 0 : index
    %66 = vector.load %arg4[%c0_64, %c0_65] : memref<256x128xbf16, #tpu.memory_space<vmem>>, vector<256x128xbf16>
    %cst_66 = arith.constant dense<0.000000e+00> : vector<64x128xf32>
    %67 = tpu.matmul %65, %66, %cst_66 {dimension_numbers = #tpu.dot_dimension_numbers<[1], [0], [0], [1], [0, 0, 1, 1], [], []>} : vector<64x256xbf16>, vector<256x128xbf16>, vector<64x128xf32> -> vector<64x128xf32>
    %c0_67 = arith.constant 0 : index
    %c0_68 = arith.constant 0 : index
    %68 = vector.load %arg6[%c0_67, %c0_68] : memref<1x128xf32, #tpu.memory_space<vmem>>, vector<1x128xf32>
    %69 = vector.broadcast %68 : vector<1x128xf32> to vector<64x128xf32>
    %70 = arith.addf %67, %69 : vector<64x128xf32>
    %c0_69 = arith.constant 0 : index
    %c0_70 = arith.constant 0 : index
    %71 = vector.load %arg5[%c0_69, %c0_70] : memref<32x128xf32, #tpu.memory_space<vmem>>, vector<32x128xf32>
    %cst_71 = arith.constant 0.000000e+00 : f32
    %72 = vector.broadcast %cst_71 : f32 to vector<2x32xf32>
    %cst_72 = arith.constant 0.000000e+00 : f32
    %73 = vector.broadcast %cst_72 : f32 to vector<2x32xf32>
    %74 = vector.extract_strided_slice %70 {offsets = [0, 0], sizes = [2, 128], strides = [1, 1]} : vector<64x128xf32> to vector<2x128xf32>
    %cst_73 = arith.constant dense<0.000000e+00> : vector<2x128xf32>
    %75 = tpu.matmul %72, %71, %cst_73 {dimension_numbers = #tpu.dot_dimension_numbers<[1], [0], [0], [1], [0, 0, 1, 1], [], []>} : vector<2x32xf32>, vector<32x128xf32>, vector<2x128xf32> -> vector<2x128xf32>
    %76 = arith.addf %74, %75 : vector<2x128xf32>
    %77 = arith.negf %76 : vector<2x128xf32>
    %78 = math.exp %77 : vector<2x128xf32>
    %cst_74 = arith.constant 1.000000e+00 : f32
    %79 = vector.broadcast %cst_74 : f32 to vector<2x128xf32>
    %80 = arith.addf %79, %78 : vector<2x128xf32>
    %81 = arith.divf %79, %80 : vector<2x128xf32>
    %82 = math.tanh %76 : vector<2x128xf32>
    %83 = vector.extract_strided_slice %81 {offsets = [0, 0], sizes = [2, 32], strides = [1, 1]} : vector<2x128xf32> to vector<2x32xf32>
    %84 = vector.extract_strided_slice %81 {offsets = [0, 32], sizes = [2, 32], strides = [1, 1]} : vector<2x128xf32> to vector<2x32xf32>
    %85 = vector.extract_strided_slice %82 {offsets = [0, 64], sizes = [2, 32], strides = [1, 1]} : vector<2x128xf32> to vector<2x32xf32>
    %86 = vector.extract_strided_slice %81 {offsets = [0, 96], sizes = [2, 32], strides = [1, 1]} : vector<2x128xf32> to vector<2x32xf32>
    %87 = arith.mulf %84, %73 : vector<2x32xf32>
    %88 = arith.mulf %83, %85 : vector<2x32xf32>
    %89 = arith.addf %87, %88 : vector<2x32xf32>
    %90 = math.tanh %89 : vector<2x32xf32>
    %91 = arith.mulf %86, %90 : vector<2x32xf32>
    %92 = vector.extract_strided_slice %70 {offsets = [2, 0], sizes = [2, 128], strides = [1, 1]} : vector<64x128xf32> to vector<2x128xf32>
    %cst_75 = arith.constant dense<0.000000e+00> : vector<2x128xf32>
    %93 = tpu.matmul %91, %71, %cst_75 {dimension_numbers = #tpu.dot_dimension_numbers<[1], [0], [0], [1], [0, 0, 1, 1], [], []>} : vector<2x32xf32>, vector<32x128xf32>, vector<2x128xf32> -> vector<2x128xf32>
    %94 = arith.addf %92, %93 : vector<2x128xf32>
    %95 = arith.negf %94 : vector<2x128xf32>
    %96 = math.exp %95 : vector<2x128xf32>
    %cst_76 = arith.constant 1.000000e+00 : f32
    %97 = vector.broadcast %cst_76 : f32 to vector<2x128xf32>
    %98 = arith.addf %97, %96 : vector<2x128xf32>
    %99 = arith.divf %97, %98 : vector<2x128xf32>
    %100 = math.tanh %94 : vector<2x128xf32>
    %101 = vector.extract_strided_slice %99 {offsets = [0, 0], sizes = [2, 32], strides = [1, 1]} : vector<2x128xf32> to vector<2x32xf32>
    %102 = vector.extract_strided_slice %99 {offsets = [0, 32], sizes = [2, 32], strides = [1, 1]} : vector<2x128xf32> to vector<2x32xf32>
    %103 = vector.extract_strided_slice %100 {offsets = [0, 64], sizes = [2, 32], strides = [1, 1]} : vector<2x128xf32> to vector<2x32xf32>
    %104 = vector.extract_strided_slice %99 {offsets = [0, 96], sizes = [2, 32], strides = [1, 1]} : vector<2x128xf32> to vector<2x32xf32>
    %105 = arith.mulf %102, %89 : vector<2x32xf32>
    %106 = arith.mulf %101, %103 : vector<2x32xf32>
    %107 = arith.addf %105, %106 : vector<2x32xf32>
    %108 = math.tanh %107 : vector<2x32xf32>
    %109 = arith.mulf %104, %108 : vector<2x32xf32>
    %110 = vector.extract_strided_slice %70 {offsets = [4, 0], sizes = [2, 128], strides = [1, 1]} : vector<64x128xf32> to vector<2x128xf32>
    %cst_77 = arith.constant dense<0.000000e+00> : vector<2x128xf32>
    %111 = tpu.matmul %109, %71, %cst_77 {dimension_numbers = #tpu.dot_dimension_numbers<[1], [0], [0], [1], [0, 0, 1, 1], [], []>} : vector<2x32xf32>, vector<32x128xf32>, vector<2x128xf32> -> vector<2x128xf32>
    %112 = arith.addf %110, %111 : vector<2x128xf32>
    %113 = arith.negf %112 : vector<2x128xf32>
    %114 = math.exp %113 : vector<2x128xf32>
    %cst_78 = arith.constant 1.000000e+00 : f32
    %115 = vector.broadcast %cst_78 : f32 to vector<2x128xf32>
    %116 = arith.addf %115, %114 : vector<2x128xf32>
    %117 = arith.divf %115, %116 : vector<2x128xf32>
    %118 = math.tanh %112 : vector<2x128xf32>
    %119 = vector.extract_strided_slice %117 {offsets = [0, 0], sizes = [2, 32], strides = [1, 1]} : vector<2x128xf32> to vector<2x32xf32>
    %120 = vector.extract_strided_slice %117 {offsets = [0, 32], sizes = [2, 32], strides = [1, 1]} : vector<2x128xf32> to vector<2x32xf32>
    %121 = vector.extract_strided_slice %118 {offsets = [0, 64], sizes = [2, 32], strides = [1, 1]} : vector<2x128xf32> to vector<2x32xf32>
    %122 = vector.extract_strided_slice %117 {offsets = [0, 96], sizes = [2, 32], strides = [1, 1]} : vector<2x128xf32> to vector<2x32xf32>
    %123 = arith.mulf %120, %107 : vector<2x32xf32>
    %124 = arith.mulf %119, %121 : vector<2x32xf32>
    %125 = arith.addf %123, %124 : vector<2x32xf32>
    %126 = math.tanh %125 : vector<2x32xf32>
    %127 = arith.mulf %122, %126 : vector<2x32xf32>
    %128 = vector.extract_strided_slice %70 {offsets = [6, 0], sizes = [2, 128], strides = [1, 1]} : vector<64x128xf32> to vector<2x128xf32>
    %cst_79 = arith.constant dense<0.000000e+00> : vector<2x128xf32>
    %129 = tpu.matmul %127, %71, %cst_79 {dimension_numbers = #tpu.dot_dimension_numbers<[1], [0], [0], [1], [0, 0, 1, 1], [], []>} : vector<2x32xf32>, vector<32x128xf32>, vector<2x128xf32> -> vector<2x128xf32>
    %130 = arith.addf %128, %129 : vector<2x128xf32>
    %131 = arith.negf %130 : vector<2x128xf32>
    %132 = math.exp %131 : vector<2x128xf32>
    %cst_80 = arith.constant 1.000000e+00 : f32
    %133 = vector.broadcast %cst_80 : f32 to vector<2x128xf32>
    %134 = arith.addf %133, %132 : vector<2x128xf32>
    %135 = arith.divf %133, %134 : vector<2x128xf32>
    %136 = math.tanh %130 : vector<2x128xf32>
    %137 = vector.extract_strided_slice %135 {offsets = [0, 0], sizes = [2, 32], strides = [1, 1]} : vector<2x128xf32> to vector<2x32xf32>
    %138 = vector.extract_strided_slice %135 {offsets = [0, 32], sizes = [2, 32], strides = [1, 1]} : vector<2x128xf32> to vector<2x32xf32>
    %139 = vector.extract_strided_slice %136 {offsets = [0, 64], sizes = [2, 32], strides = [1, 1]} : vector<2x128xf32> to vector<2x32xf32>
    %140 = vector.extract_strided_slice %135 {offsets = [0, 96], sizes = [2, 32], strides = [1, 1]} : vector<2x128xf32> to vector<2x32xf32>
    %141 = arith.mulf %138, %125 : vector<2x32xf32>
    %142 = arith.mulf %137, %139 : vector<2x32xf32>
    %143 = arith.addf %141, %142 : vector<2x32xf32>
    %144 = math.tanh %143 : vector<2x32xf32>
    %145 = arith.mulf %140, %144 : vector<2x32xf32>
    %146 = vector.extract_strided_slice %70 {offsets = [8, 0], sizes = [2, 128], strides = [1, 1]} : vector<64x128xf32> to vector<2x128xf32>
    %cst_81 = arith.constant dense<0.000000e+00> : vector<2x128xf32>
    %147 = tpu.matmul %145, %71, %cst_81 {dimension_numbers = #tpu.dot_dimension_numbers<[1], [0], [0], [1], [0, 0, 1, 1], [], []>} : vector<2x32xf32>, vector<32x128xf32>, vector<2x128xf32> -> vector<2x128xf32>
    %148 = arith.addf %146, %147 : vector<2x128xf32>
    %149 = arith.negf %148 : vector<2x128xf32>
    %150 = math.exp %149 : vector<2x128xf32>
    %cst_82 = arith.constant 1.000000e+00 : f32
    %151 = vector.broadcast %cst_82 : f32 to vector<2x128xf32>
    %152 = arith.addf %151, %150 : vector<2x128xf32>
    %153 = arith.divf %151, %152 : vector<2x128xf32>
    %154 = math.tanh %148 : vector<2x128xf32>
    %155 = vector.extract_strided_slice %153 {offsets = [0, 0], sizes = [2, 32], strides = [1, 1]} : vector<2x128xf32> to vector<2x32xf32>
    %156 = vector.extract_strided_slice %153 {offsets = [0, 32], sizes = [2, 32], strides = [1, 1]} : vector<2x128xf32> to vector<2x32xf32>
    %157 = vector.extract_strided_slice %154 {offsets = [0, 64], sizes = [2, 32], strides = [1, 1]} : vector<2x128xf32> to vector<2x32xf32>
    %158 = vector.extract_strided_slice %153 {offsets = [0, 96], sizes = [2, 32], strides = [1, 1]} : vector<2x128xf32> to vector<2x32xf32>
    %159 = arith.mulf %156, %143 : vector<2x32xf32>
    %160 = arith.mulf %155, %157 : vector<2x32xf32>
    %161 = arith.addf %159, %160 : vector<2x32xf32>
    %162 = math.tanh %161 : vector<2x32xf32>
    %163 = arith.mulf %158, %162 : vector<2x32xf32>
    %164 = vector.extract_strided_slice %70 {offsets = [10, 0], sizes = [2, 128], strides = [1, 1]} : vector<64x128xf32> to vector<2x128xf32>
    %cst_83 = arith.constant dense<0.000000e+00> : vector<2x128xf32>
    %165 = tpu.matmul %163, %71, %cst_83 {dimension_numbers = #tpu.dot_dimension_numbers<[1], [0], [0], [1], [0, 0, 1, 1], [], []>} : vector<2x32xf32>, vector<32x128xf32>, vector<2x128xf32> -> vector<2x128xf32>
    %166 = arith.addf %164, %165 : vector<2x128xf32>
    %167 = arith.negf %166 : vector<2x128xf32>
    %168 = math.exp %167 : vector<2x128xf32>
    %cst_84 = arith.constant 1.000000e+00 : f32
    %169 = vector.broadcast %cst_84 : f32 to vector<2x128xf32>
    %170 = arith.addf %169, %168 : vector<2x128xf32>
    %171 = arith.divf %169, %170 : vector<2x128xf32>
    %172 = math.tanh %166 : vector<2x128xf32>
    %173 = vector.extract_strided_slice %171 {offsets = [0, 0], sizes = [2, 32], strides = [1, 1]} : vector<2x128xf32> to vector<2x32xf32>
    %174 = vector.extract_strided_slice %171 {offsets = [0, 32], sizes = [2, 32], strides = [1, 1]} : vector<2x128xf32> to vector<2x32xf32>
    %175 = vector.extract_strided_slice %172 {offsets = [0, 64], sizes = [2, 32], strides = [1, 1]} : vector<2x128xf32> to vector<2x32xf32>
    %176 = vector.extract_strided_slice %171 {offsets = [0, 96], sizes = [2, 32], strides = [1, 1]} : vector<2x128xf32> to vector<2x32xf32>
    %177 = arith.mulf %174, %161 : vector<2x32xf32>
    %178 = arith.mulf %173, %175 : vector<2x32xf32>
    %179 = arith.addf %177, %178 : vector<2x32xf32>
    %180 = math.tanh %179 : vector<2x32xf32>
    %181 = arith.mulf %176, %180 : vector<2x32xf32>
    %182 = vector.extract_strided_slice %70 {offsets = [12, 0], sizes = [2, 128], strides = [1, 1]} : vector<64x128xf32> to vector<2x128xf32>
    %cst_85 = arith.constant dense<0.000000e+00> : vector<2x128xf32>
    %183 = tpu.matmul %181, %71, %cst_85 {dimension_numbers = #tpu.dot_dimension_numbers<[1], [0], [0], [1], [0, 0, 1, 1], [], []>} : vector<2x32xf32>, vector<32x128xf32>, vector<2x128xf32> -> vector<2x128xf32>
    %184 = arith.addf %182, %183 : vector<2x128xf32>
    %185 = arith.negf %184 : vector<2x128xf32>
    %186 = math.exp %185 : vector<2x128xf32>
    %cst_86 = arith.constant 1.000000e+00 : f32
    %187 = vector.broadcast %cst_86 : f32 to vector<2x128xf32>
    %188 = arith.addf %187, %186 : vector<2x128xf32>
    %189 = arith.divf %187, %188 : vector<2x128xf32>
    %190 = math.tanh %184 : vector<2x128xf32>
    %191 = vector.extract_strided_slice %189 {offsets = [0, 0], sizes = [2, 32], strides = [1, 1]} : vector<2x128xf32> to vector<2x32xf32>
    %192 = vector.extract_strided_slice %189 {offsets = [0, 32], sizes = [2, 32], strides = [1, 1]} : vector<2x128xf32> to vector<2x32xf32>
    %193 = vector.extract_strided_slice %190 {offsets = [0, 64], sizes = [2, 32], strides = [1, 1]} : vector<2x128xf32> to vector<2x32xf32>
    %194 = vector.extract_strided_slice %189 {offsets = [0, 96], sizes = [2, 32], strides = [1, 1]} : vector<2x128xf32> to vector<2x32xf32>
    %195 = arith.mulf %192, %179 : vector<2x32xf32>
    %196 = arith.mulf %191, %193 : vector<2x32xf32>
    %197 = arith.addf %195, %196 : vector<2x32xf32>
    %198 = math.tanh %197 : vector<2x32xf32>
    %199 = arith.mulf %194, %198 : vector<2x32xf32>
    %200 = vector.extract_strided_slice %70 {offsets = [14, 0], sizes = [2, 128], strides = [1, 1]} : vector<64x128xf32> to vector<2x128xf32>
    %cst_87 = arith.constant dense<0.000000e+00> : vector<2x128xf32>
    %201 = tpu.matmul %199, %71, %cst_87 {dimension_numbers = #tpu.dot_dimension_numbers<[1], [0], [0], [1], [0, 0, 1, 1], [], []>} : vector<2x32xf32>, vector<32x128xf32>, vector<2x128xf32> -> vector<2x128xf32>
    %202 = arith.addf %200, %201 : vector<2x128xf32>
    %203 = arith.negf %202 : vector<2x128xf32>
    %204 = math.exp %203 : vector<2x128xf32>
    %cst_88 = arith.constant 1.000000e+00 : f32
    %205 = vector.broadcast %cst_88 : f32 to vector<2x128xf32>
    %206 = arith.addf %205, %204 : vector<2x128xf32>
    %207 = arith.divf %205, %206 : vector<2x128xf32>
    %208 = math.tanh %202 : vector<2x128xf32>
    %209 = vector.extract_strided_slice %207 {offsets = [0, 0], sizes = [2, 32], strides = [1, 1]} : vector<2x128xf32> to vector<2x32xf32>
    %210 = vector.extract_strided_slice %207 {offsets = [0, 32], sizes = [2, 32], strides = [1, 1]} : vector<2x128xf32> to vector<2x32xf32>
    %211 = vector.extract_strided_slice %208 {offsets = [0, 64], sizes = [2, 32], strides = [1, 1]} : vector<2x128xf32> to vector<2x32xf32>
    %212 = vector.extract_strided_slice %207 {offsets = [0, 96], sizes = [2, 32], strides = [1, 1]} : vector<2x128xf32> to vector<2x32xf32>
    %213 = arith.mulf %210, %197 : vector<2x32xf32>
    %214 = arith.mulf %209, %211 : vector<2x32xf32>
    %215 = arith.addf %213, %214 : vector<2x32xf32>
    %216 = math.tanh %215 : vector<2x32xf32>
    %217 = arith.mulf %212, %216 : vector<2x32xf32>
    %218 = vector.extract_strided_slice %70 {offsets = [16, 0], sizes = [2, 128], strides = [1, 1]} : vector<64x128xf32> to vector<2x128xf32>
    %cst_89 = arith.constant dense<0.000000e+00> : vector<2x128xf32>
    %219 = tpu.matmul %217, %71, %cst_89 {dimension_numbers = #tpu.dot_dimension_numbers<[1], [0], [0], [1], [0, 0, 1, 1], [], []>} : vector<2x32xf32>, vector<32x128xf32>, vector<2x128xf32> -> vector<2x128xf32>
    %220 = arith.addf %218, %219 : vector<2x128xf32>
    %221 = arith.negf %220 : vector<2x128xf32>
    %222 = math.exp %221 : vector<2x128xf32>
    %cst_90 = arith.constant 1.000000e+00 : f32
    %223 = vector.broadcast %cst_90 : f32 to vector<2x128xf32>
    %224 = arith.addf %223, %222 : vector<2x128xf32>
    %225 = arith.divf %223, %224 : vector<2x128xf32>
    %226 = math.tanh %220 : vector<2x128xf32>
    %227 = vector.extract_strided_slice %225 {offsets = [0, 0], sizes = [2, 32], strides = [1, 1]} : vector<2x128xf32> to vector<2x32xf32>
    %228 = vector.extract_strided_slice %225 {offsets = [0, 32], sizes = [2, 32], strides = [1, 1]} : vector<2x128xf32> to vector<2x32xf32>
    %229 = vector.extract_strided_slice %226 {offsets = [0, 64], sizes = [2, 32], strides = [1, 1]} : vector<2x128xf32> to vector<2x32xf32>
    %230 = vector.extract_strided_slice %225 {offsets = [0, 96], sizes = [2, 32], strides = [1, 1]} : vector<2x128xf32> to vector<2x32xf32>
    %231 = arith.mulf %228, %215 : vector<2x32xf32>
    %232 = arith.mulf %227, %229 : vector<2x32xf32>
    %233 = arith.addf %231, %232 : vector<2x32xf32>
    %234 = math.tanh %233 : vector<2x32xf32>
    %235 = arith.mulf %230, %234 : vector<2x32xf32>
    %236 = vector.extract_strided_slice %70 {offsets = [18, 0], sizes = [2, 128], strides = [1, 1]} : vector<64x128xf32> to vector<2x128xf32>
    %cst_91 = arith.constant dense<0.000000e+00> : vector<2x128xf32>
    %237 = tpu.matmul %235, %71, %cst_91 {dimension_numbers = #tpu.dot_dimension_numbers<[1], [0], [0], [1], [0, 0, 1, 1], [], []>} : vector<2x32xf32>, vector<32x128xf32>, vector<2x128xf32> -> vector<2x128xf32>
    %238 = arith.addf %236, %237 : vector<2x128xf32>
    %239 = arith.negf %238 : vector<2x128xf32>
    %240 = math.exp %239 : vector<2x128xf32>
    %cst_92 = arith.constant 1.000000e+00 : f32
    %241 = vector.broadcast %cst_92 : f32 to vector<2x128xf32>
    %242 = arith.addf %241, %240 : vector<2x128xf32>
    %243 = arith.divf %241, %242 : vector<2x128xf32>
    %244 = math.tanh %238 : vector<2x128xf32>
    %245 = vector.extract_strided_slice %243 {offsets = [0, 0], sizes = [2, 32], strides = [1, 1]} : vector<2x128xf32> to vector<2x32xf32>
    %246 = vector.extract_strided_slice %243 {offsets = [0, 32], sizes = [2, 32], strides = [1, 1]} : vector<2x128xf32> to vector<2x32xf32>
    %247 = vector.extract_strided_slice %244 {offsets = [0, 64], sizes = [2, 32], strides = [1, 1]} : vector<2x128xf32> to vector<2x32xf32>
    %248 = vector.extract_strided_slice %243 {offsets = [0, 96], sizes = [2, 32], strides = [1, 1]} : vector<2x128xf32> to vector<2x32xf32>
    %249 = arith.mulf %246, %233 : vector<2x32xf32>
    %250 = arith.mulf %245, %247 : vector<2x32xf32>
    %251 = arith.addf %249, %250 : vector<2x32xf32>
    %252 = math.tanh %251 : vector<2x32xf32>
    %253 = arith.mulf %248, %252 : vector<2x32xf32>
    %254 = vector.extract_strided_slice %70 {offsets = [20, 0], sizes = [2, 128], strides = [1, 1]} : vector<64x128xf32> to vector<2x128xf32>
    %cst_93 = arith.constant dense<0.000000e+00> : vector<2x128xf32>
    %255 = tpu.matmul %253, %71, %cst_93 {dimension_numbers = #tpu.dot_dimension_numbers<[1], [0], [0], [1], [0, 0, 1, 1], [], []>} : vector<2x32xf32>, vector<32x128xf32>, vector<2x128xf32> -> vector<2x128xf32>
    %256 = arith.addf %254, %255 : vector<2x128xf32>
    %257 = arith.negf %256 : vector<2x128xf32>
    %258 = math.exp %257 : vector<2x128xf32>
    %cst_94 = arith.constant 1.000000e+00 : f32
    %259 = vector.broadcast %cst_94 : f32 to vector<2x128xf32>
    %260 = arith.addf %259, %258 : vector<2x128xf32>
    %261 = arith.divf %259, %260 : vector<2x128xf32>
    %262 = math.tanh %256 : vector<2x128xf32>
    %263 = vector.extract_strided_slice %261 {offsets = [0, 0], sizes = [2, 32], strides = [1, 1]} : vector<2x128xf32> to vector<2x32xf32>
    %264 = vector.extract_strided_slice %261 {offsets = [0, 32], sizes = [2, 32], strides = [1, 1]} : vector<2x128xf32> to vector<2x32xf32>
    %265 = vector.extract_strided_slice %262 {offsets = [0, 64], sizes = [2, 32], strides = [1, 1]} : vector<2x128xf32> to vector<2x32xf32>
    %266 = vector.extract_strided_slice %261 {offsets = [0, 96], sizes = [2, 32], strides = [1, 1]} : vector<2x128xf32> to vector<2x32xf32>
    %267 = arith.mulf %264, %251 : vector<2x32xf32>
    %268 = arith.mulf %263, %265 : vector<2x32xf32>
    %269 = arith.addf %267, %268 : vector<2x32xf32>
    %270 = math.tanh %269 : vector<2x32xf32>
    %271 = arith.mulf %266, %270 : vector<2x32xf32>
    %272 = vector.extract_strided_slice %70 {offsets = [22, 0], sizes = [2, 128], strides = [1, 1]} : vector<64x128xf32> to vector<2x128xf32>
    %cst_95 = arith.constant dense<0.000000e+00> : vector<2x128xf32>
    %273 = tpu.matmul %271, %71, %cst_95 {dimension_numbers = #tpu.dot_dimension_numbers<[1], [0], [0], [1], [0, 0, 1, 1], [], []>} : vector<2x32xf32>, vector<32x128xf32>, vector<2x128xf32> -> vector<2x128xf32>
    %274 = arith.addf %272, %273 : vector<2x128xf32>
    %275 = arith.negf %274 : vector<2x128xf32>
    %276 = math.exp %275 : vector<2x128xf32>
    %cst_96 = arith.constant 1.000000e+00 : f32
    %277 = vector.broadcast %cst_96 : f32 to vector<2x128xf32>
    %278 = arith.addf %277, %276 : vector<2x128xf32>
    %279 = arith.divf %277, %278 : vector<2x128xf32>
    %280 = math.tanh %274 : vector<2x128xf32>
    %281 = vector.extract_strided_slice %279 {offsets = [0, 0], sizes = [2, 32], strides = [1, 1]} : vector<2x128xf32> to vector<2x32xf32>
    %282 = vector.extract_strided_slice %279 {offsets = [0, 32], sizes = [2, 32], strides = [1, 1]} : vector<2x128xf32> to vector<2x32xf32>
    %283 = vector.extract_strided_slice %280 {offsets = [0, 64], sizes = [2, 32], strides = [1, 1]} : vector<2x128xf32> to vector<2x32xf32>
    %284 = vector.extract_strided_slice %279 {offsets = [0, 96], sizes = [2, 32], strides = [1, 1]} : vector<2x128xf32> to vector<2x32xf32>
    %285 = arith.mulf %282, %269 : vector<2x32xf32>
    %286 = arith.mulf %281, %283 : vector<2x32xf32>
    %287 = arith.addf %285, %286 : vector<2x32xf32>
    %288 = math.tanh %287 : vector<2x32xf32>
    %289 = arith.mulf %284, %288 : vector<2x32xf32>
    %290 = vector.extract_strided_slice %70 {offsets = [24, 0], sizes = [2, 128], strides = [1, 1]} : vector<64x128xf32> to vector<2x128xf32>
    %cst_97 = arith.constant dense<0.000000e+00> : vector<2x128xf32>
    %291 = tpu.matmul %289, %71, %cst_97 {dimension_numbers = #tpu.dot_dimension_numbers<[1], [0], [0], [1], [0, 0, 1, 1], [], []>} : vector<2x32xf32>, vector<32x128xf32>, vector<2x128xf32> -> vector<2x128xf32>
    %292 = arith.addf %290, %291 : vector<2x128xf32>
    %293 = arith.negf %292 : vector<2x128xf32>
    %294 = math.exp %293 : vector<2x128xf32>
    %cst_98 = arith.constant 1.000000e+00 : f32
    %295 = vector.broadcast %cst_98 : f32 to vector<2x128xf32>
    %296 = arith.addf %295, %294 : vector<2x128xf32>
    %297 = arith.divf %295, %296 : vector<2x128xf32>
    %298 = math.tanh %292 : vector<2x128xf32>
    %299 = vector.extract_strided_slice %297 {offsets = [0, 0], sizes = [2, 32], strides = [1, 1]} : vector<2x128xf32> to vector<2x32xf32>
    %300 = vector.extract_strided_slice %297 {offsets = [0, 32], sizes = [2, 32], strides = [1, 1]} : vector<2x128xf32> to vector<2x32xf32>
    %301 = vector.extract_strided_slice %298 {offsets = [0, 64], sizes = [2, 32], strides = [1, 1]} : vector<2x128xf32> to vector<2x32xf32>
    %302 = vector.extract_strided_slice %297 {offsets = [0, 96], sizes = [2, 32], strides = [1, 1]} : vector<2x128xf32> to vector<2x32xf32>
    %303 = arith.mulf %300, %287 : vector<2x32xf32>
    %304 = arith.mulf %299, %301 : vector<2x32xf32>
    %305 = arith.addf %303, %304 : vector<2x32xf32>
    %306 = math.tanh %305 : vector<2x32xf32>
    %307 = arith.mulf %302, %306 : vector<2x32xf32>
    %308 = vector.extract_strided_slice %70 {offsets = [26, 0], sizes = [2, 128], strides = [1, 1]} : vector<64x128xf32> to vector<2x128xf32>
    %cst_99 = arith.constant dense<0.000000e+00> : vector<2x128xf32>
    %309 = tpu.matmul %307, %71, %cst_99 {dimension_numbers = #tpu.dot_dimension_numbers<[1], [0], [0], [1], [0, 0, 1, 1], [], []>} : vector<2x32xf32>, vector<32x128xf32>, vector<2x128xf32> -> vector<2x128xf32>
    %310 = arith.addf %308, %309 : vector<2x128xf32>
    %311 = arith.negf %310 : vector<2x128xf32>
    %312 = math.exp %311 : vector<2x128xf32>
    %cst_100 = arith.constant 1.000000e+00 : f32
    %313 = vector.broadcast %cst_100 : f32 to vector<2x128xf32>
    %314 = arith.addf %313, %312 : vector<2x128xf32>
    %315 = arith.divf %313, %314 : vector<2x128xf32>
    %316 = math.tanh %310 : vector<2x128xf32>
    %317 = vector.extract_strided_slice %315 {offsets = [0, 0], sizes = [2, 32], strides = [1, 1]} : vector<2x128xf32> to vector<2x32xf32>
    %318 = vector.extract_strided_slice %315 {offsets = [0, 32], sizes = [2, 32], strides = [1, 1]} : vector<2x128xf32> to vector<2x32xf32>
    %319 = vector.extract_strided_slice %316 {offsets = [0, 64], sizes = [2, 32], strides = [1, 1]} : vector<2x128xf32> to vector<2x32xf32>
    %320 = vector.extract_strided_slice %315 {offsets = [0, 96], sizes = [2, 32], strides = [1, 1]} : vector<2x128xf32> to vector<2x32xf32>
    %321 = arith.mulf %318, %305 : vector<2x32xf32>
    %322 = arith.mulf %317, %319 : vector<2x32xf32>
    %323 = arith.addf %321, %322 : vector<2x32xf32>
    %324 = math.tanh %323 : vector<2x32xf32>
    %325 = arith.mulf %320, %324 : vector<2x32xf32>
    %326 = vector.extract_strided_slice %70 {offsets = [28, 0], sizes = [2, 128], strides = [1, 1]} : vector<64x128xf32> to vector<2x128xf32>
    %cst_101 = arith.constant dense<0.000000e+00> : vector<2x128xf32>
    %327 = tpu.matmul %325, %71, %cst_101 {dimension_numbers = #tpu.dot_dimension_numbers<[1], [0], [0], [1], [0, 0, 1, 1], [], []>} : vector<2x32xf32>, vector<32x128xf32>, vector<2x128xf32> -> vector<2x128xf32>
    %328 = arith.addf %326, %327 : vector<2x128xf32>
    %329 = arith.negf %328 : vector<2x128xf32>
    %330 = math.exp %329 : vector<2x128xf32>
    %cst_102 = arith.constant 1.000000e+00 : f32
    %331 = vector.broadcast %cst_102 : f32 to vector<2x128xf32>
    %332 = arith.addf %331, %330 : vector<2x128xf32>
    %333 = arith.divf %331, %332 : vector<2x128xf32>
    %334 = math.tanh %328 : vector<2x128xf32>
    %335 = vector.extract_strided_slice %333 {offsets = [0, 0], sizes = [2, 32], strides = [1, 1]} : vector<2x128xf32> to vector<2x32xf32>
    %336 = vector.extract_strided_slice %333 {offsets = [0, 32], sizes = [2, 32], strides = [1, 1]} : vector<2x128xf32> to vector<2x32xf32>
    %337 = vector.extract_strided_slice %334 {offsets = [0, 64], sizes = [2, 32], strides = [1, 1]} : vector<2x128xf32> to vector<2x32xf32>
    %338 = vector.extract_strided_slice %333 {offsets = [0, 96], sizes = [2, 32], strides = [1, 1]} : vector<2x128xf32> to vector<2x32xf32>
    %339 = arith.mulf %336, %323 : vector<2x32xf32>
    %340 = arith.mulf %335, %337 : vector<2x32xf32>
    %341 = arith.addf %339, %340 : vector<2x32xf32>
    %342 = math.tanh %341 : vector<2x32xf32>
    %343 = arith.mulf %338, %342 : vector<2x32xf32>
    %344 = vector.extract_strided_slice %70 {offsets = [30, 0], sizes = [2, 128], strides = [1, 1]} : vector<64x128xf32> to vector<2x128xf32>
    %cst_103 = arith.constant dense<0.000000e+00> : vector<2x128xf32>
    %345 = tpu.matmul %343, %71, %cst_103 {dimension_numbers = #tpu.dot_dimension_numbers<[1], [0], [0], [1], [0, 0, 1, 1], [], []>} : vector<2x32xf32>, vector<32x128xf32>, vector<2x128xf32> -> vector<2x128xf32>
    %346 = arith.addf %344, %345 : vector<2x128xf32>
    %347 = arith.negf %346 : vector<2x128xf32>
    %348 = math.exp %347 : vector<2x128xf32>
    %cst_104 = arith.constant 1.000000e+00 : f32
    %349 = vector.broadcast %cst_104 : f32 to vector<2x128xf32>
    %350 = arith.addf %349, %348 : vector<2x128xf32>
    %351 = arith.divf %349, %350 : vector<2x128xf32>
    %352 = math.tanh %346 : vector<2x128xf32>
    %353 = vector.extract_strided_slice %351 {offsets = [0, 0], sizes = [2, 32], strides = [1, 1]} : vector<2x128xf32> to vector<2x32xf32>
    %354 = vector.extract_strided_slice %351 {offsets = [0, 32], sizes = [2, 32], strides = [1, 1]} : vector<2x128xf32> to vector<2x32xf32>
    %355 = vector.extract_strided_slice %352 {offsets = [0, 64], sizes = [2, 32], strides = [1, 1]} : vector<2x128xf32> to vector<2x32xf32>
    %356 = vector.extract_strided_slice %351 {offsets = [0, 96], sizes = [2, 32], strides = [1, 1]} : vector<2x128xf32> to vector<2x32xf32>
    %357 = arith.mulf %354, %341 : vector<2x32xf32>
    %358 = arith.mulf %353, %355 : vector<2x32xf32>
    %359 = arith.addf %357, %358 : vector<2x32xf32>
    %360 = math.tanh %359 : vector<2x32xf32>
    %361 = arith.mulf %356, %360 : vector<2x32xf32>
    %362 = vector.extract_strided_slice %70 {offsets = [32, 0], sizes = [2, 128], strides = [1, 1]} : vector<64x128xf32> to vector<2x128xf32>
    %cst_105 = arith.constant dense<0.000000e+00> : vector<2x128xf32>
    %363 = tpu.matmul %361, %71, %cst_105 {dimension_numbers = #tpu.dot_dimension_numbers<[1], [0], [0], [1], [0, 0, 1, 1], [], []>} : vector<2x32xf32>, vector<32x128xf32>, vector<2x128xf32> -> vector<2x128xf32>
    %364 = arith.addf %362, %363 : vector<2x128xf32>
    %365 = arith.negf %364 : vector<2x128xf32>
    %366 = math.exp %365 : vector<2x128xf32>
    %cst_106 = arith.constant 1.000000e+00 : f32
    %367 = vector.broadcast %cst_106 : f32 to vector<2x128xf32>
    %368 = arith.addf %367, %366 : vector<2x128xf32>
    %369 = arith.divf %367, %368 : vector<2x128xf32>
    %370 = math.tanh %364 : vector<2x128xf32>
    %371 = vector.extract_strided_slice %369 {offsets = [0, 0], sizes = [2, 32], strides = [1, 1]} : vector<2x128xf32> to vector<2x32xf32>
    %372 = vector.extract_strided_slice %369 {offsets = [0, 32], sizes = [2, 32], strides = [1, 1]} : vector<2x128xf32> to vector<2x32xf32>
    %373 = vector.extract_strided_slice %370 {offsets = [0, 64], sizes = [2, 32], strides = [1, 1]} : vector<2x128xf32> to vector<2x32xf32>
    %374 = vector.extract_strided_slice %369 {offsets = [0, 96], sizes = [2, 32], strides = [1, 1]} : vector<2x128xf32> to vector<2x32xf32>
    %375 = arith.mulf %372, %359 : vector<2x32xf32>
    %376 = arith.mulf %371, %373 : vector<2x32xf32>
    %377 = arith.addf %375, %376 : vector<2x32xf32>
    %378 = math.tanh %377 : vector<2x32xf32>
    %379 = arith.mulf %374, %378 : vector<2x32xf32>
    %380 = vector.extract_strided_slice %70 {offsets = [34, 0], sizes = [2, 128], strides = [1, 1]} : vector<64x128xf32> to vector<2x128xf32>
    %cst_107 = arith.constant dense<0.000000e+00> : vector<2x128xf32>
    %381 = tpu.matmul %379, %71, %cst_107 {dimension_numbers = #tpu.dot_dimension_numbers<[1], [0], [0], [1], [0, 0, 1, 1], [], []>} : vector<2x32xf32>, vector<32x128xf32>, vector<2x128xf32> -> vector<2x128xf32>
    %382 = arith.addf %380, %381 : vector<2x128xf32>
    %383 = arith.negf %382 : vector<2x128xf32>
    %384 = math.exp %383 : vector<2x128xf32>
    %cst_108 = arith.constant 1.000000e+00 : f32
    %385 = vector.broadcast %cst_108 : f32 to vector<2x128xf32>
    %386 = arith.addf %385, %384 : vector<2x128xf32>
    %387 = arith.divf %385, %386 : vector<2x128xf32>
    %388 = math.tanh %382 : vector<2x128xf32>
    %389 = vector.extract_strided_slice %387 {offsets = [0, 0], sizes = [2, 32], strides = [1, 1]} : vector<2x128xf32> to vector<2x32xf32>
    %390 = vector.extract_strided_slice %387 {offsets = [0, 32], sizes = [2, 32], strides = [1, 1]} : vector<2x128xf32> to vector<2x32xf32>
    %391 = vector.extract_strided_slice %388 {offsets = [0, 64], sizes = [2, 32], strides = [1, 1]} : vector<2x128xf32> to vector<2x32xf32>
    %392 = vector.extract_strided_slice %387 {offsets = [0, 96], sizes = [2, 32], strides = [1, 1]} : vector<2x128xf32> to vector<2x32xf32>
    %393 = arith.mulf %390, %377 : vector<2x32xf32>
    %394 = arith.mulf %389, %391 : vector<2x32xf32>
    %395 = arith.addf %393, %394 : vector<2x32xf32>
    %396 = math.tanh %395 : vector<2x32xf32>
    %397 = arith.mulf %392, %396 : vector<2x32xf32>
    %398 = vector.extract_strided_slice %70 {offsets = [36, 0], sizes = [2, 128], strides = [1, 1]} : vector<64x128xf32> to vector<2x128xf32>
    %cst_109 = arith.constant dense<0.000000e+00> : vector<2x128xf32>
    %399 = tpu.matmul %397, %71, %cst_109 {dimension_numbers = #tpu.dot_dimension_numbers<[1], [0], [0], [1], [0, 0, 1, 1], [], []>} : vector<2x32xf32>, vector<32x128xf32>, vector<2x128xf32> -> vector<2x128xf32>
    %400 = arith.addf %398, %399 : vector<2x128xf32>
    %401 = arith.negf %400 : vector<2x128xf32>
    %402 = math.exp %401 : vector<2x128xf32>
    %cst_110 = arith.constant 1.000000e+00 : f32
    %403 = vector.broadcast %cst_110 : f32 to vector<2x128xf32>
    %404 = arith.addf %403, %402 : vector<2x128xf32>
    %405 = arith.divf %403, %404 : vector<2x128xf32>
    %406 = math.tanh %400 : vector<2x128xf32>
    %407 = vector.extract_strided_slice %405 {offsets = [0, 0], sizes = [2, 32], strides = [1, 1]} : vector<2x128xf32> to vector<2x32xf32>
    %408 = vector.extract_strided_slice %405 {offsets = [0, 32], sizes = [2, 32], strides = [1, 1]} : vector<2x128xf32> to vector<2x32xf32>
    %409 = vector.extract_strided_slice %406 {offsets = [0, 64], sizes = [2, 32], strides = [1, 1]} : vector<2x128xf32> to vector<2x32xf32>
    %410 = vector.extract_strided_slice %405 {offsets = [0, 96], sizes = [2, 32], strides = [1, 1]} : vector<2x128xf32> to vector<2x32xf32>
    %411 = arith.mulf %408, %395 : vector<2x32xf32>
    %412 = arith.mulf %407, %409 : vector<2x32xf32>
    %413 = arith.addf %411, %412 : vector<2x32xf32>
    %414 = math.tanh %413 : vector<2x32xf32>
    %415 = arith.mulf %410, %414 : vector<2x32xf32>
    %416 = vector.extract_strided_slice %70 {offsets = [38, 0], sizes = [2, 128], strides = [1, 1]} : vector<64x128xf32> to vector<2x128xf32>
    %cst_111 = arith.constant dense<0.000000e+00> : vector<2x128xf32>
    %417 = tpu.matmul %415, %71, %cst_111 {dimension_numbers = #tpu.dot_dimension_numbers<[1], [0], [0], [1], [0, 0, 1, 1], [], []>} : vector<2x32xf32>, vector<32x128xf32>, vector<2x128xf32> -> vector<2x128xf32>
    %418 = arith.addf %416, %417 : vector<2x128xf32>
    %419 = arith.negf %418 : vector<2x128xf32>
    %420 = math.exp %419 : vector<2x128xf32>
    %cst_112 = arith.constant 1.000000e+00 : f32
    %421 = vector.broadcast %cst_112 : f32 to vector<2x128xf32>
    %422 = arith.addf %421, %420 : vector<2x128xf32>
    %423 = arith.divf %421, %422 : vector<2x128xf32>
    %424 = math.tanh %418 : vector<2x128xf32>
    %425 = vector.extract_strided_slice %423 {offsets = [0, 0], sizes = [2, 32], strides = [1, 1]} : vector<2x128xf32> to vector<2x32xf32>
    %426 = vector.extract_strided_slice %423 {offsets = [0, 32], sizes = [2, 32], strides = [1, 1]} : vector<2x128xf32> to vector<2x32xf32>
    %427 = vector.extract_strided_slice %424 {offsets = [0, 64], sizes = [2, 32], strides = [1, 1]} : vector<2x128xf32> to vector<2x32xf32>
    %428 = vector.extract_strided_slice %423 {offsets = [0, 96], sizes = [2, 32], strides = [1, 1]} : vector<2x128xf32> to vector<2x32xf32>
    %429 = arith.mulf %426, %413 : vector<2x32xf32>
    %430 = arith.mulf %425, %427 : vector<2x32xf32>
    %431 = arith.addf %429, %430 : vector<2x32xf32>
    %432 = math.tanh %431 : vector<2x32xf32>
    %433 = arith.mulf %428, %432 : vector<2x32xf32>
    %434 = vector.extract_strided_slice %70 {offsets = [40, 0], sizes = [2, 128], strides = [1, 1]} : vector<64x128xf32> to vector<2x128xf32>
    %cst_113 = arith.constant dense<0.000000e+00> : vector<2x128xf32>
    %435 = tpu.matmul %433, %71, %cst_113 {dimension_numbers = #tpu.dot_dimension_numbers<[1], [0], [0], [1], [0, 0, 1, 1], [], []>} : vector<2x32xf32>, vector<32x128xf32>, vector<2x128xf32> -> vector<2x128xf32>
    %436 = arith.addf %434, %435 : vector<2x128xf32>
    %437 = arith.negf %436 : vector<2x128xf32>
    %438 = math.exp %437 : vector<2x128xf32>
    %cst_114 = arith.constant 1.000000e+00 : f32
    %439 = vector.broadcast %cst_114 : f32 to vector<2x128xf32>
    %440 = arith.addf %439, %438 : vector<2x128xf32>
    %441 = arith.divf %439, %440 : vector<2x128xf32>
    %442 = math.tanh %436 : vector<2x128xf32>
    %443 = vector.extract_strided_slice %441 {offsets = [0, 0], sizes = [2, 32], strides = [1, 1]} : vector<2x128xf32> to vector<2x32xf32>
    %444 = vector.extract_strided_slice %441 {offsets = [0, 32], sizes = [2, 32], strides = [1, 1]} : vector<2x128xf32> to vector<2x32xf32>
    %445 = vector.extract_strided_slice %442 {offsets = [0, 64], sizes = [2, 32], strides = [1, 1]} : vector<2x128xf32> to vector<2x32xf32>
    %446 = vector.extract_strided_slice %441 {offsets = [0, 96], sizes = [2, 32], strides = [1, 1]} : vector<2x128xf32> to vector<2x32xf32>
    %447 = arith.mulf %444, %431 : vector<2x32xf32>
    %448 = arith.mulf %443, %445 : vector<2x32xf32>
    %449 = arith.addf %447, %448 : vector<2x32xf32>
    %450 = math.tanh %449 : vector<2x32xf32>
    %451 = arith.mulf %446, %450 : vector<2x32xf32>
    %452 = vector.extract_strided_slice %70 {offsets = [42, 0], sizes = [2, 128], strides = [1, 1]} : vector<64x128xf32> to vector<2x128xf32>
    %cst_115 = arith.constant dense<0.000000e+00> : vector<2x128xf32>
    %453 = tpu.matmul %451, %71, %cst_115 {dimension_numbers = #tpu.dot_dimension_numbers<[1], [0], [0], [1], [0, 0, 1, 1], [], []>} : vector<2x32xf32>, vector<32x128xf32>, vector<2x128xf32> -> vector<2x128xf32>
    %454 = arith.addf %452, %453 : vector<2x128xf32>
    %455 = arith.negf %454 : vector<2x128xf32>
    %456 = math.exp %455 : vector<2x128xf32>
    %cst_116 = arith.constant 1.000000e+00 : f32
    %457 = vector.broadcast %cst_116 : f32 to vector<2x128xf32>
    %458 = arith.addf %457, %456 : vector<2x128xf32>
    %459 = arith.divf %457, %458 : vector<2x128xf32>
    %460 = math.tanh %454 : vector<2x128xf32>
    %461 = vector.extract_strided_slice %459 {offsets = [0, 0], sizes = [2, 32], strides = [1, 1]} : vector<2x128xf32> to vector<2x32xf32>
    %462 = vector.extract_strided_slice %459 {offsets = [0, 32], sizes = [2, 32], strides = [1, 1]} : vector<2x128xf32> to vector<2x32xf32>
    %463 = vector.extract_strided_slice %460 {offsets = [0, 64], sizes = [2, 32], strides = [1, 1]} : vector<2x128xf32> to vector<2x32xf32>
    %464 = vector.extract_strided_slice %459 {offsets = [0, 96], sizes = [2, 32], strides = [1, 1]} : vector<2x128xf32> to vector<2x32xf32>
    %465 = arith.mulf %462, %449 : vector<2x32xf32>
    %466 = arith.mulf %461, %463 : vector<2x32xf32>
    %467 = arith.addf %465, %466 : vector<2x32xf32>
    %468 = math.tanh %467 : vector<2x32xf32>
    %469 = arith.mulf %464, %468 : vector<2x32xf32>
    %470 = vector.extract_strided_slice %70 {offsets = [44, 0], sizes = [2, 128], strides = [1, 1]} : vector<64x128xf32> to vector<2x128xf32>
    %cst_117 = arith.constant dense<0.000000e+00> : vector<2x128xf32>
    %471 = tpu.matmul %469, %71, %cst_117 {dimension_numbers = #tpu.dot_dimension_numbers<[1], [0], [0], [1], [0, 0, 1, 1], [], []>} : vector<2x32xf32>, vector<32x128xf32>, vector<2x128xf32> -> vector<2x128xf32>
    %472 = arith.addf %470, %471 : vector<2x128xf32>
    %473 = arith.negf %472 : vector<2x128xf32>
    %474 = math.exp %473 : vector<2x128xf32>
    %cst_118 = arith.constant 1.000000e+00 : f32
    %475 = vector.broadcast %cst_118 : f32 to vector<2x128xf32>
    %476 = arith.addf %475, %474 : vector<2x128xf32>
    %477 = arith.divf %475, %476 : vector<2x128xf32>
    %478 = math.tanh %472 : vector<2x128xf32>
    %479 = vector.extract_strided_slice %477 {offsets = [0, 0], sizes = [2, 32], strides = [1, 1]} : vector<2x128xf32> to vector<2x32xf32>
    %480 = vector.extract_strided_slice %477 {offsets = [0, 32], sizes = [2, 32], strides = [1, 1]} : vector<2x128xf32> to vector<2x32xf32>
    %481 = vector.extract_strided_slice %478 {offsets = [0, 64], sizes = [2, 32], strides = [1, 1]} : vector<2x128xf32> to vector<2x32xf32>
    %482 = vector.extract_strided_slice %477 {offsets = [0, 96], sizes = [2, 32], strides = [1, 1]} : vector<2x128xf32> to vector<2x32xf32>
    %483 = arith.mulf %480, %467 : vector<2x32xf32>
    %484 = arith.mulf %479, %481 : vector<2x32xf32>
    %485 = arith.addf %483, %484 : vector<2x32xf32>
    %486 = math.tanh %485 : vector<2x32xf32>
    %487 = arith.mulf %482, %486 : vector<2x32xf32>
    %488 = vector.extract_strided_slice %70 {offsets = [46, 0], sizes = [2, 128], strides = [1, 1]} : vector<64x128xf32> to vector<2x128xf32>
    %cst_119 = arith.constant dense<0.000000e+00> : vector<2x128xf32>
    %489 = tpu.matmul %487, %71, %cst_119 {dimension_numbers = #tpu.dot_dimension_numbers<[1], [0], [0], [1], [0, 0, 1, 1], [], []>} : vector<2x32xf32>, vector<32x128xf32>, vector<2x128xf32> -> vector<2x128xf32>
    %490 = arith.addf %488, %489 : vector<2x128xf32>
    %491 = arith.negf %490 : vector<2x128xf32>
    %492 = math.exp %491 : vector<2x128xf32>
    %cst_120 = arith.constant 1.000000e+00 : f32
    %493 = vector.broadcast %cst_120 : f32 to vector<2x128xf32>
    %494 = arith.addf %493, %492 : vector<2x128xf32>
    %495 = arith.divf %493, %494 : vector<2x128xf32>
    %496 = math.tanh %490 : vector<2x128xf32>
    %497 = vector.extract_strided_slice %495 {offsets = [0, 0], sizes = [2, 32], strides = [1, 1]} : vector<2x128xf32> to vector<2x32xf32>
    %498 = vector.extract_strided_slice %495 {offsets = [0, 32], sizes = [2, 32], strides = [1, 1]} : vector<2x128xf32> to vector<2x32xf32>
    %499 = vector.extract_strided_slice %496 {offsets = [0, 64], sizes = [2, 32], strides = [1, 1]} : vector<2x128xf32> to vector<2x32xf32>
    %500 = vector.extract_strided_slice %495 {offsets = [0, 96], sizes = [2, 32], strides = [1, 1]} : vector<2x128xf32> to vector<2x32xf32>
    %501 = arith.mulf %498, %485 : vector<2x32xf32>
    %502 = arith.mulf %497, %499 : vector<2x32xf32>
    %503 = arith.addf %501, %502 : vector<2x32xf32>
    %504 = math.tanh %503 : vector<2x32xf32>
    %505 = arith.mulf %500, %504 : vector<2x32xf32>
    %506 = vector.extract_strided_slice %70 {offsets = [48, 0], sizes = [2, 128], strides = [1, 1]} : vector<64x128xf32> to vector<2x128xf32>
    %cst_121 = arith.constant dense<0.000000e+00> : vector<2x128xf32>
    %507 = tpu.matmul %505, %71, %cst_121 {dimension_numbers = #tpu.dot_dimension_numbers<[1], [0], [0], [1], [0, 0, 1, 1], [], []>} : vector<2x32xf32>, vector<32x128xf32>, vector<2x128xf32> -> vector<2x128xf32>
    %508 = arith.addf %506, %507 : vector<2x128xf32>
    %509 = arith.negf %508 : vector<2x128xf32>
    %510 = math.exp %509 : vector<2x128xf32>
    %cst_122 = arith.constant 1.000000e+00 : f32
    %511 = vector.broadcast %cst_122 : f32 to vector<2x128xf32>
    %512 = arith.addf %511, %510 : vector<2x128xf32>
    %513 = arith.divf %511, %512 : vector<2x128xf32>
    %514 = math.tanh %508 : vector<2x128xf32>
    %515 = vector.extract_strided_slice %513 {offsets = [0, 0], sizes = [2, 32], strides = [1, 1]} : vector<2x128xf32> to vector<2x32xf32>
    %516 = vector.extract_strided_slice %513 {offsets = [0, 32], sizes = [2, 32], strides = [1, 1]} : vector<2x128xf32> to vector<2x32xf32>
    %517 = vector.extract_strided_slice %514 {offsets = [0, 64], sizes = [2, 32], strides = [1, 1]} : vector<2x128xf32> to vector<2x32xf32>
    %518 = vector.extract_strided_slice %513 {offsets = [0, 96], sizes = [2, 32], strides = [1, 1]} : vector<2x128xf32> to vector<2x32xf32>
    %519 = arith.mulf %516, %503 : vector<2x32xf32>
    %520 = arith.mulf %515, %517 : vector<2x32xf32>
    %521 = arith.addf %519, %520 : vector<2x32xf32>
    %522 = math.tanh %521 : vector<2x32xf32>
    %523 = arith.mulf %518, %522 : vector<2x32xf32>
    %524 = vector.extract_strided_slice %70 {offsets = [50, 0], sizes = [2, 128], strides = [1, 1]} : vector<64x128xf32> to vector<2x128xf32>
    %cst_123 = arith.constant dense<0.000000e+00> : vector<2x128xf32>
    %525 = tpu.matmul %523, %71, %cst_123 {dimension_numbers = #tpu.dot_dimension_numbers<[1], [0], [0], [1], [0, 0, 1, 1], [], []>} : vector<2x32xf32>, vector<32x128xf32>, vector<2x128xf32> -> vector<2x128xf32>
    %526 = arith.addf %524, %525 : vector<2x128xf32>
    %527 = arith.negf %526 : vector<2x128xf32>
    %528 = math.exp %527 : vector<2x128xf32>
    %cst_124 = arith.constant 1.000000e+00 : f32
    %529 = vector.broadcast %cst_124 : f32 to vector<2x128xf32>
    %530 = arith.addf %529, %528 : vector<2x128xf32>
    %531 = arith.divf %529, %530 : vector<2x128xf32>
    %532 = math.tanh %526 : vector<2x128xf32>
    %533 = vector.extract_strided_slice %531 {offsets = [0, 0], sizes = [2, 32], strides = [1, 1]} : vector<2x128xf32> to vector<2x32xf32>
    %534 = vector.extract_strided_slice %531 {offsets = [0, 32], sizes = [2, 32], strides = [1, 1]} : vector<2x128xf32> to vector<2x32xf32>
    %535 = vector.extract_strided_slice %532 {offsets = [0, 64], sizes = [2, 32], strides = [1, 1]} : vector<2x128xf32> to vector<2x32xf32>
    %536 = vector.extract_strided_slice %531 {offsets = [0, 96], sizes = [2, 32], strides = [1, 1]} : vector<2x128xf32> to vector<2x32xf32>
    %537 = arith.mulf %534, %521 : vector<2x32xf32>
    %538 = arith.mulf %533, %535 : vector<2x32xf32>
    %539 = arith.addf %537, %538 : vector<2x32xf32>
    %540 = math.tanh %539 : vector<2x32xf32>
    %541 = arith.mulf %536, %540 : vector<2x32xf32>
    %542 = vector.extract_strided_slice %70 {offsets = [52, 0], sizes = [2, 128], strides = [1, 1]} : vector<64x128xf32> to vector<2x128xf32>
    %cst_125 = arith.constant dense<0.000000e+00> : vector<2x128xf32>
    %543 = tpu.matmul %541, %71, %cst_125 {dimension_numbers = #tpu.dot_dimension_numbers<[1], [0], [0], [1], [0, 0, 1, 1], [], []>} : vector<2x32xf32>, vector<32x128xf32>, vector<2x128xf32> -> vector<2x128xf32>
    %544 = arith.addf %542, %543 : vector<2x128xf32>
    %545 = arith.negf %544 : vector<2x128xf32>
    %546 = math.exp %545 : vector<2x128xf32>
    %cst_126 = arith.constant 1.000000e+00 : f32
    %547 = vector.broadcast %cst_126 : f32 to vector<2x128xf32>
    %548 = arith.addf %547, %546 : vector<2x128xf32>
    %549 = arith.divf %547, %548 : vector<2x128xf32>
    %550 = math.tanh %544 : vector<2x128xf32>
    %551 = vector.extract_strided_slice %549 {offsets = [0, 0], sizes = [2, 32], strides = [1, 1]} : vector<2x128xf32> to vector<2x32xf32>
    %552 = vector.extract_strided_slice %549 {offsets = [0, 32], sizes = [2, 32], strides = [1, 1]} : vector<2x128xf32> to vector<2x32xf32>
    %553 = vector.extract_strided_slice %550 {offsets = [0, 64], sizes = [2, 32], strides = [1, 1]} : vector<2x128xf32> to vector<2x32xf32>
    %554 = vector.extract_strided_slice %549 {offsets = [0, 96], sizes = [2, 32], strides = [1, 1]} : vector<2x128xf32> to vector<2x32xf32>
    %555 = arith.mulf %552, %539 : vector<2x32xf32>
    %556 = arith.mulf %551, %553 : vector<2x32xf32>
    %557 = arith.addf %555, %556 : vector<2x32xf32>
    %558 = math.tanh %557 : vector<2x32xf32>
    %559 = arith.mulf %554, %558 : vector<2x32xf32>
    %560 = vector.extract_strided_slice %70 {offsets = [54, 0], sizes = [2, 128], strides = [1, 1]} : vector<64x128xf32> to vector<2x128xf32>
    %cst_127 = arith.constant dense<0.000000e+00> : vector<2x128xf32>
    %561 = tpu.matmul %559, %71, %cst_127 {dimension_numbers = #tpu.dot_dimension_numbers<[1], [0], [0], [1], [0, 0, 1, 1], [], []>} : vector<2x32xf32>, vector<32x128xf32>, vector<2x128xf32> -> vector<2x128xf32>
    %562 = arith.addf %560, %561 : vector<2x128xf32>
    %563 = arith.negf %562 : vector<2x128xf32>
    %564 = math.exp %563 : vector<2x128xf32>
    %cst_128 = arith.constant 1.000000e+00 : f32
    %565 = vector.broadcast %cst_128 : f32 to vector<2x128xf32>
    %566 = arith.addf %565, %564 : vector<2x128xf32>
    %567 = arith.divf %565, %566 : vector<2x128xf32>
    %568 = math.tanh %562 : vector<2x128xf32>
    %569 = vector.extract_strided_slice %567 {offsets = [0, 0], sizes = [2, 32], strides = [1, 1]} : vector<2x128xf32> to vector<2x32xf32>
    %570 = vector.extract_strided_slice %567 {offsets = [0, 32], sizes = [2, 32], strides = [1, 1]} : vector<2x128xf32> to vector<2x32xf32>
    %571 = vector.extract_strided_slice %568 {offsets = [0, 64], sizes = [2, 32], strides = [1, 1]} : vector<2x128xf32> to vector<2x32xf32>
    %572 = vector.extract_strided_slice %567 {offsets = [0, 96], sizes = [2, 32], strides = [1, 1]} : vector<2x128xf32> to vector<2x32xf32>
    %573 = arith.mulf %570, %557 : vector<2x32xf32>
    %574 = arith.mulf %569, %571 : vector<2x32xf32>
    %575 = arith.addf %573, %574 : vector<2x32xf32>
    %576 = math.tanh %575 : vector<2x32xf32>
    %577 = arith.mulf %572, %576 : vector<2x32xf32>
    %578 = vector.extract_strided_slice %70 {offsets = [56, 0], sizes = [2, 128], strides = [1, 1]} : vector<64x128xf32> to vector<2x128xf32>
    %cst_129 = arith.constant dense<0.000000e+00> : vector<2x128xf32>
    %579 = tpu.matmul %577, %71, %cst_129 {dimension_numbers = #tpu.dot_dimension_numbers<[1], [0], [0], [1], [0, 0, 1, 1], [], []>} : vector<2x32xf32>, vector<32x128xf32>, vector<2x128xf32> -> vector<2x128xf32>
    %580 = arith.addf %578, %579 : vector<2x128xf32>
    %581 = arith.negf %580 : vector<2x128xf32>
    %582 = math.exp %581 : vector<2x128xf32>
    %cst_130 = arith.constant 1.000000e+00 : f32
    %583 = vector.broadcast %cst_130 : f32 to vector<2x128xf32>
    %584 = arith.addf %583, %582 : vector<2x128xf32>
    %585 = arith.divf %583, %584 : vector<2x128xf32>
    %586 = math.tanh %580 : vector<2x128xf32>
    %587 = vector.extract_strided_slice %585 {offsets = [0, 0], sizes = [2, 32], strides = [1, 1]} : vector<2x128xf32> to vector<2x32xf32>
    %588 = vector.extract_strided_slice %585 {offsets = [0, 32], sizes = [2, 32], strides = [1, 1]} : vector<2x128xf32> to vector<2x32xf32>
    %589 = vector.extract_strided_slice %586 {offsets = [0, 64], sizes = [2, 32], strides = [1, 1]} : vector<2x128xf32> to vector<2x32xf32>
    %590 = vector.extract_strided_slice %585 {offsets = [0, 96], sizes = [2, 32], strides = [1, 1]} : vector<2x128xf32> to vector<2x32xf32>
    %591 = arith.mulf %588, %575 : vector<2x32xf32>
    %592 = arith.mulf %587, %589 : vector<2x32xf32>
    %593 = arith.addf %591, %592 : vector<2x32xf32>
    %594 = math.tanh %593 : vector<2x32xf32>
    %595 = arith.mulf %590, %594 : vector<2x32xf32>
    %596 = vector.extract_strided_slice %70 {offsets = [58, 0], sizes = [2, 128], strides = [1, 1]} : vector<64x128xf32> to vector<2x128xf32>
    %cst_131 = arith.constant dense<0.000000e+00> : vector<2x128xf32>
    %597 = tpu.matmul %595, %71, %cst_131 {dimension_numbers = #tpu.dot_dimension_numbers<[1], [0], [0], [1], [0, 0, 1, 1], [], []>} : vector<2x32xf32>, vector<32x128xf32>, vector<2x128xf32> -> vector<2x128xf32>
    %598 = arith.addf %596, %597 : vector<2x128xf32>
    %599 = arith.negf %598 : vector<2x128xf32>
    %600 = math.exp %599 : vector<2x128xf32>
    %cst_132 = arith.constant 1.000000e+00 : f32
    %601 = vector.broadcast %cst_132 : f32 to vector<2x128xf32>
    %602 = arith.addf %601, %600 : vector<2x128xf32>
    %603 = arith.divf %601, %602 : vector<2x128xf32>
    %604 = math.tanh %598 : vector<2x128xf32>
    %605 = vector.extract_strided_slice %603 {offsets = [0, 0], sizes = [2, 32], strides = [1, 1]} : vector<2x128xf32> to vector<2x32xf32>
    %606 = vector.extract_strided_slice %603 {offsets = [0, 32], sizes = [2, 32], strides = [1, 1]} : vector<2x128xf32> to vector<2x32xf32>
    %607 = vector.extract_strided_slice %604 {offsets = [0, 64], sizes = [2, 32], strides = [1, 1]} : vector<2x128xf32> to vector<2x32xf32>
    %608 = vector.extract_strided_slice %603 {offsets = [0, 96], sizes = [2, 32], strides = [1, 1]} : vector<2x128xf32> to vector<2x32xf32>
    %609 = arith.mulf %606, %593 : vector<2x32xf32>
    %610 = arith.mulf %605, %607 : vector<2x32xf32>
    %611 = arith.addf %609, %610 : vector<2x32xf32>
    %612 = math.tanh %611 : vector<2x32xf32>
    %613 = arith.mulf %608, %612 : vector<2x32xf32>
    %614 = vector.extract_strided_slice %70 {offsets = [60, 0], sizes = [2, 128], strides = [1, 1]} : vector<64x128xf32> to vector<2x128xf32>
    %cst_133 = arith.constant dense<0.000000e+00> : vector<2x128xf32>
    %615 = tpu.matmul %613, %71, %cst_133 {dimension_numbers = #tpu.dot_dimension_numbers<[1], [0], [0], [1], [0, 0, 1, 1], [], []>} : vector<2x32xf32>, vector<32x128xf32>, vector<2x128xf32> -> vector<2x128xf32>
    %616 = arith.addf %614, %615 : vector<2x128xf32>
    %617 = arith.negf %616 : vector<2x128xf32>
    %618 = math.exp %617 : vector<2x128xf32>
    %cst_134 = arith.constant 1.000000e+00 : f32
    %619 = vector.broadcast %cst_134 : f32 to vector<2x128xf32>
    %620 = arith.addf %619, %618 : vector<2x128xf32>
    %621 = arith.divf %619, %620 : vector<2x128xf32>
    %622 = math.tanh %616 : vector<2x128xf32>
    %623 = vector.extract_strided_slice %621 {offsets = [0, 0], sizes = [2, 32], strides = [1, 1]} : vector<2x128xf32> to vector<2x32xf32>
    %624 = vector.extract_strided_slice %621 {offsets = [0, 32], sizes = [2, 32], strides = [1, 1]} : vector<2x128xf32> to vector<2x32xf32>
    %625 = vector.extract_strided_slice %622 {offsets = [0, 64], sizes = [2, 32], strides = [1, 1]} : vector<2x128xf32> to vector<2x32xf32>
    %626 = vector.extract_strided_slice %621 {offsets = [0, 96], sizes = [2, 32], strides = [1, 1]} : vector<2x128xf32> to vector<2x32xf32>
    %627 = arith.mulf %624, %611 : vector<2x32xf32>
    %628 = arith.mulf %623, %625 : vector<2x32xf32>
    %629 = arith.addf %627, %628 : vector<2x32xf32>
    %630 = math.tanh %629 : vector<2x32xf32>
    %631 = arith.mulf %626, %630 : vector<2x32xf32>
    %632 = vector.extract_strided_slice %70 {offsets = [62, 0], sizes = [2, 128], strides = [1, 1]} : vector<64x128xf32> to vector<2x128xf32>
    %cst_135 = arith.constant dense<0.000000e+00> : vector<2x128xf32>
    %633 = tpu.matmul %631, %71, %cst_135 {dimension_numbers = #tpu.dot_dimension_numbers<[1], [0], [0], [1], [0, 0, 1, 1], [], []>} : vector<2x32xf32>, vector<32x128xf32>, vector<2x128xf32> -> vector<2x128xf32>
    %634 = arith.addf %632, %633 : vector<2x128xf32>
    %635 = arith.negf %634 : vector<2x128xf32>
    %636 = math.exp %635 : vector<2x128xf32>
    %cst_136 = arith.constant 1.000000e+00 : f32
    %637 = vector.broadcast %cst_136 : f32 to vector<2x128xf32>
    %638 = arith.addf %637, %636 : vector<2x128xf32>
    %639 = arith.divf %637, %638 : vector<2x128xf32>
    %640 = math.tanh %634 : vector<2x128xf32>
    %641 = vector.extract_strided_slice %639 {offsets = [0, 0], sizes = [2, 32], strides = [1, 1]} : vector<2x128xf32> to vector<2x32xf32>
    %642 = vector.extract_strided_slice %639 {offsets = [0, 32], sizes = [2, 32], strides = [1, 1]} : vector<2x128xf32> to vector<2x32xf32>
    %643 = vector.extract_strided_slice %640 {offsets = [0, 64], sizes = [2, 32], strides = [1, 1]} : vector<2x128xf32> to vector<2x32xf32>
    %644 = vector.extract_strided_slice %639 {offsets = [0, 96], sizes = [2, 32], strides = [1, 1]} : vector<2x128xf32> to vector<2x32xf32>
    %645 = arith.mulf %642, %629 : vector<2x32xf32>
    %646 = arith.mulf %641, %643 : vector<2x32xf32>
    %647 = arith.addf %645, %646 : vector<2x32xf32>
    %648 = math.tanh %647 : vector<2x32xf32>
    %649 = arith.mulf %644, %648 : vector<2x32xf32>
    %650 = arith.truncf %649 : vector<2x32xf32> to vector<2x32xbf16>
    %c0_137 = arith.constant 0 : index
    %c0_138 = arith.constant 0 : index
    %651 = vector.load %arg7[%c0_137, %c0_138] : memref<32x1024xbf16, #tpu.memory_space<vmem>>, vector<32x1024xbf16>
    %cst_139 = arith.constant dense<0.000000e+00> : vector<2x1024xf32>
    %652 = tpu.matmul %650, %651, %cst_139 {dimension_numbers = #tpu.dot_dimension_numbers<[1], [0], [0], [1], [0, 0, 1, 1], [], []>} : vector<2x32xbf16>, vector<32x1024xbf16>, vector<2x1024xf32> -> vector<2x1024xf32>
    %c0_140 = arith.constant 0 : index
    %c0_141 = arith.constant 0 : index
    %653 = vector.load %arg8[%c0_140, %c0_141] : memref<1x1024xf32, #tpu.memory_space<vmem>>, vector<1x1024xf32>
    %654 = vector.broadcast %653 : vector<1x1024xf32> to vector<2x1024xf32>
    %655 = arith.addf %652, %654 : vector<2x1024xf32>
    %cst_142 = arith.constant 0.000000e+00 : f32
    %656 = vector.broadcast %cst_142 : f32 to vector<2x1024xf32>
    %657 = arith.maximumf %655, %656 : vector<2x1024xf32>
    %658 = arith.truncf %657 : vector<2x1024xf32> to vector<2x1024xbf16>
    %c0_143 = arith.constant 0 : index
    %c0_144 = arith.constant 0 : index
    %659 = vector.load %arg9[%c0_143, %c0_144] : memref<1024x512xbf16, #tpu.memory_space<vmem>>, vector<1024x512xbf16>
    %cst_145 = arith.constant dense<0.000000e+00> : vector<2x512xf32>
    %660 = tpu.matmul %658, %659, %cst_145 {dimension_numbers = #tpu.dot_dimension_numbers<[1], [0], [0], [1], [0, 0, 1, 1], [], []>} : vector<2x1024xbf16>, vector<1024x512xbf16>, vector<2x512xf32> -> vector<2x512xf32>
    %c0_146 = arith.constant 0 : index
    %c0_147 = arith.constant 0 : index
    %661 = vector.load %arg10[%c0_146, %c0_147] : memref<1x512xf32, #tpu.memory_space<vmem>>, vector<1x512xf32>
    %662 = vector.broadcast %661 : vector<1x512xf32> to vector<2x512xf32>
    %663 = arith.addf %660, %662 : vector<2x512xf32>
    %664 = arith.negf %663 : vector<2x512xf32>
    %665 = math.exp %664 : vector<2x512xf32>
    %cst_148 = arith.constant 1.000000e+00 : f32
    %666 = vector.broadcast %cst_148 : f32 to vector<2x512xf32>
    %667 = arith.addf %666, %665 : vector<2x512xf32>
    %668 = arith.divf %666, %667 : vector<2x512xf32>
    %c0_149 = arith.constant 0 : index
    %c0_150 = arith.constant 0 : index
    %669 = vector.load %arg11[%c0_149, %c0_150] : memref<1x512xf32, #tpu.memory_space<vmem>>, vector<1x512xf32>
    %670 = vector.broadcast %669 : vector<1x512xf32> to vector<2x512xf32>
    %671 = arith.mulf %668, %670 : vector<2x512xf32>
    %cst_151 = arith.constant dense<0.000000e+00> : vector<2xf32>
    %672 = vector.multi_reduction <add>, %671, %cst_151 [1] : vector<2x512xf32> to vector<2xf32>
    %673 = vector.shape_cast %672 : vector<2xf32> to vector<2x1xf32>
    %c0_152 = arith.constant 0 : index
    %c0_153 = arith.constant 0 : index
    %674 = vector.load %arg12[%c0_152, %c0_153] : memref<1x1xf32, #tpu.memory_space<vmem>>, vector<1x1xf32>
    %675 = vector.broadcast %674 : vector<1x1xf32> to vector<2x1xf32>
    %676 = arith.addf %673, %675 : vector<2x1xf32>
    %677 = arith.negf %676 : vector<2x1xf32>
    %678 = math.exp %677 : vector<2x1xf32>
    %cst_154 = arith.constant 1.000000e+00 : f32
    %679 = vector.broadcast %cst_154 : f32 to vector<2x1xf32>
    %680 = arith.addf %679, %678 : vector<2x1xf32>
    %681 = arith.divf %679, %680 : vector<2x1xf32>
    %c0_155 = arith.constant 0 : index
    %c0_156 = arith.constant 0 : index
    %682 = vector.load %arg13[%c0_155, %c0_156] : memref<2x1xf32, #tpu.memory_space<vmem>>, vector<2x1xf32>
    tpu.vector_store %arg13[%c0_155, %c0_156], %681 {strides = array<i32>} : memref<2x1xf32, #tpu.memory_space<vmem>>, vector<2x1xf32>,
    return
  }
  func.func @transform_0(%arg0: i32) -> (i32, i32, i32, i32) {
    %c0_i32 = arith.constant 0 : i32
    %c0_i32_0 = arith.constant 0 : i32
    %c0_i32_1 = arith.constant 0 : i32
    %c0_i32_2 = arith.constant 0 : i32
    return %arg0, %c0_i32, %c0_i32_0, %c0_i32_1 : i32, i32, i32, i32
  }
  func.func @transform_1(%arg0: i32) -> (i32, i32) {
    %c0_i32 = arith.constant 0 : i32
    %c0_i32_0 = arith.constant 0 : i32
    %c0_i32_1 = arith.constant 0 : i32
    return %c0_i32, %c0_i32_0 : i32, i32
  }
  func.func @transform_2(%arg0: i32) -> (i32, i32) {
    %c0_i32 = arith.constant 0 : i32
    %c0_i32_0 = arith.constant 0 : i32
    %c0_i32_1 = arith.constant 0 : i32
    return %c0_i32, %c0_i32_0 : i32, i32
  }
  func.func @transform_3(%arg0: i32) -> (i32, i32) {
    %c0_i32 = arith.constant 0 : i32
    %c0_i32_0 = arith.constant 0 : i32
    %c0_i32_1 = arith.constant 0 : i32
    return %c0_i32, %c0_i32_0 : i32, i32
  }
  func.func @transform_4(%arg0: i32) -> (i32, i32) {
    %c0_i32 = arith.constant 0 : i32
    %c0_i32_0 = arith.constant 0 : i32
    %c0_i32_1 = arith.constant 0 : i32
    return %c0_i32, %c0_i32_0 : i32, i32
  }
  func.func @transform_5(%arg0: i32) -> (i32, i32) {
    %c0_i32 = arith.constant 0 : i32
    %c0_i32_0 = arith.constant 0 : i32
    %c0_i32_1 = arith.constant 0 : i32
    return %c0_i32, %c0_i32_0 : i32, i32
  }
  func.func @transform_6(%arg0: i32) -> (i32, i32) {
    %c0_i32 = arith.constant 0 : i32
    %c0_i32_0 = arith.constant 0 : i32
    %c0_i32_1 = arith.constant 0 : i32
    return %c0_i32, %c0_i32_0 : i32, i32
  }
  func.func @transform_7(%arg0: i32) -> (i32, i32) {
    %c0_i32 = arith.constant 0 : i32
    %c0_i32_0 = arith.constant 0 : i32
    %c0_i32_1 = arith.constant 0 : i32
    return %c0_i32, %c0_i32_0 : i32, i32
  }
  func.func @transform_8(%arg0: i32) -> (i32, i32) {
    %c0_i32 = arith.constant 0 : i32
    %c0_i32_0 = arith.constant 0 : i32
    %c0_i32_1 = arith.constant 0 : i32
    return %c0_i32, %c0_i32_0 : i32, i32
  }
  func.func @transform_9(%arg0: i32) -> (i32, i32) {
    %c0_i32 = arith.constant 0 : i32
    %c0_i32_0 = arith.constant 0 : i32
    %c0_i32_1 = arith.constant 0 : i32
    return %c0_i32, %c0_i32_0 : i32, i32
  }
  func.func @transform_10(%arg0: i32) -> (i32, i32) {
    %c0_i32 = arith.constant 0 : i32
    %c0_i32_0 = arith.constant 0 : i32
    %c0_i32_1 = arith.constant 0 : i32
    return %c0_i32, %c0_i32_0 : i32, i32
  }
  func.func @transform_11(%arg0: i32) -> (i32, i32) {
    %c0_i32 = arith.constant 0 : i32
    %c0_i32_0 = arith.constant 0 : i32
    %c0_i32_1 = arith.constant 0 : i32
    return %c0_i32, %c0_i32_0 : i32, i32
  }
  func.func @transform_12(%arg0: i32) -> (i32, i32) {
    %c0_i32 = arith.constant 0 : i32
    %c0_i32_0 = arith.constant 0 : i32
    return %arg0, %c0_i32 : i32, i32
  }
}

</mosaic_0001>

<bundles_post_ra>
// kernel: basic_model_forward.1
= control target key start
LH: loop header
LB: loop body
LE: loop exit
PB: predicated region body
PF: predicated region fallthrough
CT: control target
= control target key end

     0   :  { %v12745_v1 = vmov 0   ;;  %vm132_vm0 = vcmask 654336   ;;  %vm9896_vm1 = vmmov 0   ;;  %s9898_s29 = smov 32   ;;  %vm2294_vm2 = vcmask 261120   ;;  %s12732_s1 = inlined_call_operand.vmem [shape: bf16[80,256], index: 1, kind: input, shape index: {}]   ;;  %s12733_s0 = inlined_call_operand.vmem [shape: bf16[1,15,64,80], index: 0, kind: input, shape index: {}]   ;;  %s12734_s3 = inlined_call_operand.vmem [shape: bf16[256,128], index: 3, kind: input, shape index: {}]   ;;  %s12735_s4 = inlined_call_operand.vmem [shape: f32[32,128], index: 4, kind: input, shape index: {}]   ;;  %s12736_s2 = inlined_call_operand.vmem [shape: f32[1,256], index: 2, kind: input, shape index: {}]   ;;  %s12737_s5 = inlined_call_operand.vmem [shape: f32[1,128], index: 5, kind: input, shape index: {}]   ;;  %s12738_s6 = inlined_call_operand.vmem [shape: bf16[32,1024], index: 6, kind: input, shape index: {}]   ;;  %s12739_s8 = inlined_call_operand.vmem [shape: bf16[1024,512], index: 8, kind: input, shape index: {}]   ;;  %s12740_s7 = inlined_call_operand.vmem [shape: f32[1,1024], index: 7, kind: input, shape index: {}]   ;;  %s12741_s9 = inlined_call_operand.vmem [shape: f32[1,512], index: 9, kind: input, shape index: {}]   ;;  %s12742_s10 = inlined_call_operand.vmem [shape: f32[1,512], index: 10, kind: input, shape index: {}]   ;;  %s12743_s11 = inlined_call_operand.<no memory space> [shape: f32[1,1], index: 11, kind: input, shape index: {}]   ;;  %s12744_s12 = inlined_call_operand.vmem [shape: f32[2,1], index: 12, kind: output, shape index: {}]  }
   0x1   :  { %v9967_v0 = vld [vmem:[%s12732_s1 + $0x44] ss:$8 sps:$4 sm:$0xff]   ;;  %177 = vmatprep.mubr.bf16.mxu0 %v12745_v1  ;;  %291 = vmatprep.mubr.bf16.mxu1 %v12745_v1  ;;  %v9974_v2 = vld [vmem:[%s12732_s1 + $0x40] ss:$8 sps:$4 sm:$0xff]   ;;  %v9981_v3 = vld [vmem:[%s12732_s1 + $0x34] ss:$8 sps:$4 sm:$0xff]  }
   0x2   :  { %151 = vmatprep.subr.bf16.mxu0 %v9967_v0  ;;  %265 = vmatprep.subr.bf16.mxu1 %v9967_v0  ;;  %v9988_v4 = vld [vmem:[%s12732_s1 + $0x30] ss:$8 sps:$4 sm:$0xff]   ;;  %v9995_v5 = vld [vmem:[%s12732_s1 + $0x24] ss:$8 sps:$4 sm:$0xff]   ;;  %v10002_v6 = vld [vmem:[%s12732_s1 + $0x20] ss:$8 sps:$4 sm:$0xff]  }
   0x3   :  { %152 = vmatpush1.bf16.msra.mxu0 %v9974_v2  ;;  %266 = vmatpush1.bf16.msra.mxu1 %v9974_v2  ;;  %v10009_v7 = vld [vmem:[%s12732_s1 + $0x14] ss:$8 sps:$4 sm:$0xff]   ;;  %v10016_v8 = vld [vmem:[%s12732_s1 + $0x10] ss:$8 sps:$4 sm:$0xff]   ;;  %v10023_v9 = vld [vmem:[%s12732_s1 + $0x4] ss:$8 sps:$4 sm:$0xff]  }
   0x4   :  { %153 = vmatprep.subr.bf16.mxu0 %v9981_v3  ;;  %267 = vmatprep.subr.bf16.mxu1 %v9981_v3  ;;  %v10030_v10 = vld [vmem:[%s12732_s1] ss:$8 sps:$4 sm:$0xff]   ;;  %v9153_v15 = vld [vmem:[%s12733_s0 + $0x10] sm:$0xff]   ;;  %v9155_v17 = vld [vmem:[%s12733_s0 + $0x18] sm:$0xff]   ;;  %vm7943_vm3 = vcmask 1041408   ;;  %vm7967_vm4 = vcmask 1024  }
   0x5   :  { %v9149_v11 = vld [vmem:[%s12733_s0] sm:$0xff]   ;;  %v9151_v13 = vld [vmem:[%s12733_s0 + $0x8] sm:$0xff]   ;;  %v9154_v16 = vld [vmem:[%s12733_s0 + $0x30] sm:$0xff]  }
   0x6   :  { %v9150_v12 = vld [vmem:[%s12733_s0 + $0x20] sm:$0xff]   ;;  %v9152_v14 = vld [vmem:[%s12733_s0 + $0x28] sm:$0xff]   ;;  %v9156_v18 = vld [vmem:[%s12733_s0 + $0x38] sm:$0xff]  }
   0x7   :  { %154 = vmatpush1.bf16.msra.mxu0 %v9988_v4  ;;  %268 = vmatpush1.bf16.msra.mxu1 %v9988_v4  ;;  %v9157_v19 = vld [vmem:[%s12733_s0 + $0x40] sm:$0xff]   ;;  %v9159_v21 = vld [vmem:[%s12733_s0 + $0x48] sm:$0xff]   ;;  %v9161_v23 = vld [vmem:[%s12733_s0 + $0x50] sm:$0xff]  }
   0x8   :  { %155 = vmatprep.subr.bf16.mxu0 %v9995_v5  ;;  %269 = vmatprep.subr.bf16.mxu1 %v9995_v5  ;;  %v9158_v20 = vld [vmem:[%s12733_s0 + $0x60] sm:$0xff]   ;;  %v9160_v22 = vld [vmem:[%s12733_s0 + $0x68] sm:$0xff]   ;;  %v9162_v24 = vld [vmem:[%s12733_s0 + $0x70] sm:$0xff]  }
   0x9   :  { %v9163_v25 = vld [vmem:[%s12733_s0 + $0x58] sm:$0xff]   ;;  %v9165_v27 = vld [vmem:[%s12733_s0 + $0x80] sm:$0xff]   ;;  %v9167_v29 = vld [vmem:[%s12733_s0 + $0x88] sm:$0xff]  }
   0xa   :  { %v9164_v26 = vld [vmem:[%s12733_s0 + $0x78] sm:$0xff]   ;;  %v9166_v28 = vld [vmem:[%s12733_s0 + $0xa0] sm:$0xff]   ;;  %v9168_v30 = vld [vmem:[%s12733_s0 + $0xa8] sm:$0xff]  }
   0xb   :  { %156 = vmatpush1.bf16.msra.mxu0 %v10002_v6  ;;  %270 = vmatpush1.bf16.msra.mxu1 %v10002_v6  ;;  %v9169_v31 = vld [vmem:[%s12733_s0 + $0x90] sm:$0xff]   ;;  %v9171_v33 = vld [vmem:[%s12733_s0 + $0x98] sm:$0xff]   ;;  %v9173_v35 = vld [vmem:[%s12733_s0 + $0xc0] sm:$0xff]  }
   0xc   :  { %157 = vmatprep.subr.bf16.mxu0 %v10009_v7  ;;  %271 = vmatprep.subr.bf16.mxu1 %v10009_v7  ;;  %v9170_v32 = vld [vmem:[%s12733_s0 + $0xb0] sm:$0xff]   ;;  %v9172_v34 = vld [vmem:[%s12733_s0 + $0xb8] sm:$0xff]   ;;  %v9174_v36 = vld [vmem:[%s12733_s0 + $0xe0] sm:$0xff]  }
   0xd   :  { %v9175_v37 = vld [vmem:[%s12733_s0 + $0xc8] sm:$0xff]   ;;  %v9177_v39 = vld [vmem:[%s12733_s0 + $0xd0] sm:$0xff]   ;;  %v9179_v41 = vld [vmem:[%s12733_s0 + $0xd8] sm:$0xff]  }
   0xe   :  { %v9176_v38 = vld [vmem:[%s12733_s0 + $0xe8] sm:$0xff]   ;;  %v9178_v40 = vld [vmem:[%s12733_s0 + $0xf0] sm:$0xff]   ;;  %v9180_v42 = vld [vmem:[%s12733_s0 + $0xf8] sm:$0xff]  }
   0xf   :  { %158 = vmatpush1.bf16.msra.mxu0 %v10016_v8  ;;  %272 = vmatpush1.bf16.msra.mxu1 %v10016_v8  ;;  %v9181_v43 = vld [vmem:[%s12733_s0 + $0x100] sm:$0xff]   ;;  %v9183_v45 = vld [vmem:[%s12733_s0 + $0x108] sm:$0xff]   ;;  %v9185_v47 = vld [vmem:[%s12733_s0 + $0x110] sm:$0xff]  }
  0x10   :  { %159 = vmatprep.subr.bf16.mxu0 %v10023_v9  ;;  %273 = vmatprep.subr.bf16.mxu1 %v10023_v9  ;;  %v9182_v44 = vld [vmem:[%s12733_s0 + $0x120] sm:$0xff]   ;;  %v9184_v46 = vld [vmem:[%s12733_s0 + $0x128] sm:$0xff]   ;;  %v9186_v48 = vld [vmem:[%s12733_s0 + $0x130] sm:$0xff]  }
  0x11   :  { %v9187_v49 = vld [vmem:[%s12733_s0 + $0x118] sm:$0xff]   ;;  %v9189_v51 = vld [vmem:[%s12733_s0 + $0x140] sm:$0xff]   ;;  %v9191_v53 = vld [vmem:[%s12733_s0 + $0x148] sm:$0xff]  }
  0x12   :  { %v9188_v50 = vld [vmem:[%s12733_s0 + $0x138] sm:$0xff]   ;;  %v9190_v52 = vld [vmem:[%s12733_s0 + $0x160] sm:$0xff]   ;;  %v9192_v54 = vld [vmem:[%s12733_s0 + $0x168] sm:$0xff]  }
  0x13   :  { %160 = vmatpush1.bf16.msra.mxu0 %v10030_v10  ;;  %274 = vmatpush1.bf16.msra.mxu1 %v10030_v10  ;;  %v9193_v55 = vld [vmem:[%s12733_s0 + $0x150] sm:$0xff]   ;;  %v9195_v57 = vld [vmem:[%s12733_s0 + $0x158] sm:$0xff]   ;;  %v9197_v59 = vld [vmem:[%s12733_s0 + $0x180] sm:$0xff]  }
  0x14   :  { %395 = vmatprep.subr.bf16.mxu0 %v9967_v0  ;;  %525 = vmatprep.subr.bf16.mxu1 %v9967_v0  ;;  %v9194_v56 = vld [vmem:[%s12733_s0 + $0x170] sm:$0xff]   ;;  %v9196_v58 = vld [vmem:[%s12733_s0 + $0x178] sm:$0xff]   ;;  %v9198_v60 = vld [vmem:[%s12733_s0 + $0x1a0] sm:$0xff]  }
  0x16   :  { %7987 = vmatmul.mubr.msk.bf16.vlgmr.msra.gmra.mxu0 %vm132_vm0, %v9149_v11  ;;  %8003 = vmatmul.mubr.msk.bf16.vlgmr.msra.gmra.mxu1 %vm132_vm0, %v9150_v12 }
  0x17   :  { %396 = vmatpush1.bf16.msra.mxu0 %v9974_v2  ;;  %187 = vmatprep.mubr.bf16.mxu0 %v12745_v1 }
  0x18   :  { %301 = vmatprep.mubr.bf16.mxu1 %v12745_v1  ;;  %397 = vmatprep.subr.bf16.mxu0 %v9981_v3 }
  0x19   :  { %526 = vmatpush1.bf16.msra.mxu1 %v9974_v2 }
  0x1a   :  { %527 = vmatprep.subr.bf16.mxu1 %v9981_v3 }
  0x1b   :  { %398 = vmatpush1.bf16.msra.mxu0 %v9988_v4 }
  0x1c   :  { %399 = vmatprep.subr.bf16.mxu0 %v9995_v5 }
  0x1d   :  { %528 = vmatpush1.bf16.msra.mxu1 %v9988_v4 }
  0x1e   :  { %7988 = vmatmul.mubr.msk.bf16.gmra.mxu0 %vm132_vm0, %v9151_v13  ;;  %8004 = vmatmul.mubr.msk.bf16.gmra.mxu1 %vm132_vm0, %v9152_v14 }
  0x1f   :  { %400 = vmatpush1.bf16.msra.mxu0 %v10002_v6  ;;  %197 = vmatprep.mubr.bf16.mxu0 %v12745_v1 }
  0x20   :  { %311 = vmatprep.mubr.bf16.mxu1 %v12745_v1  ;;  %401 = vmatprep.subr.bf16.mxu0 %v10009_v7 }
  0x21   :  { %529 = vmatprep.subr.bf16.mxu1 %v9995_v5 }
  0x22   :  { %530 = vmatpush1.bf16.msra.mxu1 %v10002_v6 }
  0x23   :  { %402 = vmatpush1.bf16.msra.mxu0 %v10016_v8  ;;  %531 = vmatprep.subr.bf16.mxu1 %v10009_v7 }
  0x24   :  { %403 = vmatprep.subr.bf16.mxu0 %v10023_v9 }
  0x26   :  { %7989 = vmatmul.mubr.msk.bf16.gmra.mxu0 %vm132_vm0, %v9153_v15  ;;  %8005 = vmatmul.mubr.msk.bf16.gmra.mxu1 %vm132_vm0, %v9154_v16  ;;  %v9200_v15 = vld [vmem:[%s12733_s0 + $0x1a8] sm:$0xff]  }
  0x27   :  { %207 = vmatprep.mubr.bf16.mxu0 %v12745_v1  ;;  %321 = vmatprep.mubr.bf16.mxu1 %v12745_v1 }
  0x28   :  { %404 = vmatpush1.bf16.msra.mxu0 %v10030_v10  ;;  %532 = vmatpush1.bf16.msra.mxu1 %v10016_v8 }
  0x29   :  { %533 = vmatprep.subr.bf16.mxu1 %v10023_v9  ;;  %655 = vmatprep.subr.bf16.mxu0 %v9967_v0 }
  0x2c   :  { %534 = vmatpush1.bf16.msra.mxu1 %v10030_v10 }
  0x2d   :  { %785 = vmatprep.subr.bf16.mxu1 %v9967_v0 }
  0x2e   :  { %7990 = vmatmul.mubr.msk.bf16.gmra.mxu0 %vm132_vm0, %v9155_v17  ;;  %8006 = vmatmul.mubr.msk.bf16.gmra.mxu1 %vm132_vm0, %v9156_v18 }
  0x2f   :  { %421 = vmatprep.mubr.bf16.mxu0 %v12745_v1  ;;  %551 = vmatprep.mubr.bf16.mxu1 %v12745_v1 }
  0x36   :  { %8019 = vmatmul.mubr.msk.bf16.vlgmr.msra.gmra.mxu0 %vm132_vm0, %v9157_v19  ;;  %8035 = vmatmul.mubr.msk.bf16.vlgmr.msra.gmra.mxu1 %vm132_vm0, %v9158_v20 }
  0x37   :  { %656 = vmatpush1.bf16.msra.mxu0 %v9974_v2  ;;  %431 = vmatprep.mubr.bf16.mxu0 %v12745_v1 }
  0x38   :  { %657 = vmatprep.subr.bf16.mxu0 %v9981_v3  ;;  %561 = vmatprep.mubr.bf16.mxu1 %v12745_v1 }
  0x39   :  { %786 = vmatpush1.bf16.msra.mxu1 %v9974_v2 }
  0x3a   :  { %787 = vmatprep.subr.bf16.mxu1 %v9981_v3 }
  0x3b   :  { %658 = vmatpush1.bf16.msra.mxu0 %v9988_v4 }
  0x3c   :  { %659 = vmatprep.subr.bf16.mxu0 %v9995_v5 }
  0x3d   :  { %788 = vmatpush1.bf16.msra.mxu1 %v9988_v4 }
  0x3e   :  { %8020 = vmatmul.mubr.msk.bf16.gmra.mxu0 %vm132_vm0, %v9159_v21  ;;  %8036 = vmatmul.mubr.msk.bf16.gmra.mxu1 %vm132_vm0, %v9160_v22 }
  0x3f   :  { %660 = vmatpush1.bf16.msra.mxu0 %v10002_v6  ;;  %441 = vmatprep.mubr.bf16.mxu0 %v12745_v1 }
  0x40   :  { %571 = vmatprep.mubr.bf16.mxu1 %v12745_v1  ;;  %661 = vmatprep.subr.bf16.mxu0 %v10009_v7 }
  0x41   :  { %789 = vmatprep.subr.bf16.mxu1 %v9995_v5 }
  0x42   :  { %790 = vmatpush1.bf16.msra.mxu1 %v10002_v6 }
  0x43   :  { %662 = vmatpush1.bf16.msra.mxu0 %v10016_v8  ;;  %791 = vmatprep.subr.bf16.mxu1 %v10009_v7 }
  0x44   :  { %663 = vmatprep.subr.bf16.mxu0 %v10023_v9 }
  0x46   :  { %8021 = vmatmul.mubr.msk.bf16.gmra.mxu0 %vm132_vm0, %v9161_v23  ;;  %8037 = vmatmul.mubr.msk.bf16.gmra.mxu1 %vm132_vm0, %v9162_v24  ;;  %v9202_v24 = vld [vmem:[%s12733_s0 + $0x1b0] sm:$0xff]  }
  0x47   :  { %451 = vmatprep.mubr.bf16.mxu0 %v12745_v1  ;;  %581 = vmatprep.mubr.bf16.mxu1 %v12745_v1 }
  0x48   :  { %664 = vmatpush1.bf16.msra.mxu0 %v10030_v10  ;;  %792 = vmatpush1.bf16.msra.mxu1 %v10016_v8 }
  0x49   :  { %793 = vmatprep.subr.bf16.mxu1 %v10023_v9  ;;  %915 = vmatprep.subr.bf16.mxu0 %v9967_v0 }
  0x4c   :  { %794 = vmatpush1.bf16.msra.mxu1 %v10030_v10 }
  0x4d   :  { %1045 = vmatprep.subr.bf16.mxu1 %v9967_v0 }
  0x4e   :  { %8022 = vmatmul.mubr.msk.bf16.gmra.mxu0 %vm132_vm0, %v9163_v25  ;;  %8038 = vmatmul.mubr.msk.bf16.gmra.mxu1 %vm132_vm0, %v9164_v26 }
  0x4f   :  { %681 = vmatprep.mubr.bf16.mxu0 %v12745_v1  ;;  %811 = vmatprep.mubr.bf16.mxu1 %v12745_v1 }
  0x56   :  { %8051 = vmatmul.mubr.msk.bf16.vlgmr.msra.gmra.mxu0 %vm132_vm0, %v9165_v27  ;;  %8067 = vmatmul.mubr.msk.bf16.vlgmr.msra.gmra.mxu1 %vm132_vm0, %v9166_v28 }
  0x57   :  { %916 = vmatpush1.bf16.msra.mxu0 %v9974_v2  ;;  %691 = vmatprep.mubr.bf16.mxu0 %v12745_v1 }
  0x58   :  { %917 = vmatprep.subr.bf16.mxu0 %v9981_v3  ;;  %821 = vmatprep.mubr.bf16.mxu1 %v12745_v1 }
  0x59   :  { %1046 = vmatpush1.bf16.msra.mxu1 %v9974_v2 }
  0x5a   :  { %1047 = vmatprep.subr.bf16.mxu1 %v9981_v3 }
  0x5b   :  { %918 = vmatpush1.bf16.msra.mxu0 %v9988_v4 }
  0x5c   :  { %919 = vmatprep.subr.bf16.mxu0 %v9995_v5 }
  0x5d   :  { %1048 = vmatpush1.bf16.msra.mxu1 %v9988_v4 }
  0x5e   :  { %8052 = vmatmul.mubr.msk.bf16.gmra.mxu0 %vm132_vm0, %v9167_v29  ;;  %8068 = vmatmul.mubr.msk.bf16.gmra.mxu1 %vm132_vm0, %v9168_v30 }
  0x5f   :  { %920 = vmatpush1.bf16.msra.mxu0 %v10002_v6  ;;  %701 = vmatprep.mubr.bf16.mxu0 %v12745_v1 }
  0x60   :  { %831 = vmatprep.mubr.bf16.mxu1 %v12745_v1  ;;  %921 = vmatprep.subr.bf16.mxu0 %v10009_v7 }
  0x61   :  { %1049 = vmatprep.subr.bf16.mxu1 %v9995_v5 }
  0x62   :  { %1050 = vmatpush1.bf16.msra.mxu1 %v10002_v6 }
  0x63   :  { %922 = vmatpush1.bf16.msra.mxu0 %v10016_v8  ;;  %1051 = vmatprep.subr.bf16.mxu1 %v10009_v7 }
  0x64   :  { %923 = vmatprep.subr.bf16.mxu0 %v10023_v9 }
  0x66   :  { %8053 = vmatmul.mubr.msk.bf16.gmra.mxu0 %vm132_vm0, %v9169_v31  ;;  %8069 = vmatmul.mubr.msk.bf16.gmra.mxu1 %vm132_vm0, %v9170_v32 }
  0x67   :  { %711 = vmatprep.mubr.bf16.mxu0 %v12745_v1  ;;  %841 = vmatprep.mubr.bf16.mxu1 %v12745_v1 }
  0x68   :  { %924 = vmatpush1.bf16.msra.mxu0 %v10030_v10  ;;  %1052 = vmatpush1.bf16.msra.mxu1 %v10016_v8 }
  0x69   :  { %1053 = vmatprep.subr.bf16.mxu1 %v10023_v9  ;;  %1175 = vmatprep.subr.bf16.mxu0 %v9967_v0 }
  0x6c   :  { %1054 = vmatpush1.bf16.msra.mxu1 %v10030_v10 }
  0x6d   :  { %1305 = vmatprep.subr.bf16.mxu1 %v9967_v0 }
  0x6e   :  { %8054 = vmatmul.mubr.msk.bf16.gmra.mxu0 %vm132_vm0, %v9171_v33  ;;  %8070 = vmatmul.mubr.msk.bf16.gmra.mxu1 %vm132_vm0, %v9172_v34  ;;  %v9203_v33 = vld [vmem:[%s12733_s0 + $0x198] sm:$0xff]  }
  0x6f   :  { %941 = vmatprep.mubr.bf16.mxu0 %v12745_v1  ;;  %1071 = vmatprep.mubr.bf16.mxu1 %v12745_v1  ;;  %v9204_v34 = vld [vmem:[%s12733_s0 + $0x1b8] sm:$0xff]  }
  0x76   :  { %8083 = vmatmul.mubr.msk.bf16.vlgmr.msra.gmra.mxu0 %vm132_vm0, %v9173_v35  ;;  %8099 = vmatmul.mubr.msk.bf16.vlgmr.msra.gmra.mxu1 %vm132_vm0, %v9174_v36 }
  0x77   :  { %1176 = vmatpush1.bf16.msra.mxu0 %v9974_v2  ;;  %951 = vmatprep.mubr.bf16.mxu0 %v12745_v1 }
  0x78   :  { %1177 = vmatprep.subr.bf16.mxu0 %v9981_v3  ;;  %1081 = vmatprep.mubr.bf16.mxu1 %v12745_v1 }
  0x79   :  { %1306 = vmatpush1.bf16.msra.mxu1 %v9974_v2 }
  0x7a   :  { %1307 = vmatprep.subr.bf16.mxu1 %v9981_v3 }
  0x7b   :  { %1178 = vmatpush1.bf16.msra.mxu0 %v9988_v4 }
  0x7c   :  { %1179 = vmatprep.subr.bf16.mxu0 %v9995_v5 }
  0x7d   :  { %1308 = vmatpush1.bf16.msra.mxu1 %v9988_v4 }
  0x7e   :  { %8084 = vmatmul.mubr.msk.bf16.gmra.mxu0 %vm132_vm0, %v9175_v37  ;;  %8100 = vmatmul.mubr.msk.bf16.gmra.mxu1 %vm132_vm0, %v9176_v38 }
  0x7f   :  { %1180 = vmatpush1.bf16.msra.mxu0 %v10002_v6  ;;  %961 = vmatprep.mubr.bf16.mxu0 %v12745_v1 }
  0x80   :  { %1091 = vmatprep.mubr.bf16.mxu1 %v12745_v1  ;;  %1181 = vmatprep.subr.bf16.mxu0 %v10009_v7 }
  0x81   :  { %1309 = vmatprep.subr.bf16.mxu1 %v9995_v5 }
  0x82   :  { %1310 = vmatpush1.bf16.msra.mxu1 %v10002_v6 }
  0x83   :  { %1182 = vmatpush1.bf16.msra.mxu0 %v10016_v8  ;;  %1311 = vmatprep.subr.bf16.mxu1 %v10009_v7 }
  0x84   :  { %1183 = vmatprep.subr.bf16.mxu0 %v10023_v9 }
  0x86   :  { %8085 = vmatmul.mubr.msk.bf16.gmra.mxu0 %vm132_vm0, %v9177_v39  ;;  %8101 = vmatmul.mubr.msk.bf16.gmra.mxu1 %vm132_vm0, %v9178_v40 }
  0x87   :  { %971 = vmatprep.mubr.bf16.mxu0 %v12745_v1  ;;  %1101 = vmatprep.mubr.bf16.mxu1 %v12745_v1 }
  0x88   :  { %1184 = vmatpush1.bf16.msra.mxu0 %v10030_v10  ;;  %1312 = vmatpush1.bf16.msra.mxu1 %v10016_v8 }
  0x89   :  { %1313 = vmatprep.subr.bf16.mxu1 %v10023_v9  ;;  %1435 = vmatprep.subr.bf16.mxu0 %v9967_v0 }
  0x8c   :  { %1314 = vmatpush1.bf16.msra.mxu1 %v10030_v10 }
  0x8d   :  { %1565 = vmatprep.subr.bf16.mxu1 %v9967_v0 }
  0x8e   :  { %8086 = vmatmul.mubr.msk.bf16.gmra.mxu0 %vm132_vm0, %v9179_v41  ;;  %8102 = vmatmul.mubr.msk.bf16.gmra.mxu1 %vm132_vm0, %v9180_v42 }
  0x8f   :  { %1201 = vmatprep.mubr.bf16.mxu0 %v12745_v1  ;;  %1331 = vmatprep.mubr.bf16.mxu1 %v12745_v1 }
  0x96   :  { %8115 = vmatmul.mubr.msk.bf16.vlgmr.msra.gmra.mxu0 %vm132_vm0, %v9181_v43  ;;  %8131 = vmatmul.mubr.msk.bf16.vlgmr.msra.gmra.mxu1 %vm132_vm0, %v9182_v44 }
  0x97   :  { %1436 = vmatpush1.bf16.msra.mxu0 %v9974_v2  ;;  %1211 = vmatprep.mubr.bf16.mxu0 %v12745_v1 }
  0x98   :  { %1437 = vmatprep.subr.bf16.mxu0 %v9981_v3  ;;  %1341 = vmatprep.mubr.bf16.mxu1 %v12745_v1 }
  0x99   :  { %1566 = vmatpush1.bf16.msra.mxu1 %v9974_v2 }
  0x9a   :  { %1567 = vmatprep.subr.bf16.mxu1 %v9981_v3 }
  0x9b   :  { %1438 = vmatpush1.bf16.msra.mxu0 %v9988_v4 }
  0x9c   :  { %1439 = vmatprep.subr.bf16.mxu0 %v9995_v5 }
  0x9d   :  { %1568 = vmatpush1.bf16.msra.mxu1 %v9988_v4 }
  0x9e   :  { %8116 = vmatmul.mubr.msk.bf16.gmra.mxu0 %vm132_vm0, %v9183_v45  ;;  %8132 = vmatmul.mubr.msk.bf16.gmra.mxu1 %vm132_vm0, %v9184_v46  ;;  %v9205_v45 = vld [vmem:[%s12733_s0 + $0x1c0] sm:$0xff]  }
  0x9f   :  { %1440 = vmatpush1.bf16.msra.mxu0 %v10002_v6  ;;  %1221 = vmatprep.mubr.bf16.mxu0 %v12745_v1 }
  0xa0   :  { %1351 = vmatprep.mubr.bf16.mxu1 %v12745_v1  ;;  %1441 = vmatprep.subr.bf16.mxu0 %v10009_v7 }
  0xa1   :  { %1569 = vmatprep.subr.bf16.mxu1 %v9995_v5 }
  0xa2   :  { %1570 = vmatpush1.bf16.msra.mxu1 %v10002_v6 }
  0xa3   :  { %1442 = vmatpush1.bf16.msra.mxu0 %v10016_v8  ;;  %1571 = vmatprep.subr.bf16.mxu1 %v10009_v7 }
  0xa4   :  { %1443 = vmatprep.subr.bf16.mxu0 %v10023_v9 }
  0xa6   :  { %8117 = vmatmul.mubr.msk.bf16.gmra.mxu0 %vm132_vm0, %v9185_v47  ;;  %8133 = vmatmul.mubr.msk.bf16.gmra.mxu1 %vm132_vm0, %v9186_v48 }
  0xa7   :  { %1231 = vmatprep.mubr.bf16.mxu0 %v12745_v1  ;;  %1361 = vmatprep.mubr.bf16.mxu1 %v12745_v1 }
  0xa8   :  { %1444 = vmatpush1.bf16.msra.mxu0 %v10030_v10  ;;  %1572 = vmatpush1.bf16.msra.mxu1 %v10016_v8 }
  0xa9   :  { %1573 = vmatprep.subr.bf16.mxu1 %v10023_v9  ;;  %1695 = vmatprep.subr.bf16.mxu0 %v9967_v0 }
  0xac   :  { %1574 = vmatpush1.bf16.msra.mxu1 %v10030_v10 }
  0xad   :  { %1825 = vmatprep.subr.bf16.mxu1 %v9967_v0 }
  0xae   :  { %8118 = vmatmul.mubr.msk.bf16.gmra.mxu0 %vm132_vm0, %v9187_v49  ;;  %8134 = vmatmul.mubr.msk.bf16.gmra.mxu1 %vm132_vm0, %v9188_v50 }
  0xaf   :  { %1461 = vmatprep.mubr.bf16.mxu0 %v12745_v1  ;;  %1591 = vmatprep.mubr.bf16.mxu1 %v12745_v1 }
  0xb6   :  { %8147 = vmatmul.mubr.msk.bf16.vlgmr.msra.gmra.mxu0 %vm132_vm0, %v9189_v51  ;;  %8163 = vmatmul.mubr.msk.bf16.vlgmr.msra.gmra.mxu1 %vm132_vm0, %v9190_v52 }
  0xb7   :  { %1696 = vmatpush1.bf16.msra.mxu0 %v9974_v2  ;;  %1471 = vmatprep.mubr.bf16.mxu0 %v12745_v1 }
  0xb8   :  { %1697 = vmatprep.subr.bf16.mxu0 %v9981_v3  ;;  %1601 = vmatprep.mubr.bf16.mxu1 %v12745_v1 }
  0xb9   :  { %1826 = vmatpush1.bf16.msra.mxu1 %v9974_v2 }
  0xba   :  { %1827 = vmatprep.subr.bf16.mxu1 %v9981_v3 }
  0xbb   :  { %1698 = vmatpush1.bf16.msra.mxu0 %v9988_v4 }
  0xbc   :  { %1699 = vmatprep.subr.bf16.mxu0 %v9995_v5 }
  0xbd   :  { %1828 = vmatpush1.bf16.msra.mxu1 %v9988_v4 }
  0xbe   :  { %8148 = vmatmul.mubr.msk.bf16.gmra.mxu0 %vm132_vm0, %v9191_v53  ;;  %8164 = vmatmul.mubr.msk.bf16.gmra.mxu1 %vm132_vm0, %v9192_v54 }
  0xbf   :  { %1700 = vmatpush1.bf16.msra.mxu0 %v10002_v6  ;;  %1481 = vmatprep.mubr.bf16.mxu0 %v12745_v1 }
  0xc0   :  { %1611 = vmatprep.mubr.bf16.mxu1 %v12745_v1  ;;  %1701 = vmatprep.subr.bf16.mxu0 %v10009_v7 }
  0xc1   :  { %1829 = vmatprep.subr.bf16.mxu1 %v9995_v5 }
  0xc2   :  { %1830 = vmatpush1.bf16.msra.mxu1 %v10002_v6 }
  0xc3   :  { %1702 = vmatpush1.bf16.msra.mxu0 %v10016_v8  ;;  %1831 = vmatprep.subr.bf16.mxu1 %v10009_v7 }
  0xc4   :  { %1703 = vmatprep.subr.bf16.mxu0 %v10023_v9 }
  0xc6   :  { %8149 = vmatmul.mubr.msk.bf16.gmra.mxu0 %vm132_vm0, %v9193_v55  ;;  %8165 = vmatmul.mubr.msk.bf16.gmra.mxu1 %vm132_vm0, %v9194_v56 }
  0xc7   :  { %1491 = vmatprep.mubr.bf16.mxu0 %v12745_v1  ;;  %1621 = vmatprep.mubr.bf16.mxu1 %v12745_v1 }
  0xc8   :  { %1704 = vmatpush1.bf16.msra.mxu0 %v10030_v10  ;;  %1832 = vmatpush1.bf16.msra.mxu1 %v10016_v8 }
  0xc9   :  { %1833 = vmatprep.subr.bf16.mxu1 %v10023_v9  ;;  %1955 = vmatprep.subr.bf16.mxu0 %v9967_v0 }
  0xcc   :  { %1834 = vmatpush1.bf16.msra.mxu1 %v10030_v10 }
  0xce   :  { %8150 = vmatmul.mubr.msk.bf16.gmra.mxu0 %vm132_vm0, %v9195_v57  ;;  %8166 = vmatmul.mubr.msk.bf16.gmra.mxu1 %vm132_vm0, %v9196_v58  ;;  %v9206_v57 = vld [vmem:[%s12733_s0 + $0x1c8] sm:$0xff]  }
  0xcf   :  { %1721 = vmatprep.mubr.bf16.mxu0 %v12745_v1  ;;  %1851 = vmatprep.mubr.bf16.mxu1 %v12745_v1 }
  0xd6   :  { %v10403_v61 = vpop.f32.mrf.mxu0  ;;  %v10405_v62 = vpop.f32.mrf.mxu1  ;;  %8179 = vmatmul.mubr.msk.bf16.vlgmr.msra.gmra.mxu0 %vm132_vm0, %v9197_v59  ;;  %8195 = vmatmul.mubr.msk.bf16.vlgmr.msra.gmra.mxu1 %vm132_vm0, %v9198_v60 }
  0xd7   :  { %v332_v63 = vmax.f32 %v10403_v61, %v10405_v62  ;;  %1956 = vmatpush1.bf16.msra.mxu0 %v9974_v2  ;;  %1731 = vmatprep.mubr.bf16.mxu0 %v12745_v1  ;;  %v9199_v2 = vld [vmem:[%s12733_s0 + $0x188] sm:$0xff]  }
  0xd8   :  { %v10413_v0 = vpop.f32.mrf.mxu0  ;;  %v10415_v11 = vpop.f32.mrf.mxu1  ;;  %1957 = vmatprep.subr.bf16.mxu0 %v9981_v3  ;;  %1861 = vmatprep.mubr.bf16.mxu1 %v12745_v1 }
  0xda   :  { %v10421_v13 = vpop.f32.mrf.mxu0  ;;  %v10423_v14 = vpop.f32.mrf.mxu1 }
  0xdb   :  { %v334_v3 = vmax.f32 %v10421_v13, %v10423_v14  ;;  %1958 = vmatpush1.bf16.msra.mxu0 %v9988_v4 }
  0xdc   :  { %v10434_v16 = vpop.f32.mrf.mxu0  ;;  %v10436_v17 = vpop.f32.mrf.mxu1  ;;  %1959 = vmatprep.subr.bf16.mxu0 %v9995_v5  ;;  %v9211_v5 = vld [vmem:[%s12734_s3 + $0x70] sm:$0xff]  }
  0xde   :  { %v10439_v18 = vpop.f32.mrf.mxu0  ;;  %v10441_v19 = vpop.f32.mrf.mxu1  ;;  %8180 = vmatmul.mubr.msk.bf16.gmra.mxu0 %vm132_vm0, %v9199_v2  ;;  %8196 = vmatmul.mubr.msk.bf16.gmra.mxu1 %vm132_vm0, %v9200_v15 }
  0xdf   :  { %v336_v20 = vmax.f32 %v10439_v18, %v10441_v19  ;;  %1960 = vmatpush1.bf16.msra.mxu0 %v10002_v6  ;;  %1741 = vmatprep.mubr.bf16.mxu0 %v12745_v1  ;;  %v9201_v6 = vld [vmem:[%s12733_s0 + $0x190] sm:$0xff]  }
  0xe0   :  { %v10449_v4 = vpop.f32.mrf.mxu0  ;;  %v10451_v21 = vpop.f32.mrf.mxu1  ;;  %1871 = vmatprep.mubr.bf16.mxu1 %v12745_v1  ;;  %1961 = vmatprep.subr.bf16.mxu0 %v10009_v7 }
  0xe2   :  { %v10457_v22 = vpop.f32.mrf.mxu0  ;;  %v10459_v23 = vpop.f32.mrf.mxu1 }
  0xe3   :  { %v338_v25 = vmax.f32 %v10457_v22, %v10459_v23  ;;  %1962 = vmatpush1.bf16.msra.mxu0 %v10016_v8  ;;  %v9208_v23 = vld [vmem:[%s12733_s0 + $0x1d8] sm:$0xff]  }
  0xe4   :  { %v10470_v7 = vpop.f32.mrf.mxu0  ;;  %v10472_v26 = vpop.f32.mrf.mxu1  ;;  %1963 = vmatprep.subr.bf16.mxu0 %v10023_v9 }
  0xe5   :  { %12757 = vst [vmem:[#allocation3_spill] sm:$0xff] %v10470_v7  ;;  %12758 = vst [vmem:[#allocation4_spill] sm:$0xff] %v10472_v26 }
  0xe6   :  { %v10475_v27 = vpop.f32.mrf.mxu0  ;;  %v10477_v28 = vpop.f32.mrf.mxu1  ;;  %8181 = vmatmul.mubr.msk.bf16.gmra.mxu0 %vm132_vm0, %v9201_v6  ;;  %8197 = vmatmul.mubr.msk.bf16.gmra.mxu1 %vm132_vm0, %v9202_v24  ;;  %v9207_v24 = vld [vmem:[%s12733_s0 + $0x1d0] sm:$0xff]  }
  0xe7   :  { %v340_v29 = vmax.f32 %v10475_v27, %v10477_v28  ;;  %1751 = vmatprep.mubr.bf16.mxu0 %v12745_v1  ;;  %1881 = vmatprep.mubr.bf16.mxu1 %v12745_v1 }
  0xe8   :  { %v10485_v8 = vpop.f32.mrf.mxu0  ;;  %v10487_v30 = vpop.f32.mrf.mxu1  ;;  %1964 = vmatpush1.bf16.msra.mxu0 %v10030_v10 }
  0xea   :  { %v10492_v31 = vpop.f32.mrf.mxu0  ;;  %v10494_v32 = vpop.f32.mrf.mxu1 }
  0xeb   :  { %v342_v35 = vmax.f32 %v10492_v31, %v10494_v32 }
  0xec   :  { %v10504_v36 = vpop.f32.mrf.mxu0  ;;  %v10506_v10 = vpop.f32.mrf.mxu1 }
  0xee   :  { %v10508_v37 = vpop.f32.mrf.mxu0  ;;  %v10510_v38 = vpop.f32.mrf.mxu1  ;;  %8182 = vmatmul.mubr.msk.bf16.gmra.mxu0 %vm132_vm0, %v9203_v33  ;;  %8198 = vmatmul.mubr.msk.bf16.gmra.mxu1 %vm132_vm0, %v9204_v34 }
  0xef   :  { %v344_v39 = vmax.f32 %v10508_v37, %v10510_v38  ;;  %1981 = vmatprep.mubr.bf16.mxu0 %v12745_v1 }
  0xf0   :  { %v10517_v40 = vpop.f32.mrf.mxu0  ;;  %v10519_v41 = vpop.f32.mrf.mxu1 }
  0xf2   :  { %v213_v43 = vpop.f32.mrf.mxu0  ;;  %v327_v44 = vpop.f32.mrf.mxu1 }
  0xf3   :  { %v346_v46 = vmax.f32 %v213_v43, %v327_v44 }
  0xf4   :  { %v10526_v47 = vpop.f32.mrf.mxu0  ;;  %v10528_v48 = vpop.f32.mrf.mxu1 }
  0xf6   :  { %v423_v49 = vpop.f32.mrf.mxu0  ;;  %8211 = vmatmul.mubr.msk.bf16.vlgmr.msra.gmra.mxu0 %vm132_vm0, %v9205_v45  ;;  %v553_v50 = vpop.f32.mrf.mxu1 }
  0xf7   :  { %v462_v51 = vmax.f32 %v332_v63, %v423_v49  ;;  %1991 = vmatprep.mubr.bf16.mxu0 %v12745_v1 }
  0xf8   :  { %v10535_v52 = vpop.f32.mrf.mxu0  ;;  %v10537_v53 = vpop.f32.mrf.mxu1 }
  0xf9   :  { %v592_v54 = vmax.f32 %v462_v51, %v553_v50 }
  0xfa   :  { %v427_v55 = vpop.f32.mrf.mxu0  ;;  %v557_v56 = vpop.f32.mrf.mxu1 }
  0xfb   :  { %v464_v58 = vmax.f32 %v334_v3, %v427_v55 }
  0xfc   :  { %v10545_v59 = vpop.f32.mrf.mxu0  ;;  %v10547_v60 = vpop.f32.mrf.mxu1 }
  0xfd   :  { %v594_v61 = vmax.f32 %v464_v58, %v557_v56 }
  0xfe   :  { %v433_v62 = vpop.f32.mrf.mxu0  ;;  %8212 = vmatmul.mubr.msk.bf16.gmra.mxu0 %vm132_vm0, %v9206_v57  ;;  %v563_v63 = vpop.f32.mrf.mxu1 }
  0xff   :  { %v466_v2 = vmax.f32 %v336_v20, %v433_v62  ;;  %2001 = vmatprep.mubr.bf16.mxu0 %v12745_v1 }
 0x100   :  { %v10554_v15 = vpop.f32.mrf.mxu0  ;;  %v10556_v6 = vpop.f32.mrf.mxu1 }
 0x101   :  { %v596_v13 = vmax.f32 %v466_v2, %v563_v63 }
 0x102   :  { %v437_v14 = vpop.f32.mrf.mxu0  ;;  %v567_v3 = vpop.f32.mrf.mxu1 }
 0x103   :  { %v468_v27 = vmax.f32 %v338_v25, %v437_v14 }
 0x104   :  { %v10564_v28 = vpop.f32.mrf.mxu0  ;;  %v10566_v18 = vpop.f32.mrf.mxu1 }
 0x105   :  { %12759 = vst [vmem:[#allocation5_spill] sm:$0xff] %v10564_v28  ;;  %12760 = vst [vmem:[#allocation6_spill] sm:$0xff] %v10566_v18  ;;  %v598_v19 = vmax.f32 %v468_v27, %v567_v3 }
 0x106   :  { %v443_v20 = vpop.f32.mrf.mxu0  ;;  %8213 = vmatmul.mubr.msk.bf16.gmra.mxu0 %vm132_vm0, %v9207_v24  ;;  %v573_v31 = vpop.f32.mrf.mxu1 }
 0x107   :  { %v470_v32 = vmax.f32 %v340_v29, %v443_v20  ;;  %2011 = vmatprep.mubr.bf16.mxu0 %v12745_v1 }
 0x108   :  { %v10570_v33 = vpop.f32.mrf.mxu0  ;;  %v10572_v34 = vpop.f32.mrf.mxu1 }
 0x109   :  { %v600_v37 = vmax.f32 %v470_v32, %v573_v31 }
 0x10a   :  { %v447_v38 = vpop.f32.mrf.mxu0  ;;  %v577_v22 = vpop.f32.mrf.mxu1 }
 0x10b   :  { %v472_v25 = vmax.f32 %v342_v35, %v447_v38 }
 0x10c   :  { %v10577_v43 = vpop.f32.mrf.mxu0  ;;  %v10579_v44 = vpop.f32.mrf.mxu1 }
 0x10d   :  { %v602_v45 = vmax.f32 %v472_v25, %v577_v22 }
 0x10e   :  { %v453_v29 = vpop.f32.mrf.mxu0  ;;  %8214 = vmatmul.mubr.msk.bf16.gmra.mxu0 %vm132_vm0, %v9208_v23  ;;  %v10582_v49 = vpop.f32.mrf.mxu1 }
 0x10f   :  { %v10584_v50 = vmax.f32 %v344_v39, %v453_v29  ;;  %v9212_v39 = vld [vmem:[%s12734_s3 + $0x30] sm:$0xff]  }
 0x110   :  { %v10586_v51 = vpop.f32.mrf.mxu0  ;;  %v10588_v55 = vpop.f32.mrf.mxu1 }
 0x111   :  { %v604_v56 = vmax.f32 %v10584_v50, %v10582_v49 }
 0x112   :  { %v457_v35 = vpop.f32.mrf.mxu0  ;;  %v10592_v57 = vpop.f32.mrf.mxu1 }
 0x113   :  { %v10594_v58 = vmax.f32 %v346_v46, %v457_v35 }
 0x114   :  { %v10596_v62 = vpop.f32.mrf.mxu0  ;;  %v10598_v63 = vpop.f32.mrf.mxu1 }
 0x116   :  { %v683_v2 = vpop.f32.mrf.mxu0  ;;  %v10602_v14 = vpop.f32.mrf.mxu1 }
 0x117   :  { %v10604_v3 = vmax.f32 %v592_v54, %v683_v2 }
 0x118   :  { %v10606_v24 = vpop.f32.mrf.mxu0  ;;  %v10608_v27 = vpop.f32.mrf.mxu1 }
 0x11a   :  { %v687_v20 = vpop.f32.mrf.mxu0  ;;  %v10612_v31 = vpop.f32.mrf.mxu1 }
 0x11b   :  { %v10614_v32 = vmax.f32 %v594_v61, %v687_v20  ;;  %v9210_v61 = vld [vmem:[%s12734_s3 + $0x38] sm:$0xff]  }
 0x11c   :  { %v10616_v38 = vpop.f32.mrf.mxu0  ;;  %v10618_v22 = vpop.f32.mrf.mxu1 }
 0x11d   :  { %12761 = vst [vmem:[#allocation7_spill] sm:$0xff] %v10616_v38  ;;  %12762 = vst [vmem:[#allocation8_spill] sm:$0xff] %v10618_v22  ;;  %v10690_v22 = vld [vmem:[%s12735_s4 + $0x18] sm:$0xff]  ;;  %v12767_v38 = vmax.f32 %v10594_v58, %v10592_v57  ;;  %v10733_v57 = vld [vmem:[%s12735_s4 + $0x10] sm:$0xff] }
 0x11e   :  { %v693_v23 = vpop.f32.mrf.mxu0  ;;  %v10622_v25 = vpop.f32.mrf.mxu1  ;;  %12766 = vst [vmem:[#allocation11_spill] sm:$0xff] %v10690_v22  ;;  %12769 = vst [vmem:[#allocation12_spill] sm:$0xff] %v10733_v57  ;;  %v9218_v58 = vld [vmem:[%s12734_s3 + $0x18] sm:$0xff]  }
 0x11f   :  { %v10624_v29 = vmax.f32 %v596_v13, %v693_v23  ;;  %v9209_v13 = vld [vmem:[%s12734_s3 + $0x78] sm:$0xff]   ;;  %v12765_v23 = vmax.f32 %v10413_v0, %v10415_v11 }
 0x120   :  { %v10626_v49 = vpop.f32.mrf.mxu0  ;;  %v10628_v50 = vpop.f32.mrf.mxu1  ;;  %8577 = vmatprep.subr.bf16.mxu1 %v9209_v13 }
 0x121   :  { %8578 = vmatpush3.bf16.msra.mxu1 %v9210_v61 }
 0x122   :  { %v697_v35 = vpop.f32.mrf.mxu0  ;;  %v10632_v2 = vpop.f32.mrf.mxu1  ;;  %8579 = vmatprep.subr.bf16.mxu1 %v9211_v5 }
 0x123   :  { %v10634_v20 = vmax.f32 %v598_v19, %v697_v35 }
 0x124   :  { %v10636_v1 = vpop.f32.mrf.mxu0  ;;  %v10638_v42 = vpop.f32.mrf.mxu1 }
 0x125   :  { %12763 = vst [vmem:[#allocation9_spill] sm:$0xff] %v10636_v1  ;;  %12764 = vst [vmem:[#allocation10_spill] sm:$0xff] %v10638_v42  ;;  %8580 = vmatpush3.bf16.msra.mxu1 %v9212_v39  ;;  %v9213_v42 = vld [vmem:[%s12734_s3 + $0x68] sm:$0xff]   ;;  %v463_v1 = vmax.f32 %v12765_v23, %v10535_v52  ;;  %v12747_v39 = vmov 0.0   ;;  %v9215_v23 = vld [vmem:[%s12734_s3 + $0x60] sm:$0xff]  }
 0x126   :  { %v703_v9 = vpop.f32.mrf.mxu0  ;;  %v10648_v54 = vpop.f32.mrf.mxu1  ;;  %8777 = vmatprep.subr.mxu0 %v12747_v39  ;;  %8581 = vmatprep.subr.bf16.mxu1 %v9213_v42  ;;  %v9217_v42 = vld [vmem:[%s12734_s3 + $0x58] sm:$0xff]  }
 0x127   :  { %v10650_v19 = vmax.f32 %v600_v37, %v703_v9  ;;  %8778 = vmatpush3.msra.mxu0 %v10690_v22  ;;  %v593_v18 = vmax.f32 %v463_v1, %v10537_v53 }
 0x128   :  { %v10652_v35 = vpop.f32.mrf.mxu0  ;;  %v10654_v46 = vpop.f32.mrf.mxu1  ;;  %8779 = vmatprep.subr.mxu0 %v12747_v39 }
 0x129   :  { %v723_v28 = vmax.f32 %v593_v18, %v10606_v24  ;;  %8780 = vmatpush3.msra.mxu0 %v10733_v57  ;;  %v9219_v18 = vld [vmem:[%s12734_s3 + $0x50] sm:$0xff]  }
 0x12a   :  { %v707_v12 = vpop.f32.mrf.mxu0  ;;  %v10664_v13 = vpop.f32.mrf.mxu1 }
 0x12b   :  { %v10666_v9 = vmax.f32 %v602_v45, %v707_v12  ;;  %v9214_v12 = vld [vmem:[%s12734_s3 + $0x28] sm:$0xff]  }
 0x12c   :  { %v10668_v37 = vpop.f32.mrf.mxu0  ;;  %v10670_v61 = vpop.f32.mrf.mxu1  ;;  %8582 = vmatpush3.bf16.msra.mxu1 %v9214_v12 }
 0x12d   :  { %8583 = vmatprep.subr.bf16.mxu1 %v9215_v23  ;;  %v12768_v23 = vmax.f32 %v10449_v4, %v10451_v21  ;;  %v853_v4 = vmax.f32 %v723_v28, %v10608_v27  ;;  %v12770_v21 = vmax.f32 %v10604_v3, %v10602_v14  ;;  %v9220_v14 = vld [vmem:[%s12734_s3 + $0x10] sm:$0xff]  }
 0x12e   :  { %v713_v5 = vpop.f32.mrf.mxu0  ;;  %v10684_v45 = vpop.f32.mrf.mxu1 }
 0x12f   :  { %v10692_v0 = vmax.f32 %v604_v56, %v713_v5  ;;  %v9216_v56 = vld [vmem:[%s12734_s3 + $0x20] sm:$0xff]   ;;  %v467_v39 = vmax.f32 %v12768_v23, %v10554_v15 }
 0x130   :  { %v10695_v11 = vpop.f32.mrf.mxu0  ;;  %v10697_v52 = vpop.f32.mrf.mxu1  ;;  %8584 = vmatpush3.bf16.msra.mxu1 %v9216_v56  ;;  %v12771_v56 = vmov 0.0  }
 0x131   :  { %8585 = vmatprep.subr.bf16.mxu1 %v9217_v42  ;;  %8781 = vmatprep.subr.mxu0 %v12771_v56  ;;  %v597_v26 = vmax.f32 %v467_v39, %v10556_v6 }
 0x132   :  { %v717_v12 = vpop.f32.mrf.mxu0  ;;  %v10709_v5 = vpop.f32.mrf.mxu1  ;;  %8785 = vmatprep.mubr.msk.f32.mxu0 %vm9896_vm1, %v12771_v56 }
 0x133   :  { %v10715_v7 = vmax.f32 %v12767_v38, %v717_v12 }
 0x134   :  { %v10717_v1 = vpop.f32.mrf.mxu0  ;;  %v10719_v53 = vpop.f32.mrf.mxu1  ;;  %8586 = vmatpush3.bf16.msra.mxu1 %v9218_v58  ;;  %v727_v58 = vmax.f32 %v597_v26, %v10626_v49  ;;  %v12773_v26 = vmax.f32 %v10485_v8, %v10487_v30 }
 0x135   :  { %8587 = vmatprep.subr.bf16.mxu1 %v9219_v18 }
 0x136   :  { %v943_v24 = vpop.f32.mrf.mxu0  ;;  %v10738_v38 = vpop.f32.mrf.mxu1  ;;  %v471_v49 = vmax.f32 %v12773_v26, %v10570_v33  ;;  %v9223_v33 = vld [vmem:[%s12734_s3 + $0x40] sm:$0xff]  }
 0x137   :  { %v10745_v15 = vmax.f32 %v12770_v21, %v943_v24  ;;  %v12772_v24 = vmax.f32 %v10614_v32, %v10612_v31  ;;  %v9222_v32 = vld [vmem:[%s12734_s3 + $0x8] sm:$0xff]  }
 0x138   :  { %v945_v12 = vpop.f32.mrf.mxu0  ;;  %v10748_v23 = vpop.f32.mrf.mxu1  ;;  %8588 = vmatpush3.bf16.msra.mxu1 %v9220_v14  ;;  %v601_v26 = vmax.f32 %v471_v49, %v10572_v34  ;;  %v12776_v49 = vmax.f32 %v10634_v20, %v10632_v2 }
 0x139   :  { %v10754_v42 = vmax.f32 %v853_v4, %v945_v12  ;;  %v1112_v28 = vmax.f32 %v10745_v15, %v10738_v38  ;;  %v9221_v12 = vld [vmem:[%s12734_s3 + $0x48] sm:$0xff]  }
 0x13a   :  { %v947_v3 = vpop.f32.mrf.mxu0  ;;  %v10761_v27 = vpop.f32.mrf.mxu1  ;;  %8589 = vmatprep.subr.bf16.mxu1 %v9221_v12  ;;  %v731_v34 = vmax.f32 %v601_v26, %v10652_v35  ;;  %v12777_v35 = vmax.f32 %v10517_v40, %v10519_v41  ;;  %v10849_v40 = vld [vmem:[%s12735_s4] sm:$0xff] }
 0x13b   :  { %v10767_v21 = vmax.f32 %v12772_v24, %v947_v3  ;;  %v857_v3 = vmax.f32 %v727_v58, %v10628_v50  ;;  %v12774_v24 = vmax.f32 %v10624_v29, %v10622_v25  ;;  %v10808_v25 = vld [vmem:[%s12735_s4 + $0x8] sm:$0xff]  ;;  %v9224_v29 = vld [vmem:[%s12734_s3] sm:$0xff]   ;;  %12779 = vst [vmem:[#allocation14_spill] sm:$0xff] %v10849_v40 }
 0x13c   :  { %v10771_v39 = vpop.f32.mrf.mxu0  ;;  %v10773_v4 = vpop.f32.mrf.mxu1  ;;  %8590 = vmatpush3.bf16.msra.mxu1 %v9222_v32  ;;  %12775 = vst [vmem:[#allocation13_spill] sm:$0xff] %v10808_v25  ;;  %8782 = vmatpush3.msra.mxu0 %v10808_v25  ;;  %v861_v26 = vmax.f32 %v731_v34, %v10654_v46  ;;  %v12780_v34 = vmax.f32 %v10666_v9, %v10664_v13 }
 0x13d   :  { %8591 = vmatprep.subr.bf16.mxu1 %v9223_v33  ;;  %8783 = vmatprep.subr.mxu0 %v12771_v56  ;;  %v12784_v38 = vmax.f32 %v10767_v21, %v10761_v27  ;;  %v347_v27 = vmax.f32 %v10526_v47, %v10528_v48 }
 0x13e   :  { %v953_v18 = vpop.f32.mrf.mxu0  ;;  %v10787_v14 = vpop.f32.mrf.mxu1  ;;  %8784 = vmatpush3.msra.mxu0 %v10849_v40 }
 0x13f   :  { %v10793_v6 = vmax.f32 %v12774_v24, %v953_v18  ;;  %8786 = vmatmul.mubr.f32.vlgmr.msra.gmra.mxu0 %v12771_v56  ;;  %8799 = vmatprep.subr.mxu0 %v12771_v56 }
 0x140   :  { %v955_v8 = vpop.f32.mrf.mxu0  ;;  %v10795_v30 = vpop.f32.mrf.mxu1  ;;  %8592 = vmatpush3.bf16.msra.mxu1 %v9224_v29  ;;  %v12778_v29 = vmax.f32 %v10650_v19, %v10648_v54  ;;  %8800 = vmatpush3.msra.mxu0 %v10690_v22 }
 0x141   :  { %v10801_v31 = vmax.f32 %v857_v3, %v955_v8  ;;  %8788 = vmatprep.subr.mxu1 %v12771_v56  ;;  %v475_v8 = vmax.f32 %v12777_v35, %v10586_v51  ;;  %8807 = vmatprep.mubr.msk.f32.mxu0 %vm9896_vm1, %v12771_v56 }
 0x142   :  { %v957_v58 = vpop.f32.mrf.mxu0  ;;  %v10813_v12 = vpop.f32.mrf.mxu1  ;;  %8801 = vmatprep.subr.mxu0 %v12771_v56 }
 0x143   :  { %v10820_v32 = vmax.f32 %v12776_v49, %v957_v58  ;;  %v605_v41 = vmax.f32 %v475_v8, %v10588_v55  ;;  %8802 = vmatpush3.msra.mxu0 %v10733_v57 }
 0x144   :  { %v10825_v3 = vpop.f32.mrf.mxu0  ;;  %v10827_v24 = vpop.f32.mrf.mxu1  ;;  %8803 = vmatprep.subr.mxu0 %v12771_v56 }
 0x145   :  { %v735_v55 = vmax.f32 %v605_v41, %v10695_v11  ;;  %8804 = vmatpush3.msra.mxu0 %v10808_v25 }
 0x146   :  { %v963_v20 = vpop.f32.mrf.mxu0  ;;  %v10836_v33 = vpop.f32.mrf.mxu1  ;;  %8805 = vmatprep.subr.mxu0 %v12771_v56 }
 0x147   :  { %v10842_v58 = vmax.f32 %v12778_v29, %v963_v20  ;;  %v865_v29 = vmax.f32 %v735_v55, %v10697_v52  ;;  %8806 = vmatpush3.msra.mxu0 %v10849_v40 }
 0x148   :  { %v965_v49 = vpop.f32.mrf.mxu0  ;;  %v10844_v18 = vpop.f32.mrf.mxu1  ;;  %8821 = vmatprep.subr.mxu0 %v12771_v56 }
 0x149   :  { %v10852_v51 = vmax.f32 %v861_v26, %v965_v49  ;;  %v12781_v49 = vmax.f32 %v10692_v0, %v10684_v45  ;;  %v12782_v45 = vmax.f32 %v10715_v7, %v10709_v5  ;;  %v343_v7 = vmax.f32 %v10504_v36, %v10506_v10 }
 0x14a   :  { %v967_v54 = vpop.f32.mrf.mxu0  ;;  %v10859_v19 = vpop.f32.mrf.mxu1  ;;  %v12783_v5 = vmax.f32 %v10754_v42, %v10748_v23  ;;  %v12785_v42 = vmax.f32 %v10793_v6, %v10787_v14  ;;  %v477_v6 = vmax.f32 %v347_v27, %v10596_v62  ;;  %v12787_v14 = vmax.f32 %v10820_v32, %v10813_v12 }
 0x14b   :  { %v10867_v35 = vmax.f32 %v12780_v34, %v967_v54  ;;  %v12788_v62 = vmax.f32 %v10842_v58, %v10836_v33 }
 0x14c   :  { %v969_v20 = vpop.f32.mrf.mxu0  ;;  %v10874_v26 = vpop.f32.mrf.mxu1 }
 0x14d   :  { %v12790_v33 = vmax.f32 %v10867_v35, %v10859_v19 }
 0x14e   :  { %v973_v13 = vpop.f32.mrf.mxu0  ;;  %v10880_v9 = vpop.f32.mrf.mxu1 }
 0x14f   :  { %v10887_v41 = vmax.f32 %v12781_v49, %v973_v13 }
 0x150   :  { %v975_v54 = vpop.f32.mrf.mxu0  ;;  %v10890_v34 = vpop.f32.mrf.mxu1 }
 0x151   :  { %v10893_v11 = vmax.f32 %v865_v29, %v975_v54  ;;  %v1124_v8 = vmax.f32 %v10887_v41, %v10880_v9 }
 0x152   :  { %v977_v52 = vpop.f32.mrf.mxu0  ;;  %v10898_v55 = vpop.f32.mrf.mxu1 }
 0x153   :  { %v996_v0 = vmax.f32 %v12782_v45, %v977_v52  ;;  %v1125_v13 = vmax.f32 %v10893_v11, %v10890_v34 }
 0x154   :  { %v979_v49 = vpop.f32.mrf.mxu0  ;;  %v1109_v29 = vpop.f32.mrf.mxu1 }
 0x155   :  { %v1126_v54 = vmax.f32 %v996_v0, %v10898_v55  ;;  %v473_v55 = vmax.f32 %v343_v7, %v10577_v43  ;;  %v12786_v0 = vmax.f32 %v10801_v31, %v10795_v30  ;;  %v607_v30 = vmax.f32 %v477_v6, %v10598_v63 }
 0x156   :  { %v1203_v46 = vpop.f32.mrf.mxu0  ;;  %v10907_v9 = vpop.f32.mrf.mxu1 }
 0x157   :  { %v10912_v41 = vmax.f32 %v1112_v28, %v1203_v46  ;;  %v603_v23 = vmax.f32 %v473_v55, %v10579_v44 }
 0x158   :  { %v1205_v2 = vpop.f32.mrf.mxu0  ;;  %v10914_v50 = vpop.f32.mrf.mxu1 }
 0x159   :  { %v10921_v11 = vmax.f32 %v12783_v5, %v1205_v2  ;;  %v733_v21 = vmax.f32 %v603_v23, %v10668_v37  ;;  %v737_v23 = vmax.f32 %v607_v30, %v10717_v1 }
 0x15a   :  { %v1207_v34 = vpop.f32.mrf.mxu0  ;;  %v10923_v52 = vpop.f32.mrf.mxu1 }
 0x15b   :  { %v10929_v15 = vmax.f32 %v12784_v38, %v1207_v34  ;;  %v863_v48 = vmax.f32 %v733_v21, %v10670_v61  ;;  %v867_v1 = vmax.f32 %v737_v23, %v10719_v53 }
 0x15c   :  { %v10931_v28 = vpop.f32.mrf.mxu0  ;;  %v10933_v46 = vpop.f32.mrf.mxu1 }
 0x15d   :  { %v993_v38 = vmax.f32 %v863_v48, %v969_v20 }
 0x15e   :  { %v1213_v36 = vpop.f32.mrf.mxu0  ;;  %v10935_v10 = vpop.f32.mrf.mxu1 }
 0x15f   :  { %v10941_v2 = vmax.f32 %v12785_v42, %v1213_v36  ;;  %v12789_v42 = vmax.f32 %v10852_v51, %v10844_v18  ;;  %v1123_v63 = vmax.f32 %v993_v38, %v10874_v26 }
 0x160   :  { %v1215_v43 = vpop.f32.mrf.mxu0  ;;  %v10943_v45 = vpop.f32.mrf.mxu1 }
 0x161   :  { %v10951_v7 = vmax.f32 %v12786_v0, %v1215_v43 }
 0x162   :  { %v1217_v5 = vpop.f32.mrf.mxu0  ;;  %v10953_v44 = vpop.f32.mrf.mxu1 }
 0x163   :  { %v10959_v34 = vmax.f32 %v12787_v14, %v1217_v5  ;;  %v997_v5 = vmax.f32 %v867_v1, %v979_v49 }
 0x164   :  { %v10961_v55 = vpop.f32.mrf.mxu0  ;;  %v10963_v47 = vpop.f32.mrf.mxu1 }
 0x166   :  { %v1223_v37 = vpop.f32.mrf.mxu0  ;;  %v10966_v31 = vpop.f32.mrf.mxu1 }
 0x167   :  { %v10972_v36 = vmax.f32 %v12788_v62, %v1223_v37  ;;  %v1127_v37 = vmax.f32 %v997_v5, %v1109_v29 }
 0x168   :  { %v1225_v12 = vpop.f32.mrf.mxu0  ;;  %v10974_v32 = vpop.f32.mrf.mxu1 }
 0x169   :  { %v10980_v61 = vmax.f32 %v12789_v42, %v1225_v12 }
 0x16a   :  { %v1227_v43 = vpop.f32.mrf.mxu0  ;;  %v10982_v27 = vpop.f32.mrf.mxu1 }
 0x16b   :  { %v10988_v58 = vmax.f32 %v12790_v33, %v1227_v43 }
 0x16c   :  { %v1229_v20 = vpop.f32.mrf.mxu0  ;;  %v10990_v21 = vpop.f32.mrf.mxu1 }
 0x16d   :  { %12791 = vst [vmem:[#allocation15_spill] sm:$0xff] %v10990_v21  ;;  %v10993_v0 = vmax.f32 %v1123_v63, %v1229_v20  ;;  %v12826_v21 = vld [vmem:[#allocation6_spill] sm:$0xff] }
 0x16e   :  { %v1233_v18 = vpop.f32.mrf.mxu0  ;;  %v10995_v51 = vpop.f32.mrf.mxu1 }
 0x16f   :  { %12792 = vst [vmem:[#allocation16_spill] sm:$0xff] %v10993_v0  ;;  %12793 = vst [vmem:[#allocation17_spill] sm:$0xff] %v10995_v51  ;;  %v10997_v6 = vmax.f32 %v1124_v8, %v1233_v18 }
 0x170   :  { %v1235_v14 = vpop.f32.mrf.mxu0  ;;  %v10999_v26 = vpop.f32.mrf.mxu1 }
 0x171   :  { %12794 = vst [vmem:[#allocation18_spill] sm:$0xff] %v10997_v6  ;;  %12795 = vst [vmem:[#allocation19_spill] sm:$0xff] %v10999_v26  ;;  %v11001_v48 = vmax.f32 %v1125_v13, %v1235_v14  ;;  %v12822_v6 = vld [vmem:[#allocation7_spill] sm:$0xff] }
 0x172   :  { %v1237_v19 = vpop.f32.mrf.mxu0  ;;  %v11003_v35 = vpop.f32.mrf.mxu1 }
 0x173   :  { %12796 = vst [vmem:[#allocation20_spill] sm:$0xff] %v11001_v48  ;;  %12797 = vst [vmem:[#allocation21_spill] sm:$0xff] %v11003_v35  ;;  %v11005_v30 = vmax.f32 %v1126_v54, %v1237_v19 }
 0x174   :  { %v1239_v53 = vpop.f32.mrf.mxu0  ;;  %v11007_v38 = vpop.f32.mrf.mxu1 }
 0x175   :  { %12798 = vst [vmem:[#allocation22_spill] sm:$0xff] %v11005_v30  ;;  %12799 = vst [vmem:[#allocation23_spill] sm:$0xff] %v11007_v38  ;;  %v11009_v62 = vmax.f32 %v1127_v37, %v1239_v53 }
 0x176   :  { %v11011_v12 = vpop.f32.mrf.mxu0  ;;  %v11013_v8 = vpop.f32.mrf.mxu1 }
 0x177   :  { %12800 = vst [vmem:[#allocation24_spill] sm:$0xff] %v11009_v62 }
 0x178   :  { %v11015_v49 = vpop.f32.mrf.mxu0  ;;  %v11017_v23 = vpop.f32.mrf.mxu1 }
 0x17a   :  { %v11019_v13 = vpop.f32.mrf.mxu0  ;;  %v11021_v42 = vpop.f32.mrf.mxu1 }
 0x17c   :  { %v11023_v29 = vpop.f32.mrf.mxu0  ;;  %v11025_v54 = vpop.f32.mrf.mxu1 }
 0x17e   :  { %v11027_v43 = vpop.f32.mrf.mxu0  ;;  %v11029_v63 = vpop.f32.mrf.mxu1 }
 0x180   :  { %v11031_v33 = vpop.f32.mrf.mxu0  ;;  %v11033_v20 = vpop.f32.mrf.mxu1 }
 0x182   :  { %v11035_v1 = vpop.f32.mrf.mxu0  ;;  %v11037_v18 = vpop.f32.mrf.mxu1 }
 0x183   :  { %12801 = vst [vmem:[#allocation25_spill] sm:$0xff] %v11037_v18 }
 0x184   :  { %v11039_v5 = vpop.f32.mrf.mxu0  ;;  %v11041_v14 = vpop.f32.mrf.mxu1 }
 0x185   :  { %12802 = vst [vmem:[#allocation26_spill] sm:$0xff] %v11041_v14 }
 0x186   :  { %v11043_v19 = vpop.f32.mrf.mxu0  ;;  %v11045_v37 = vpop.f32.mrf.mxu1 }
 0x187   :  { %12803 = vst [vmem:[#allocation27_spill] sm:$0xff] %v11043_v19  ;;  %12804 = vst [vmem:[#allocation28_spill] sm:$0xff] %v11045_v37 }
 0x188   :  { %v11047_v53 = vpop.f32.mrf.mxu0  ;;  %v11049_v40 = vpop.f32.mrf.mxu1 }
 0x189   :  { %12805 = vst [vmem:[#allocation29_spill] sm:$0xff] %v11047_v53  ;;  %12806 = vst [vmem:[#allocation30_spill] sm:$0xff] %v11049_v40 }
 0x18a   :  { %v11051_v25 = vpop.f32.mrf.mxu0  ;;  %v11053_v57 = vpop.f32.mrf.mxu1 }
 0x18b   :  { %12807 = vst [vmem:[#allocation31_spill] sm:$0xff] %v11051_v25  ;;  %12808 = vst [vmem:[#allocation32_spill] sm:$0xff] %v11053_v57 }
 0x18c   :  { %v11055_v56 = vpop.f32.mrf.mxu0  ;;  %v11057_v22 = vpop.f32.mrf.mxu1 }
 0x18d   :  { %12809 = vst [vmem:[#allocation33_spill] sm:$0xff] %v11055_v56  ;;  %12810 = vst [vmem:[#allocation34_spill] sm:$0xff] %v11057_v22  ;;  %v335_v22 = vmax.f32 %v10434_v16, %v10436_v17  ;;  %v12823_v16 = vld [vmem:[#allocation5_spill] sm:$0xff] }
 0x18e   :  { %v11059_v62 = vpop.f32.mrf.mxu0  ;;  %v11061_v38 = vpop.f32.mrf.mxu1 }
 0x18f   :  { %12811 = vst [vmem:[#allocation35_spill] sm:$0xff] %v11059_v62  ;;  %12812 = vst [vmem:[#allocation36_spill] sm:$0xff] %v11061_v38 }
 0x190   :  { %v11063_v30 = vpop.f32.mrf.mxu0  ;;  %v11065_v35 = vpop.f32.mrf.mxu1 }
 0x191   :  { %12813 = vst [vmem:[#allocation37_spill] sm:$0xff] %v11063_v30  ;;  %12814 = vst [vmem:[#allocation38_spill] sm:$0xff] %v11065_v35  ;;  %v465_v30 = vmax.f32 %v335_v22, %v10545_v59  ;;  %v12825_v22 = vld [vmem:[#allocation8_spill] sm:$0xff] }
 0x192   :  { %v11067_v37 = vpop.f32.mrf.mxu0  ;;  %v11069_v53 = vpop.f32.mrf.mxu1 }
 0x193   :  { %12815 = vst [vmem:[#allocation39_spill] sm:$0xff] %v11067_v37  ;;  %12816 = vst [vmem:[#allocation40_spill] sm:$0xff] %v11069_v53  ;;  %v595_v53 = vmax.f32 %v465_v30, %v10547_v60 }
 0x194   :  { %v11071_v40 = vpop.f32.mrf.mxu0  ;;  %v11073_v25 = vpop.f32.mrf.mxu1 }
 0x195   :  { %12817 = vst [vmem:[#allocation41_spill] sm:$0xff] %v11071_v40  ;;  %12818 = vst [vmem:[#allocation42_spill] sm:$0xff] %v11073_v25  ;;  %v12820_v40 = vld [vmem:[#allocation4_spill] sm:$0xff]  ;;  %v12821_v25 = vld [vmem:[#allocation3_spill] sm:$0xff]  ;;  %v725_v51 = vmax.f32 %v595_v53, %v12822_v6 }
 0x196   :  { %v1723_v57 = vpop.f32.mrf.mxu0  ;;  %v11075_v56 = vpop.f32.mrf.mxu1  ;;  %v339_v48 = vmax.f32 %v12821_v25, %v12820_v40  ;;  %v12828_v40 = vld [vmem:[#allocation9_spill] sm:$0xff] }
 0x197   :  { %v855_v0 = vmax.f32 %v725_v51, %v12825_v22  ;;  %v1372_v51 = vmax.f32 %v10912_v41, %v10907_v9  ;;  %v1374_v9 = vmax.f32 %v10929_v15, %v10923_v52  ;;  %v1376_v52 = vmax.f32 %v10941_v2, %v10935_v10 }
 0x198   :  { %v1725_v62 = vpop.f32.mrf.mxu0  ;;  %v11079_v38 = vpop.f32.mrf.mxu1  ;;  %v469_v17 = vmax.f32 %v339_v48, %v12823_v16 }
 0x199   :  { %v985_v25 = vmax.f32 %v855_v0, %v10771_v39  ;;  %v1373_v39 = vmax.f32 %v10921_v11, %v10914_v50  ;;  %v1506_v2 = vmax.f32 %v1376_v52, %v11027_v43  ;;  %v12836_v52 = vld [vmem:[#allocation17_spill] sm:$0xff] }
 0x19a   :  { %v1727_v35 = vpop.f32.mrf.mxu0  ;;  %v11084_v37 = vpop.f32.mrf.mxu1 }
 0x19b   :  { %12819 = vst [vmem:[#allocation43_spill] sm:$0xff] %v11084_v37  ;;  %v599_v37 = vmax.f32 %v469_v17, %v12826_v21  ;;  %v12830_v21 = vld [vmem:[#allocation10_spill] sm:$0xff]  ;;  %v1503_v41 = vmax.f32 %v1373_v39, %v11015_v49 }
 0x19c   :  { %v11082_v14 = vpop.f32.mrf.mxu0  ;;  %v11093_v19 = vpop.f32.mrf.mxu1 }
 0x19d   :  { %v729_v6 = vmax.f32 %v599_v37, %v12828_v40  ;;  %v1502_v37 = vmax.f32 %v1372_v51, %v11011_v12  ;;  %v1633_v15 = vmax.f32 %v1503_v41, %v11017_v23 }
 0x19e   :  { %v11089_v26 = vpop.f32.mrf.mxu0  ;;  %v11101_v60 = vpop.f32.mrf.mxu1 }
 0x19f   :  { %v859_v17 = vmax.f32 %v729_v6, %v12830_v21  ;;  %v1632_v11 = vmax.f32 %v1502_v37, %v11013_v8  ;;  %v1763_v23 = vmax.f32 %v1633_v15, %v1725_v62  ;;  %v12837_v15 = vld [vmem:[#allocation18_spill] sm:$0xff] }
 0x1a0   :  { %v11095_v18 = vpop.f32.mrf.mxu0  ;;  %v11109_v48 = vpop.f32.mrf.mxu1 }
 0x1a1   :  { %v989_v40 = vmax.f32 %v859_v17, %v10825_v3 }
 0x1a2   :  { %v11097_v59 = vpop.f32.mrf.mxu0 }
 0x1a3   :  { %12824 = vst [vmem:[#allocation4_spill] sm:$0xff] %v11097_v59  ;;  %v1115_v59 = vmax.f32 %v985_v25, %v10773_v4  ;;  %v1119_v3 = vmax.f32 %v989_v40, %v10827_v24 }
 0x1a4   :  { %v11103_v30 = vpop.f32.mrf.mxu0 }
 0x1a5   :  { %12827 = vst [vmem:[#allocation3_spill] sm:$0xff] %v11103_v30  ;;  %v2040_v30 = vlaneseq  ;;  %v1245_v0 = vmax.f32 %v1115_v59, %v10931_v28  ;;  %v1504_v28 = vmax.f32 %v1374_v9, %v11019_v13  ;;  %v1249_v8 = vmax.f32 %v1119_v3, %v10961_v55 }
 0x1a6   :  { %v11107_v53 = vpop.f32.mrf.mxu0 }
 0x1a7   :  { %v11133_v6 = vshrl.u32 %v2040_v30, 7  ;;  %v1375_v50 = vmax.f32 %v1245_v0, %v10933_v46  ;;  %v1762_v30 = vmax.f32 %v1632_v11, %v1723_v57  ;;  %v1377_v46 = vmax.f32 %v10951_v7, %v10943_v45  ;;  %v2038_v57 = vld [vmem:[%s12736_s2] sm:$0x3] }
 0x1a8   :  { %v11111_v16 = vpop.f32.mrf.mxu0  ;;  %v1634_v10 = vmax.f32 %v1504_v28, %v11021_v42  ;;  %v1378_v45 = vmax.f32 %v10959_v34, %v10953_v44  ;;  %v1379_v62 = vmax.f32 %v1249_v8, %v10963_v47  ;;  %v1636_v34 = vmax.f32 %v1506_v2, %v11029_v63  ;;  %v12832_v11 = vld [vmem:[#allocation15_spill] sm:$0xff]  ;;  %v12834_v28 = vld [vmem:[#allocation25_spill] sm:$0xff] }
 0x1a9   :  { %12829 = vst [vmem:[#allocation7_spill] sm:$0xff] %v11111_v16  ;;  %v11124_v16 = vpop.f32.mrf.mxu1  ;;  %v1505_v49 = vmax.f32 %v1375_v50, %v11023_v29  ;;  %v11153_v24 = vsub.s32 0, %v11133_v6  ;;  %v11156_v51 = vsub.s32 1, %v11133_v6  ;;  %v1507_v7 = vmax.f32 %v1377_v46, %v11031_v33  ;;  %v12839_v46 = vld [vmem:[#allocation20_spill] sm:$0xff] }
 0x1aa   :  { %v11117_v22 = vpop.f32.mrf.mxu0  ;;  %v1892_v42 = vmax.f32 %v1762_v30, %v11075_v56  ;;  %v1764_v17 = vmax.f32 %v1634_v10, %v1727_v35  ;;  %v1508_v43 = vmax.f32 %v1378_v45, %v11035_v1  ;;  %v1893_v33 = vmax.f32 %v1763_v23, %v11079_v38  ;;  %v12831_v38 = vld [vmem:[#allocation43_spill] sm:$0xff]  ;;  %v12840_v10 = vld [vmem:[#allocation26_spill] sm:$0xff]  ;;  %v12841_v23 = vld [vmem:[#allocation29_spill] sm:$0xff] }
 0x1ab   :  { %v11139_v12 = vpop.f32.mrf.mxu1  ;;  %v1635_v21 = vmax.f32 %v1505_v49, %v11025_v54  ;;  %v11175_v0 = vrot.slane %v2038_v57, %v11153_v24  ;;  %v11178_v44 = vrot.slane %v2038_v57, %v11156_v51  ;;  %v1380_v56 = vmax.f32 %v10972_v36, %v10966_v31  ;;  %v12833_v31 = vld [vmem:[#allocation16_spill] sm:$0xff] }
 0x1ac   :  { %v11126_v4 = vpop.f32.mrf.mxu0  ;;  %v1381_v47 = vmax.f32 %v10980_v61, %v10974_v32  ;;  %v1637_v35 = vmax.f32 %v1507_v7, %v11033_v20  ;;  %v1509_v1 = vmax.f32 %v1379_v62, %v11039_v5  ;;  %v1382_v63 = vmax.f32 %v10988_v58, %v10982_v27  ;;  %v12835_v61 = vld [vmem:[#allocation27_spill] sm:$0xff]  ;;  %v12842_v45 = vld [vmem:[#allocation4_spill] sm:$0xff] }
 0x1ad   :  { %v11166_v55 = vpop.f32.mrf.mxu1  ;;  %v1765_v54 = vmax.f32 %v1635_v21, %v11082_v14  ;;  %v1894_v41 = vmax.f32 %v1764_v17, %v12831_v38  ;;  %v1766_v14 = vmax.f32 %v1636_v34, %v11089_v26  ;;  %v1383_v36 = vmax.f32 %v12833_v31, %v12832_v11  ;;  %v12838_v26 = vld [vmem:[#allocation19_spill] sm:$0xff] }
 0x1ae   :  { %v11131_v25 = vpop.f32.mrf.mxu0  ;;  %v1638_v32 = vmax.f32 %v1508_v43, %v12834_v28  ;;  %v1510_v20 = vmax.f32 %v1380_v56, %v12835_v61  ;;  %v1767_v5 = vmax.f32 %v1637_v35, %v11095_v18  ;;  %v1384_v49 = vmax.f32 %v12837_v15, %v12836_v52  ;;  %v12843_v43 = vld [vmem:[#allocation28_spill] sm:$0xff]  ;;  %v12844_v34 = vld [vmem:[#allocation31_spill] sm:$0xff] }
 0x1af   :  { %v11189_v40 = vpop.f32.mrf.mxu1  ;;  %v1895_v27 = vmax.f32 %v1765_v54, %v11093_v19  ;;  %v1385_v8 = vmax.f32 %v12839_v46, %v12838_v26  ;;  %v1639_v2 = vmax.f32 %v1509_v1, %v12840_v10  ;;  %v1511_v57 = vmax.f32 %v1381_v47, %v12841_v23  ;;  %v12850_v15 = vld [vmem:[#allocation32_spill] sm:$0xff]  ;;  %v12853_v23 = vld [vmem:[#allocation23_spill] sm:$0xff] }
 0x1b0   :  { %v11141_v59 = vpop.f32.mrf.mxu0  ;;  %v1768_v7 = vmax.f32 %v1638_v32, %v12842_v45  ;;  %v1897_v54 = vmax.f32 %v1767_v5, %v11109_v48  ;;  %v12848_v5 = vld [vmem:[#allocation21_spill] sm:$0xff]  ;;  %v12852_v26 = vld [vmem:[#allocation7_spill] sm:$0xff] }
 0x1b1   :  { %v11209_v21 = vpop.f32.mrf.mxu1 }
 0x1b2   :  { %v11150_v13 = vpop.f32.mrf.mxu0  ;;  %v1898_v11 = vmax.f32 %v1768_v7, %v11124_v16  ;;  %v12855_v7 = vld [vmem:[#allocation34_spill] sm:$0xff] }
 0x1b3   :  { %v11223_v28 = vpop.f32.mrf.mxu1 }
 0x1b4   :  { %v11168_v29 = vpop.f32.mrf.mxu0 }
 0x1b6   :  { %v1983_v39 = vpop.f32.mrf.mxu0 }
 0x1b7   :  { %v2022_v37 = vmax.f32 %v1892_v42, %v1983_v39  ;;  %v1896_v42 = vmax.f32 %v1766_v14, %v11101_v60  ;;  %v1640_v39 = vmax.f32 %v1510_v20, %v12843_v43  ;;  %v12846_v60 = vld [vmem:[#allocation30_spill] sm:$0xff]  ;;  %v12847_v14 = vld [vmem:[#allocation33_spill] sm:$0xff] }
 0x1b8   :  { %v1985_v9 = vpop.f32.mrf.mxu0 }
 0x1b9   :  { %v2023_v50 = vmax.f32 %v1893_v33, %v1985_v9  ;;  %v2050_v58 = vadd.f32 %v11175_v0, %v2022_v37  ;;  %v1512_v33 = vmax.f32 %v1382_v63, %v12844_v34  ;;  %v12845_v37 = vld [vmem:[#allocation3_spill] sm:$0xff]  ;;  %v1770_v31 = vmax.f32 %v1640_v39, %v11107_v53 }
 0x1ba   :  { %v1987_v3 = vpop.f32.mrf.mxu0  ;;  %v1769_v56 = vmax.f32 %v1639_v2, %v12845_v37  ;;  %v12858_v37 = vld [vmem:[#allocation39_spill] sm:$0xff] }
 0x1bb   :  { %v2024_v30 = vmax.f32 %v1894_v41, %v1987_v3  ;;  %v2051_v17 = vadd.f32 %v11178_v44, %v2023_v50  ;;  %v2066_v35 = vmax.f32 %v2050_v58, 0.0  ;;  %v1641_v41 = vmax.f32 %v1511_v57, %v12846_v60  ;;  %v12849_v3 = vld [vmem:[#allocation22_spill] sm:$0xff]  ;;  %v12851_v58 = vld [vmem:[#allocation35_spill] sm:$0xff]  ;;  %v12854_v57 = vld [vmem:[#allocation24_spill] sm:$0xff] }
 0x1bc   :  { %v1989_v18 = vpop.f32.mrf.mxu0  ;;  %v1513_v50 = vmax.f32 %v1383_v36, %v12847_v14  ;;  %v1386_v52 = vmax.f32 %v12849_v3, %v12848_v5  ;;  %v1899_v16 = vmax.f32 %v1769_v56, %v11139_v12  ;;  %v1387_v45 = vmax.f32 %v12854_v57, %v12853_v23  ;;  %v12860_v60 = vld [vmem:[#allocation38_spill] sm:$0xff]  ;;  %v12861_v14 = vld [vmem:[#allocation41_spill] sm:$0xff]  ;;  %v12863_v5 = vld [vmem:[#allocation12_spill] sm:$0xff] }
 0x1bd   :  { %v2052_v19 = vadd.f32 %v11175_v0, %v2024_v30  ;;  %v2025_v62 = vmax.f32 %v1895_v27, %v1989_v18  ;;  %v2067_v48 = vmax.f32 %v2051_v17, 0.0  ;;  %v1642_v27 = vmax.f32 %v1512_v33, %v12850_v15  ;;  %v12857_v33 = vld [vmem:[#allocation36_spill] sm:$0xff]  ;;  %v12867_v57 = vld [vmem:[#allocation14_spill] sm:$0xff] }
 0x1be   :  { %v1993_v47 = vpop.f32.mrf.mxu0  ;;  %v1514_v30 = vmax.f32 %v1384_v49, %v12851_v58  ;;  %v1771_v36 = vmax.f32 %v1641_v41, %v12852_v26  ;;  %v1643_v18 = vmax.f32 %v1513_v50, %v12855_v7  ;;  %v1900_v43 = vmax.f32 %v1770_v31, %v11166_v55  ;;  %v12864_v3 = vld [vmem:[#allocation40_spill] sm:$0xff]  ;;  %v12865_v26 = vld [vmem:[#allocation13_spill] sm:$0xff] }
 0x1bf   :  { %v2068_v1 = vmax.f32 %v2052_v19, 0.0  ;;  %v2053_v9 = vadd.f32 %v11178_v44, %v2025_v62  ;;  %v2026_v38 = vmax.f32 %v1896_v42, %v1993_v47  ;;  %v12856_v42 = vld [vmem:[#allocation37_spill] sm:$0xff]  ;;  %v1772_v19 = vmax.f32 %v1642_v27, %v11117_v22  ;;  %v1883_v62 = vpop.f32.mrf.mxu1 }
 0x1c0   :  { %v1995_v63 = vpop.f32.mrf.mxu0  ;;  %v1515_v17 = vmax.f32 %v1385_v8, %v12856_v42  ;;  %v1516_v56 = vmax.f32 %v1386_v52, %v12858_v37  ;;  %v1901_v47 = vmax.f32 %v1771_v36, %v11189_v40  ;;  %v1773_v8 = vmax.f32 %v1643_v18, %v11126_v4  ;;  %v12866_v36 = vld [vmem:[#allocation42_spill] sm:$0xff] }
 0x1c1   :  { %v2082_v32 = vpack.c.bf16 %v2068_v1, %v2066_v35  ;;  %v2069_v61 = vmax.f32 %v2053_v9, 0.0  ;;  %v2027_v20 = vmax.f32 %v1897_v54, %v1995_v63  ;;  %v2054_v53 = vadd.f32 %v11175_v0, %v2026_v38  ;;  %v12859_v38 = vld [vmem:[#allocation11_spill] sm:$0xff]  ;;  %v1885_v40 = vpop.f32.mrf.mxu1 }
 0x1c2   :  { %v1997_v46 = vpop.f32.mrf.mxu0  ;;  %v1644_v54 = vmax.f32 %v1514_v30, %v12857_v33  ;;  %v1645_v41 = vmax.f32 %v1515_v17, %v12860_v60  ;;  %v1517_v50 = vmax.f32 %v1387_v45, %v12861_v14  ;;  %v12862_v4 = vmov 0.0  }
 0x1c3   :  { %v2028_v10 = vmax.f32 %v1898_v11, %v1997_v46  ;;  %v2083_v2 = vpack.c.bf16 %v2069_v61, %v2067_v48  ;;  %v2055_v39 = vadd.f32 %v11178_v44, %v2027_v20  ;;  %v2070_v22 = vmax.f32 %v2054_v53, 0.0 }
 0x1c4   :  { %v1999_v49 = vpop.f32.mrf.mxu0  ;;  %v1902_v11 = vmax.f32 %v1772_v19, %v11209_v21  ;;  %v1774_v31 = vmax.f32 %v1644_v54, %v11131_v25  ;;  %v1646_v52 = vmax.f32 %v1516_v56, %v12864_v3  ;;  %v1775_v15 = vmax.f32 %v1645_v41, %v11141_v59 }
 0x1c5   :  { %v2056_v12 = vadd.f32 %v11175_v0, %v2028_v10  ;;  %v2029_v34 = vmax.f32 %v1899_v16, %v1999_v49  ;;  %2257 = vmatprep.mubr.bf16.mxu1 %v2083_v2  ;;  %v2071_v48 = vmax.f32 %v2055_v39, 0.0  ;;  %v1903_v21 = vmax.f32 %v1773_v8, %v11223_v28  ;;  %v1887_v10 = vpop.f32.mrf.mxu1 }
 0x1c6   :  { %v2003_v35 = vpop.f32.mrf.mxu0  ;;  %2258 = vmatmul.mubr.bf16.vlgmr.msra.gmra.mxu1 %v2082_v32  ;;  %v1647_v46 = vmax.f32 %v1517_v50, %v12866_v36  ;;  %v1904_v16 = vmax.f32 %v1774_v31, %v1883_v62  ;;  %v1776_v53 = vmax.f32 %v1646_v52, %v11150_v13  ;;  %v1905_v45 = vmax.f32 %v1775_v15, %v1885_v40 }
 0x1c7   :  { %v2072_v1 = vmax.f32 %v2056_v12, 0.0  ;;  %v2057_v55 = vadd.f32 %v11178_v44, %v2029_v34  ;;  %v2030_v9 = vmax.f32 %v1900_v43, %v2003_v35  ;;  %8789 = vmatpush3.msra.mxu1 %v12859_v38  ;;  %v1889_v49 = vpop.f32.mrf.mxu1 }
 0x1c8   :  { %v2005_v63 = vpop.f32.mrf.mxu0  ;;  %8790 = vmatprep.subr.mxu1 %v12862_v4  ;;  %v1777_v7 = vmax.f32 %v1647_v46, %v11168_v29  ;;  %v1906_v62 = vmax.f32 %v1776_v53, %v1887_v10 }
 0x1c9   :  { %v2084_v32 = vpack.c.bf16 %v2072_v1, %v2070_v22  ;;  %v2073_v61 = vmax.f32 %v2057_v55, 0.0  ;;  %v2031_v20 = vmax.f32 %v1901_v47, %v2005_v63  ;;  %8791 = vmatpush3.msra.mxu1 %v12863_v5  ;;  %v2058_v25 = vadd.f32 %v11175_v0, %v2030_v9 }
 0x1ca   :  { %v2007_v27 = vpop.f32.mrf.mxu0  ;;  %8792 = vmatprep.subr.mxu1 %v12862_v4  ;;  %v1907_v37 = vmax.f32 %v1777_v7, %v1889_v49 }
 0x1cb   :  { %v2032_v58 = vmax.f32 %v1902_v11, %v2007_v27  ;;  %v2085_v30 = vpack.c.bf16 %v2073_v61, %v2071_v48  ;;  %8793 = vmatpush3.msra.mxu1 %v12865_v26  ;;  %v2059_v59 = vadd.f32 %v11178_v44, %v2031_v20  ;;  %v2074_v13 = vmax.f32 %v2058_v25, 0.0 }
 0x1cc   :  { %v2009_v2 = vpop.f32.mrf.mxu0  ;;  %8794 = vmatprep.subr.mxu1 %v12862_v4 }
 0x1cd   :  { %v2060_v23 = vadd.f32 %v11175_v0, %v2032_v58  ;;  %v2033_v28 = vmax.f32 %v1903_v21, %v2009_v2  ;;  %2265 = vmatprep.mubr.bf16.mxu1 %v2085_v30  ;;  %8795 = vmatpush3.msra.mxu1 %v12867_v57  ;;  %v2075_v39 = vmax.f32 %v2059_v59, 0.0 }
 0x1ce   :  { %v2013_v18 = vpop.f32.mrf.mxu0  ;;  %2266 = vmatmul.mubr.bf16.gmra.mxu1 %v2084_v32  ;;  %8810 = vmatprep.subr.mxu1 %v12862_v4 }
 0x1cf   :  { %v2076_v42 = vmax.f32 %v2060_v23, 0.0  ;;  %v2061_v17 = vadd.f32 %v11178_v44, %v2033_v28  ;;  %v2034_v19 = vmax.f32 %v1904_v16, %v2013_v18 }
 0x1d0   :  { %v2015_v43 = vpop.f32.mrf.mxu0 }
 0x1d1   :  { %v2086_v12 = vpack.c.bf16 %v2076_v42, %v2074_v13  ;;  %v2077_v34 = vmax.f32 %v2061_v17, 0.0  ;;  %v2035_v33 = vmax.f32 %v1905_v45, %v2015_v43  ;;  %v2062_v29 = vadd.f32 %v11175_v0, %v2034_v19 }
 0x1d2   :  { %v2017_v54 = vpop.f32.mrf.mxu0 }
 0x1d3   :  { %v2036_v56 = vmax.f32 %v1906_v62, %v2017_v54  ;;  %v2087_v47 = vpack.c.bf16 %v2077_v34, %v2075_v39  ;;  %v2063_v35 = vadd.f32 %v11178_v44, %v2035_v33  ;;  %v2078_v55 = vmax.f32 %v2062_v29, 0.0 }
 0x1d4   :  { %v2019_v8 = vpop.f32.mrf.mxu0 }
 0x1d5   :  { %v2064_v22 = vadd.f32 %v11175_v0, %v2036_v56  ;;  %v2037_v1 = vmax.f32 %v1907_v37, %v2019_v8  ;;  %2273 = vmatprep.mubr.bf16.mxu1 %v2087_v47  ;;  %v2079_v60 = vmax.f32 %v2063_v35, 0.0  ;;  %v8215_v0 = vld [vmem:[%s12737_s5] ss:$0 sm:$0xff]  ;;  %s9897_s5 = smov 64  }
 0x1d6   :  { %2274 = vmatmul.mubr.bf16.gmra.mxu1 %v2086_v12 }
 0x1d7   :  { %v2080_v9 = vmax.f32 %v2064_v22, 0.0  ;;  %v2065_v38 = vadd.f32 %v11178_v44, %v2037_v1 }
 0x1d9   :  { %v2088_v41 = vpack.c.bf16 %v2080_v9, %v2078_v55  ;;  %v2081_v14 = vmax.f32 %v2065_v38, 0.0  ;;  %v11301_v55 = vld [vmem:[%s12735_s4 + $0x18] sm:$0xff] }
 0x1db   :  { %v2089_v50 = vpack.c.bf16 %v2081_v14, %v2079_v60 }
 0x1dd   :  { %2281 = vmatprep.mubr.bf16.mxu1 %v2089_v50 }
 0x1de   :  { %2282 = vmatmul.mubr.bf16.gmra.mxu1 %v2088_v41 }
 0x1df   :  { %8796 = vmatprep.mubr.msk.f32.mxu1 %vm9896_vm1, %v12862_v4 }
 0x1ff   :  { %v2364_v11 = vpop.f32.mrf.mxu0 }
 0x201   :  { %v8787_v31 = vpop.f32.mrf.mxu0 }
 0x286   :  { %v8593_v40 = vpop.f32.mrf.mxu1 }
 0x288   :  { %v8594_v63 = vpop.f32.mrf.mxu1 }
 0x289   :  { %v8595_v48 = vadd.f32 %v8594_v63, %v8593_v40 }
 0x28a   :  { %v8596_v32 = vpop.f32.mrf.mxu1 }
 0x28b   :  { %v11276_v44 = vadd.f32 %v8595_v48, %v8215_v0 }
 0x28c   :  { %v8597_v61 = vpop.f32.mrf.mxu1 }
 0x28d   :  { %v2368_v20 = vadd.f32 %v2364_v11, %v11276_v44  ;;  %v8598_v3 = vadd.f32 %v8597_v61, %v8596_v32 }
 0x28e   :  { %v8599_v52 = vpop.f32.mrf.mxu1 }
 0x28f   :  { %9609 = vtanh.f32 %v2368_v20  ;;  %v11279_v15 = vadd.f32 %v8598_v3, %v8215_v0  ;;  %v8232_v39 = vmul.f32 -1.442695, %v2368_v20 }
 0x290   :  { %v8600_v27 = vpop.f32.mrf.mxu1 }
 0x291   :  { %v8601_v21 = vadd.f32 %v8600_v27, %v8599_v52  ;;  %9611 = vpow2.f32 %v8232_v39 }
 0x292   :  { %v8602_v25 = vpop.f32.mrf.mxu1 }
 0x293   :  { %v11281_v58 = vadd.f32 %v8601_v21, %v8215_v0 }
 0x294   :  { %v8603_v30 = vpop.f32.mrf.mxu1 }
 0x295   :  { %v8604_v36 = vadd.f32 %v8603_v30, %v8602_v25  ;;  %v11326_v25 = vld [vmem:[%s12735_s4 + $0x10] sm:$0xff] }
 0x296   :  { %v8605_v46 = vpop.f32.mrf.mxu1 }
 0x297   :  { %v11283_v16 = vadd.f32 %v8604_v36, %v8215_v0 }
 0x298   :  { %v8606_v53 = vpop.f32.mrf.mxu1 }
 0x299   :  { %v8607_v10 = vadd.f32 %v8606_v53, %v8605_v46 }
 0x29a   :  { %v8608_v2 = vpop.f32.mrf.mxu1 }
 0x29b   :  { %v11285_v59 = vadd.f32 %v8607_v10, %v8215_v0 }
 0x29c   :  { %v9610_v23 = vpop.eup %9609  ;;  %v8609_v28 = vpop.f32.mrf.mxu1 }
 0x29d   :  { %v8610_v45 = vadd.f32 %v8609_v28, %v8608_v2  ;;  %2378 = vrot.lane.b32.xlu0 %v9610_v23, %s9897_s5 }
 0x29e   :  { %v8611_v7 = vpop.f32.mrf.mxu1  ;;  %v9612_v12 = vpop.eup %9611 }
 0x29f   :  { %v11288_v18 = vadd.f32 %v8610_v45, %v8215_v0  ;;  %v2372_v34 = vadd.f32 1.0, %v9612_v12 }
 0x2a0   :  { %v8612_v13 = vpop.f32.mrf.mxu1 }
 0x2a1   :  { %v8613_v42 = vadd.f32 %v8612_v13, %v8611_v7  ;;  %9613 = vrcp.f32 %v2372_v34 }
 0x2a2   :  { %v8614_v17 = vpop.f32.mrf.mxu1 }
 0x2a3   :  { %v11290_v19 = vadd.f32 %v8613_v42, %v8215_v0 }
 0x2a4   :  { %v8615_v62 = vpop.f32.mrf.mxu1 }
 0x2a5   :  { %v8616_v49 = vadd.f32 %v8615_v62, %v8614_v17 }
 0x2a7   :  { %v11292_v43 = vadd.f32 %v8616_v49, %v8215_v0 }
 0x2ae   :  { %v9614_v33 = vpop.eup %9613 }
 0x2af   :  { %v2376_v29 = vmul.f32 0.0, %v9614_v33 }
 0x30f   :  { %v2379_v54 = vpop.permute.xlu0 %2378 }
 0x310   :  { %v2381_v37 = vmul.f32 %v9614_v33, %v2379_v54  ;;  %v11349_v54 = vld [vmem:[%s12735_s4 + $0x8] sm:$0xff] }
 0x312   :  { %2383 = vrot.lane.b32.xlu0 %v2381_v37, %s9898_s29 }
 0x384   :  { %v2384_v56 = vpop.permute.xlu0 %2383 }
 0x385   :  { %v2386_v47 = vadd.f32 %v2384_v56, %v2376_v29 }
 0x387   :  { %9615 = vtanh.f32 %v2386_v47  ;;  %v2480_v63 = vrot.slane %v2386_v47, 6 }
 0x394   :  { %v9616_v8 = vpop.eup %9615 }
 0x395   :  { %2389 = vrot.lane.b32.xlu1 %v9616_v8, %s9897_s5 }
 0x407   :  { %v2390_v35 = vpop.permute.xlu1 %2389 }
 0x408   :  { %v2392_v22 = vmul.f32 %v9614_v33, %v2390_v35 }
 0x40a   :  { %2394 = vrot.lane.b32.xlu1 %v2392_v22, %s9898_s29 }
 0x47c   :  { %v2395_v1 = vpop.permute.xlu1 %2394 }
 0x47d   :  { %8797 = vmatmul.mubr.msk.f32.vlgmr.msra.gmra.mxu1 %vm2294_vm2, %v2395_v1 }
 0x47e   :  { %8811 = vmatpush3.msra.mxu1 %v11301_v55  ;;  %8818 = vmatprep.mubr.msk.f32.mxu1 %vm9896_vm1, %v12862_v4 }
 0x47f   :  { %8812 = vmatprep.subr.mxu1 %v12862_v4 }
 0x480   :  { %8813 = vmatpush3.msra.mxu1 %v12863_v5 }
 0x481   :  { %8814 = vmatprep.subr.mxu1 %v12862_v4 }
 0x482   :  { %8815 = vmatpush3.msra.mxu1 %v12865_v26 }
 0x483   :  { %8816 = vmatprep.subr.mxu1 %v12862_v4 }
 0x484   :  { %8817 = vmatpush3.msra.mxu1 %v12867_v57 }
 0x485   :  { %8832 = vmatprep.subr.mxu1 %v12862_v4 }
 0x53d   :  { %v2464_v9 = vpop.f32.mrf.mxu1 }
 0x53e   :  { %v2469_v38 = vrot.slane %v2464_v9, 6 }
 0x53f   :  { %v8798_v60 = vpop.f32.mrf.mxu1 }
 0x540   :  { %v2471_v41 = vadd.f32 %v2469_v38, %v11276_v44 }
 0x542   :  { %9617 = vtanh.f32 %v2471_v41  ;;  %v8234_v5 = vmul.f32 -1.442695, %v2471_v41 }
 0x544   :  { %9619 = vpow2.f32 %v8234_v5 }
 0x54f   :  { %v9618_v14 = vpop.eup %9617 }
 0x550   :  { %2484 = vrot.lane.b32.xlu0 %v9618_v14, %s9897_s5 }
 0x551   :  { %v9620_v50 = vpop.eup %9619 }
 0x552   :  { %v2475_v11 = vadd.f32 1.0, %v9620_v50 }
 0x554   :  { %9621 = vrcp.f32 %v2475_v11 }
 0x561   :  { %v9622_v31 = vpop.eup %9621 }
 0x562   :  { %v2482_v48 = vmul.f32 %v9622_v31, %v2480_v63 }
 0x5c2   :  { %v2485_v40 = vpop.permute.xlu0 %2484 }
 0x5c3   :  { %v2487_v0 = vmul.f32 %v9622_v31, %v2485_v40 }
 0x5c5   :  { %2489 = vrot.lane.b32.xlu1 %v2487_v0, %s9898_s29  ;;  %v11372_v0 = vld [vmem:[%s12735_s4] sm:$0xff] }
 0x637   :  { %v2490_v32 = vpop.permute.xlu1 %2489 }
 0x638   :  { %v2492_v61 = vadd.f32 %v2490_v32, %v2482_v48 }
 0x63a   :  { %9623 = vtanh.f32 %v2492_v61  ;;  %v2587_v13 = vrot.slane %v2492_v61, 6 }
 0x647   :  { %v9624_v20 = vpop.eup %9623 }
 0x648   :  { %2495 = vrot.lane.b32.xlu0 %v9624_v20, %s9897_s5 }
 0x6ba   :  { %v2496_v3 = vpop.permute.xlu0 %2495 }
 0x6bb   :  { %v2498_v52 = vmul.f32 %v9622_v31, %v2496_v3 }
 0x6bd   :  { %v2500_v27 = vrot.slane %v2498_v52, 2 }
 0x6bf   :  { %2501 = vrot.lane.b32.xlu1 %v2500_v27, %s9898_s29 }
 0x731   :  { %v2502_v21 = vpop.permute.xlu1 %2501 }
 0x732   :  { %8808 = vmatmul.mubr.msk.f32.vlgmr.msra.gmra.mxu0 %vm2294_vm2, %v2502_v21 }
 0x733   :  { %8822 = vmatpush3.msra.mxu0 %v11301_v55  ;;  %8829 = vmatprep.mubr.msk.f32.mxu0 %vm9896_vm1, %v12862_v4 }
 0x734   :  { %8823 = vmatprep.subr.mxu0 %v12862_v4 }
 0x735   :  { %8824 = vmatpush3.msra.mxu0 %v11326_v25 }
 0x736   :  { %8825 = vmatprep.subr.mxu0 %v12862_v4 }
 0x737   :  { %8826 = vmatpush3.msra.mxu0 %v12865_v26 }
 0x738   :  { %8827 = vmatprep.subr.mxu0 %v12862_v4 }
 0x739   :  { %8828 = vmatpush3.msra.mxu0 %v12867_v57 }
 0x73a   :  { %8843 = vmatprep.subr.mxu0 %v12862_v4 }
 0x7f2   :  { %v2571_v30 = vpop.f32.mrf.mxu0 }
 0x7f3   :  { %v2576_v36 = vrot.slane %v2571_v30, 4 }
 0x7f4   :  { %v8809_v46 = vpop.f32.mrf.mxu0 }
 0x7f5   :  { %v2578_v53 = vadd.f32 %v2576_v36, %v11276_v44 }
 0x7f7   :  { %9625 = vtanh.f32 %v2578_v53  ;;  %v8236_v2 = vmul.f32 -1.442695, %v2578_v53 }
 0x7f9   :  { %9627 = vpow2.f32 %v8236_v2 }
 0x804   :  { %v9626_v10 = vpop.eup %9625 }
 0x805   :  { %2591 = vrot.lane.b32.xlu0 %v9626_v10, %s9897_s5 }
 0x806   :  { %v9628_v23 = vpop.eup %9627 }
 0x807   :  { %v2582_v28 = vadd.f32 1.0, %v9628_v23 }
 0x809   :  { %9629 = vrcp.f32 %v2582_v28 }
 0x816   :  { %v9630_v26 = vpop.eup %9629 }
 0x817   :  { %v2589_v42 = vmul.f32 %v9630_v26, %v2587_v13 }
 0x877   :  { %v2592_v45 = vpop.permute.xlu0 %2591 }
 0x878   :  { %v2594_v7 = vmul.f32 %v9630_v26, %v2592_v45 }
 0x87a   :  { %2596 = vrot.lane.b32.xlu1 %v2594_v7, %s9898_s29 }
 0x8ec   :  { %v2597_v17 = vpop.permute.xlu1 %2596 }
 0x8ed   :  { %v2599_v62 = vadd.f32 %v2597_v17, %v2589_v42 }
 0x8ef   :  { %9631 = vtanh.f32 %v2599_v62 }
 0x8fc   :  { %v9632_v49 = vpop.eup %9631 }
 0x8fd   :  { %2602 = vrot.lane.b32.xlu0 %v9632_v49, %s9897_s5 }
 0x96f   :  { %v2603_v39 = vpop.permute.xlu0 %2602 }
 0x970   :  { %v2605_v12 = vmul.f32 %v9630_v26, %v2603_v39 }
 0x972   :  { %v2607_v34 = vrot.slane %v2605_v12, 4 }
 0x974   :  { %2608 = vrot.lane.b32.xlu1 %v2607_v34, %s9898_s29 }
 0x9e6   :  { %v2609_v33 = vpop.permute.xlu1 %2608 }
 0x9e7   :  { %8819 = vmatmul.mubr.msk.f32.vlgmr.msra.gmra.mxu1 %vm2294_vm2, %v2609_v33 }
 0x9e8   :  { %8833 = vmatpush3.msra.mxu1 %v11301_v55  ;;  %8840 = vmatprep.mubr.msk.f32.mxu1 %vm9896_vm1, %v12862_v4 }
 0x9e9   :  { %8834 = vmatprep.subr.mxu1 %v12862_v4 }
 0x9ea   :  { %8835 = vmatpush3.msra.mxu1 %v11326_v25 }
 0x9eb   :  { %8836 = vmatprep.subr.mxu1 %v12862_v4 }
 0x9ec   :  { %8837 = vmatpush3.msra.mxu1 %v11349_v54 }
 0x9ed   :  { %8838 = vmatprep.subr.mxu1 %v12862_v4 }
 0x9ee   :  { %8839 = vmatpush3.msra.mxu1 %v12867_v57  ;;  %v2694_v57 = vrot.slane %v2599_v62, 6 }
 0x9ef   :  { %8854 = vmatprep.subr.mxu1 %v12862_v4 }
 0xaa7   :  { %v2678_v37 = vpop.f32.mrf.mxu1 }
 0xaa8   :  { %v2683_v29 = vrot.slane %v2678_v37, 2 }
 0xaa9   :  { %v8820_v56 = vpop.f32.mrf.mxu1 }
 0xaaa   :  { %v2685_v47 = vadd.f32 %v2683_v29, %v11276_v44 }
 0xaac   :  { %9633 = vtanh.f32 %v2685_v47  ;;  %v8238_v35 = vmul.f32 -1.442695, %v2685_v47 }
 0xaae   :  { %9635 = vpow2.f32 %v8238_v35 }
 0xab9   :  { %v9634_v8 = vpop.eup %9633 }
 0xaba   :  { %2698 = vrot.lane.b32.xlu0 %v9634_v8, %s9897_s5 }
 0xabb   :  { %v9636_v22 = vpop.eup %9635 }
 0xabc   :  { %v2689_v1 = vadd.f32 1.0, %v9636_v22 }
 0xabe   :  { %9637 = vrcp.f32 %v2689_v1 }
 0xacb   :  { %v9638_v9 = vpop.eup %9637 }
 0xacc   :  { %v2696_v41 = vmul.f32 %v9638_v9, %v2694_v57 }
 0xb2c   :  { %v2699_v38 = vpop.permute.xlu0 %2698 }
 0xb2d   :  { %v2701_v60 = vmul.f32 %v9638_v9, %v2699_v38 }
 0xb2f   :  { %2703 = vrot.lane.b32.xlu1 %v2701_v60, %s9898_s29 }
 0xba1   :  { %v2704_v14 = vpop.permute.xlu1 %2703 }
 0xba2   :  { %v2706_v5 = vadd.f32 %v2704_v14, %v2696_v41 }
 0xba4   :  { %9639 = vtanh.f32 %v2706_v5  ;;  %v2798_v36 = vrot.slane %v2706_v5, 6 }
 0xbb1   :  { %v9640_v44 = vpop.eup %9639 }
 0xbb2   :  { %2709 = vrot.lane.b32.xlu0 %v9640_v44, %s9897_s5 }
 0xc24   :  { %v2710_v50 = vpop.permute.xlu0 %2709 }
 0xc25   :  { %v2712_v11 = vmul.f32 %v9638_v9, %v2710_v50 }
 0xc27   :  { %v2714_v31 = vrot.slane %v2712_v11, 6 }
 0xc29   :  { %2715 = vrot.lane.b32.xlu1 %v2714_v31, %s9898_s29 }
 0xc9b   :  { %v2716_v40 = vpop.permute.xlu1 %2715 }
 0xc9c   :  { %8830 = vmatmul.mubr.msk.f32.vlgmr.msra.gmra.mxu0 %vm2294_vm2, %v2716_v40 }
 0xc9d   :  { %8844 = vmatpush3.msra.mxu0 %v11301_v55  ;;  %8851 = vmatprep.mubr.msk.f32.mxu0 %vm9896_vm1, %v12862_v4 }
 0xc9e   :  { %8845 = vmatprep.subr.mxu0 %v12862_v4 }
 0xc9f   :  { %8846 = vmatpush3.msra.mxu0 %v11326_v25 }
 0xca0   :  { %8847 = vmatprep.subr.mxu0 %v12862_v4 }
 0xca1   :  { %8848 = vmatpush3.msra.mxu0 %v11349_v54 }
 0xca2   :  { %8849 = vmatprep.subr.mxu0 %v12862_v4 }
 0xca3   :  { %8850 = vmatpush3.msra.mxu0 %v11372_v0 }
 0xca4   :  { %8865 = vmatprep.subr.mxu0 %v12862_v4 }
 0xd5c   :  { %v2785_v63 = vpop.f32.mrf.mxu0 }
 0xd5d   :  { %v2789_v48 = vadd.f32 %v2785_v63, %v11279_v15 }
 0xd5e   :  { %v8831_v32 = vpop.f32.mrf.mxu0 }
 0xd5f   :  { %9641 = vtanh.f32 %v2789_v48  ;;  %v8240_v20 = vmul.f32 -1.442695, %v2789_v48 }
 0xd61   :  { %9643 = vpow2.f32 %v8240_v20 }
 0xd6c   :  { %v9642_v61 = vpop.eup %9641 }
 0xd6d   :  { %2802 = vrot.lane.b32.xlu0 %v9642_v61, %s9897_s5 }
 0xd6e   :  { %v9644_v3 = vpop.eup %9643 }
 0xd6f   :  { %v2793_v52 = vadd.f32 1.0, %v9644_v3 }
 0xd71   :  { %9645 = vrcp.f32 %v2793_v52 }
 0xd7e   :  { %v9646_v27 = vpop.eup %9645 }
 0xd7f   :  { %v2800_v46 = vmul.f32 %v9646_v27, %v2798_v36 }
 0xddf   :  { %v2803_v21 = vpop.permute.xlu0 %2802 }
 0xde0   :  { %v2805_v30 = vmul.f32 %v9646_v27, %v2803_v21 }
 0xde2   :  { %2807 = vrot.lane.b32.xlu1 %v2805_v30, %s9898_s29 }
 0xe54   :  { %v2808_v53 = vpop.permute.xlu1 %2807 }
 0xe55   :  { %v2810_v10 = vadd.f32 %v2808_v53, %v2800_v46 }
 0xe57   :  { %9647 = vtanh.f32 %v2810_v10  ;;  %v2904_v37 = vrot.slane %v2810_v10, 6 }
 0xe64   :  { %v9648_v2 = vpop.eup %9647 }
 0xe65   :  { %2813 = vrot.lane.b32.xlu0 %v9648_v2, %s9897_s5 }
 0xed7   :  { %v2814_v23 = vpop.permute.xlu0 %2813 }
 0xed8   :  { %v2816_v28 = vmul.f32 %v9646_v27, %v2814_v23 }
 0xeda   :  { %2818 = vrot.lane.b32.xlu1 %v2816_v28, %s9898_s29 }
 0xf4c   :  { %v2819_v26 = vpop.permute.xlu1 %2818 }
 0xf4d   :  { %8841 = vmatmul.mubr.msk.f32.vlgmr.msra.gmra.mxu1 %vm2294_vm2, %v2819_v26 }
 0xf4e   :  { %8855 = vmatpush3.msra.mxu1 %v11301_v55  ;;  %8862 = vmatprep.mubr.msk.f32.mxu1 %vm9896_vm1, %v12862_v4 }
 0xf4f   :  { %8856 = vmatprep.subr.mxu1 %v12862_v4 }
 0xf50   :  { %8857 = vmatpush3.msra.mxu1 %v11326_v25 }
 0xf51   :  { %8858 = vmatprep.subr.mxu1 %v12862_v4 }
 0xf52   :  { %8859 = vmatpush3.msra.mxu1 %v11349_v54 }
 0xf53   :  { %8860 = vmatprep.subr.mxu1 %v12862_v4 }
 0xf54   :  { %8861 = vmatpush3.msra.mxu1 %v11372_v0 }
 0xf55   :  { %8876 = vmatprep.subr.mxu1 %v12862_v4 }
0x100d   :  { %v2888_v45 = vpop.f32.mrf.mxu1 }
0x100e   :  { %v2893_v7 = vrot.slane %v2888_v45, 6 }
0x100f   :  { %v8842_v13 = vpop.f32.mrf.mxu1 }
0x1010   :  { %v2895_v42 = vadd.f32 %v2893_v7, %v11279_v15 }
0x1012   :  { %9649 = vtanh.f32 %v2895_v42  ;;  %v8242_v62 = vmul.f32 -1.442695, %v2895_v42 }
0x1014   :  { %9651 = vpow2.f32 %v8242_v62 }
0x101f   :  { %v9650_v17 = vpop.eup %9649 }
0x1020   :  { %2908 = vrot.lane.b32.xlu0 %v9650_v17, %s9897_s5 }
0x1021   :  { %v9652_v49 = vpop.eup %9651 }
0x1022   :  { %v2899_v39 = vadd.f32 1.0, %v9652_v49 }
0x1024   :  { %9653 = vrcp.f32 %v2899_v39 }
0x1031   :  { %v9654_v12 = vpop.eup %9653 }
0x1032   :  { %v2906_v29 = vmul.f32 %v9654_v12, %v2904_v37 }
0x1092   :  { %v2909_v34 = vpop.permute.xlu0 %2908 }
0x1093   :  { %v2911_v33 = vmul.f32 %v9654_v12, %v2909_v34 }
0x1095   :  { %2913 = vrot.lane.b32.xlu1 %v2911_v33, %s9898_s29 }
0x1107   :  { %v2914_v56 = vpop.permute.xlu1 %2913 }
0x1108   :  { %v2916_v47 = vadd.f32 %v2914_v56, %v2906_v29 }
0x110a   :  { %9655 = vtanh.f32 %v2916_v47  ;;  %v3011_v63 = vrot.slane %v2916_v47, 6 }
0x1117   :  { %v9656_v8 = vpop.eup %9655 }
0x1118   :  { %2919 = vrot.lane.b32.xlu0 %v9656_v8, %s9897_s5 }
0x118a   :  { %v2920_v35 = vpop.permute.xlu0 %2919 }
0x118b   :  { %v2922_v22 = vmul.f32 %v9654_v12, %v2920_v35 }
0x118d   :  { %v2924_v1 = vrot.slane %v2922_v22, 2 }
0x118f   :  { %2925 = vrot.lane.b32.xlu1 %v2924_v1, %s9898_s29 }
0x1201   :  { %v2926_v9 = vpop.permute.xlu1 %2925 }
0x1202   :  { %8852 = vmatmul.mubr.msk.f32.vlgmr.msra.gmra.mxu0 %vm2294_vm2, %v2926_v9 }
0x1203   :  { %8866 = vmatpush3.msra.mxu0 %v11301_v55  ;;  %8873 = vmatprep.mubr.msk.f32.mxu0 %vm9896_vm1, %v12862_v4 }
0x1204   :  { %8867 = vmatprep.subr.mxu0 %v12862_v4 }
0x1205   :  { %8868 = vmatpush3.msra.mxu0 %v11326_v25 }
0x1206   :  { %8869 = vmatprep.subr.mxu0 %v12862_v4 }
0x1207   :  { %8870 = vmatpush3.msra.mxu0 %v11349_v54 }
0x1208   :  { %8871 = vmatprep.subr.mxu0 %v12862_v4 }
0x1209   :  { %8872 = vmatpush3.msra.mxu0 %v11372_v0 }
0x120a   :  { %8887 = vmatprep.subr.mxu0 %v12862_v4 }
0x12c2   :  { %v2995_v38 = vpop.f32.mrf.mxu0 }
0x12c3   :  { %v3000_v60 = vrot.slane %v2995_v38, 4 }
0x12c4   :  { %v8853_v57 = vpop.f32.mrf.mxu0 }
0x12c5   :  { %v3002_v41 = vadd.f32 %v3000_v60, %v11279_v15 }
0x12c7   :  { %9657 = vtanh.f32 %v3002_v41  ;;  %v8244_v5 = vmul.f32 -1.442695, %v3002_v41 }
0x12c9   :  { %9659 = vpow2.f32 %v8244_v5 }
0x12d4   :  { %v9658_v14 = vpop.eup %9657 }
0x12d5   :  { %3015 = vrot.lane.b32.xlu0 %v9658_v14, %s9897_s5 }
0x12d6   :  { %v9660_v44 = vpop.eup %9659 }
0x12d7   :  { %v3006_v50 = vadd.f32 1.0, %v9660_v44 }
0x12d9   :  { %9661 = vrcp.f32 %v3006_v50 }
0x12e6   :  { %v9662_v11 = vpop.eup %9661 }
0x12e7   :  { %v3013_v48 = vmul.f32 %v9662_v11, %v3011_v63 }
0x1347   :  { %v3016_v31 = vpop.permute.xlu0 %3015 }
0x1348   :  { %v3018_v40 = vmul.f32 %v9662_v11, %v3016_v31 }
0x134a   :  { %3020 = vrot.lane.b32.xlu1 %v3018_v40, %s9898_s29 }
0x13bc   :  { %v3021_v32 = vpop.permute.xlu1 %3020 }
0x13bd   :  { %v3023_v61 = vadd.f32 %v3021_v32, %v3013_v48 }
0x13bf   :  { %9663 = vtanh.f32 %v3023_v61  ;;  %v3118_v13 = vrot.slane %v3023_v61, 6 }
0x13cc   :  { %v9664_v20 = vpop.eup %9663 }
0x13cd   :  { %3026 = vrot.lane.b32.xlu0 %v9664_v20, %s9897_s5 }
0x143f   :  { %v3027_v3 = vpop.permute.xlu0 %3026 }
0x1440   :  { %v3029_v52 = vmul.f32 %v9662_v11, %v3027_v3 }
0x1442   :  { %v3031_v27 = vrot.slane %v3029_v52, 4 }
0x1444   :  { %3032 = vrot.lane.b32.xlu1 %v3031_v27, %s9898_s29 }
0x14b6   :  { %v3033_v21 = vpop.permute.xlu1 %3032 }
0x14b7   :  { %8863 = vmatmul.mubr.msk.f32.vlgmr.msra.gmra.mxu1 %vm2294_vm2, %v3033_v21 }
0x14b8   :  { %8877 = vmatpush3.msra.mxu1 %v11301_v55  ;;  %8884 = vmatprep.mubr.msk.f32.mxu1 %vm9896_vm1, %v12862_v4 }
0x14b9   :  { %8878 = vmatprep.subr.mxu1 %v12862_v4 }
0x14ba   :  { %8879 = vmatpush3.msra.mxu1 %v11326_v25 }
0x14bb   :  { %8880 = vmatprep.subr.mxu1 %v12862_v4 }
0x14bc   :  { %8881 = vmatpush3.msra.mxu1 %v11349_v54 }
0x14bd   :  { %8882 = vmatprep.subr.mxu1 %v12862_v4 }
0x14be   :  { %8883 = vmatpush3.msra.mxu1 %v11372_v0 }
0x14bf   :  { %8898 = vmatprep.subr.mxu1 %v12862_v4 }
0x1577   :  { %v3102_v30 = vpop.f32.mrf.mxu1 }
0x1578   :  { %v3107_v36 = vrot.slane %v3102_v30, 2 }
0x1579   :  { %v8864_v46 = vpop.f32.mrf.mxu1 }
0x157a   :  { %v3109_v53 = vadd.f32 %v3107_v36, %v11279_v15 }
0x157c   :  { %9665 = vtanh.f32 %v3109_v53  ;;  %v8246_v2 = vmul.f32 -1.442695, %v3109_v53 }
0x157e   :  { %9667 = vpow2.f32 %v8246_v2 }
0x1589   :  { %v9666_v10 = vpop.eup %9665 }
0x158a   :  { %3122 = vrot.lane.b32.xlu0 %v9666_v10, %s9897_s5 }
0x158b   :  { %v9668_v23 = vpop.eup %9667 }
0x158c   :  { %v3113_v28 = vadd.f32 1.0, %v9668_v23 }
0x158e   :  { %9669 = vrcp.f32 %v3113_v28 }
0x159b   :  { %v9670_v26 = vpop.eup %9669 }
0x159c   :  { %v3120_v42 = vmul.f32 %v9670_v26, %v3118_v13 }
0x15fc   :  { %v3123_v45 = vpop.permute.xlu0 %3122 }
0x15fd   :  { %v3125_v7 = vmul.f32 %v9670_v26, %v3123_v45 }
0x15ff   :  { %3127 = vrot.lane.b32.xlu1 %v3125_v7, %s9898_s29 }
0x1671   :  { %v3128_v17 = vpop.permute.xlu1 %3127 }
0x1672   :  { %v3130_v62 = vadd.f32 %v3128_v17, %v3120_v42 }
0x1674   :  { %9671 = vtanh.f32 %v3130_v62  ;;  %v3222_v38 = vrot.slane %v3130_v62, 6 }
0x1681   :  { %v9672_v15 = vpop.eup %9671 }
0x1682   :  { %3133 = vrot.lane.b32.xlu0 %v9672_v15, %s9897_s5 }
0x16f4   :  { %v3134_v49 = vpop.permute.xlu0 %3133 }
0x16f5   :  { %v3136_v39 = vmul.f32 %v9670_v26, %v3134_v49 }
0x16f7   :  { %v3138_v12 = vrot.slane %v3136_v39, 6 }
0x16f9   :  { %3139 = vrot.lane.b32.xlu1 %v3138_v12, %s9898_s29 }
0x176b   :  { %v3140_v34 = vpop.permute.xlu1 %3139 }
0x176c   :  { %8874 = vmatmul.mubr.msk.f32.vlgmr.msra.gmra.mxu0 %vm2294_vm2, %v3140_v34 }
0x176d   :  { %8888 = vmatpush3.msra.mxu0 %v11301_v55  ;;  %8895 = vmatprep.mubr.msk.f32.mxu0 %vm9896_vm1, %v12862_v4 }
0x176e   :  { %8889 = vmatprep.subr.mxu0 %v12862_v4 }
0x176f   :  { %8890 = vmatpush3.msra.mxu0 %v11326_v25 }
0x1770   :  { %8891 = vmatprep.subr.mxu0 %v12862_v4 }
0x1771   :  { %8892 = vmatpush3.msra.mxu0 %v11349_v54 }
0x1772   :  { %8893 = vmatprep.subr.mxu0 %v12862_v4 }
0x1773   :  { %8894 = vmatpush3.msra.mxu0 %v11372_v0 }
0x1774   :  { %8909 = vmatprep.subr.mxu0 %v12862_v4 }
0x182c   :  { %v3209_v33 = vpop.f32.mrf.mxu0 }
0x182d   :  { %v3213_v37 = vadd.f32 %v3209_v33, %v11281_v58 }
0x182e   :  { %v8875_v29 = vpop.f32.mrf.mxu0 }
0x182f   :  { %9673 = vtanh.f32 %v3213_v37  ;;  %v8248_v47 = vmul.f32 -1.442695, %v3213_v37 }
0x1831   :  { %9675 = vpow2.f32 %v8248_v47 }
0x183c   :  { %v9674_v56 = vpop.eup %9673 }
0x183d   :  { %3226 = vrot.lane.b32.xlu0 %v9674_v56, %s9897_s5 }
0x183e   :  { %v9676_v8 = vpop.eup %9675 }
0x183f   :  { %v3217_v35 = vadd.f32 1.0, %v9676_v8 }
0x1841   :  { %9677 = vrcp.f32 %v3217_v35 }
0x184e   :  { %v9678_v22 = vpop.eup %9677 }
0x184f   :  { %v3224_v60 = vmul.f32 %v9678_v22, %v3222_v38 }
0x18af   :  { %v3227_v1 = vpop.permute.xlu0 %3226 }
0x18b0   :  { %v3229_v9 = vmul.f32 %v9678_v22, %v3227_v1 }
0x18b2   :  { %3231 = vrot.lane.b32.xlu1 %v3229_v9, %s9898_s29 }
0x1924   :  { %v3232_v57 = vpop.permute.xlu1 %3231 }
0x1925   :  { %v3234_v41 = vadd.f32 %v3232_v57, %v3224_v60 }
0x1927   :  { %9679 = vtanh.f32 %v3234_v41  ;;  %v3328_v21 = vrot.slane %v3234_v41, 6 }
0x1934   :  { %v9680_v14 = vpop.eup %9679 }
0x1935   :  { %3237 = vrot.lane.b32.xlu0 %v9680_v14, %s9897_s5 }
0x19a7   :  { %v3238_v5 = vpop.permute.xlu0 %3237 }
0x19a8   :  { %v3240_v44 = vmul.f32 %v9678_v22, %v3238_v5 }
0x19aa   :  { %3242 = vrot.lane.b32.xlu1 %v3240_v44, %s9898_s29 }
0x1a1c   :  { %v3243_v50 = vpop.permute.xlu1 %3242 }
0x1a1d   :  { %8885 = vmatmul.mubr.msk.f32.vlgmr.msra.gmra.mxu1 %vm2294_vm2, %v3243_v50 }
0x1a1e   :  { %8899 = vmatpush3.msra.mxu1 %v11301_v55  ;;  %8906 = vmatprep.mubr.msk.f32.mxu1 %vm9896_vm1, %v12862_v4 }
0x1a1f   :  { %8900 = vmatprep.subr.mxu1 %v12862_v4 }
0x1a20   :  { %8901 = vmatpush3.msra.mxu1 %v11326_v25 }
0x1a21   :  { %8902 = vmatprep.subr.mxu1 %v12862_v4 }
0x1a22   :  { %8903 = vmatpush3.msra.mxu1 %v11349_v54 }
0x1a23   :  { %8904 = vmatprep.subr.mxu1 %v12862_v4 }
0x1a24   :  { %8905 = vmatpush3.msra.mxu1 %v11372_v0 }
0x1a25   :  { %8920 = vmatprep.subr.mxu1 %v12862_v4 }
0x1add   :  { %v3312_v11 = vpop.f32.mrf.mxu1 }
0x1ade   :  { %v3317_v31 = vrot.slane %v3312_v11, 6 }
0x1adf   :  { %v8886_v40 = vpop.f32.mrf.mxu1 }
0x1ae0   :  { %v3319_v63 = vadd.f32 %v3317_v31, %v11281_v58 }
0x1ae2   :  { %9681 = vtanh.f32 %v3319_v63  ;;  %v8250_v32 = vmul.f32 -1.442695, %v3319_v63 }
0x1ae4   :  { %9683 = vpow2.f32 %v8250_v32 }
0x1aef   :  { %v9682_v48 = vpop.eup %9681 }
0x1af0   :  { %3332 = vrot.lane.b32.xlu0 %v9682_v48, %s9897_s5 }
0x1af1   :  { %v9684_v61 = vpop.eup %9683 }
0x1af2   :  { %v3323_v20 = vadd.f32 1.0, %v9684_v61 }
0x1af4   :  { %9685 = vrcp.f32 %v3323_v20 }
0x1b01   :  { %v9686_v3 = vpop.eup %9685 }
0x1b02   :  { %v3330_v30 = vmul.f32 %v9686_v3, %v3328_v21 }
0x1b62   :  { %v3333_v52 = vpop.permute.xlu0 %3332 }
0x1b63   :  { %v3335_v27 = vmul.f32 %v9686_v3, %v3333_v52 }
0x1b65   :  { %3337 = vrot.lane.b32.xlu1 %v3335_v27, %s9898_s29 }
0x1bd7   :  { %v3338_v36 = vpop.permute.xlu1 %3337 }
0x1bd8   :  { %v3340_v46 = vadd.f32 %v3338_v36, %v3330_v30 }
0x1bda   :  { %9687 = vtanh.f32 %v3340_v46  ;;  %v3435_v34 = vrot.slane %v3340_v46, 6 }
0x1be7   :  { %v9688_v53 = vpop.eup %9687 }
0x1be8   :  { %3343 = vrot.lane.b32.xlu0 %v9688_v53, %s9897_s5 }
0x1c5a   :  { %v3344_v10 = vpop.permute.xlu0 %3343 }
0x1c5b   :  { %v3346_v2 = vmul.f32 %v9686_v3, %v3344_v10 }
0x1c5d   :  { %v3348_v23 = vrot.slane %v3346_v2, 2 }
0x1c5f   :  { %3349 = vrot.lane.b32.xlu1 %v3348_v23, %s9898_s29 }
0x1cd1   :  { %v3350_v28 = vpop.permute.xlu1 %3349 }
0x1cd2   :  { %8896 = vmatmul.mubr.msk.f32.vlgmr.msra.gmra.mxu0 %vm2294_vm2, %v3350_v28 }
0x1cd3   :  { %8910 = vmatpush3.msra.mxu0 %v11301_v55  ;;  %8917 = vmatprep.mubr.msk.f32.mxu0 %vm9896_vm1, %v12862_v4 }
0x1cd4   :  { %8911 = vmatprep.subr.mxu0 %v12862_v4 }
0x1cd5   :  { %8912 = vmatpush3.msra.mxu0 %v11326_v25 }
0x1cd6   :  { %8913 = vmatprep.subr.mxu0 %v12862_v4 }
0x1cd7   :  { %8914 = vmatpush3.msra.mxu0 %v11349_v54 }
0x1cd8   :  { %8915 = vmatprep.subr.mxu0 %v12862_v4 }
0x1cd9   :  { %8916 = vmatpush3.msra.mxu0 %v11372_v0 }
0x1cda   :  { %8931 = vmatprep.subr.mxu0 %v12862_v4 }
0x1d92   :  { %v3419_v26 = vpop.f32.mrf.mxu0 }
0x1d93   :  { %v3424_v45 = vrot.slane %v3419_v26, 4 }
0x1d94   :  { %v8897_v7 = vpop.f32.mrf.mxu0 }
0x1d95   :  { %v3426_v13 = vadd.f32 %v3424_v45, %v11281_v58 }
0x1d97   :  { %9689 = vtanh.f32 %v3426_v13  ;;  %v8252_v17 = vmul.f32 -1.442695, %v3426_v13 }
0x1d99   :  { %9691 = vpow2.f32 %v8252_v17 }
0x1da4   :  { %v9690_v42 = vpop.eup %9689 }
0x1da5   :  { %3439 = vrot.lane.b32.xlu0 %v9690_v42, %s9897_s5 }
0x1da6   :  { %v9692_v62 = vpop.eup %9691 }
0x1da7   :  { %v3430_v15 = vadd.f32 1.0, %v9692_v62 }
0x1da9   :  { %9693 = vrcp.f32 %v3430_v15 }
0x1db6   :  { %v9694_v49 = vpop.eup %9693 }
0x1db7   :  { %v3437_v33 = vmul.f32 %v9694_v49, %v3435_v34 }
0x1e17   :  { %v3440_v39 = vpop.permute.xlu0 %3439 }
0x1e18   :  { %v3442_v12 = vmul.f32 %v9694_v49, %v3440_v39 }
0x1e1a   :  { %3444 = vrot.lane.b32.xlu1 %v3442_v12, %s9898_s29 }
0x1e8c   :  { %v3445_v37 = vpop.permute.xlu1 %3444 }
0x1e8d   :  { %v3447_v29 = vadd.f32 %v3445_v37, %v3437_v33 }
0x1e8f   :  { %9695 = vtanh.f32 %v3447_v29  ;;  %v3542_v31 = vrot.slane %v3447_v29, 6 }
0x1e9c   :  { %v9696_v56 = vpop.eup %9695 }
0x1e9d   :  { %3450 = vrot.lane.b32.xlu0 %v9696_v56, %s9897_s5 }
0x1f0f   :  { %v3451_v47 = vpop.permute.xlu0 %3450 }
0x1f10   :  { %v3453_v8 = vmul.f32 %v9694_v49, %v3451_v47 }
0x1f12   :  { %v3455_v35 = vrot.slane %v3453_v8, 4 }
0x1f14   :  { %3456 = vrot.lane.b32.xlu1 %v3455_v35, %s9898_s29 }
0x1f86   :  { %v3457_v22 = vpop.permute.xlu1 %3456 }
0x1f87   :  { %8907 = vmatmul.mubr.msk.f32.vlgmr.msra.gmra.mxu1 %vm2294_vm2, %v3457_v22 }
0x1f88   :  { %8921 = vmatpush3.msra.mxu1 %v11301_v55  ;;  %8928 = vmatprep.mubr.msk.f32.mxu1 %vm9896_vm1, %v12862_v4 }
0x1f89   :  { %8922 = vmatprep.subr.mxu1 %v12862_v4 }
0x1f8a   :  { %8923 = vmatpush3.msra.mxu1 %v11326_v25 }
0x1f8b   :  { %8924 = vmatprep.subr.mxu1 %v12862_v4 }
0x1f8c   :  { %8925 = vmatpush3.msra.mxu1 %v11349_v54 }
0x1f8d   :  { %8926 = vmatprep.subr.mxu1 %v12862_v4 }
0x1f8e   :  { %8927 = vmatpush3.msra.mxu1 %v11372_v0 }
0x1f8f   :  { %8942 = vmatprep.subr.mxu1 %v12862_v4 }
0x2047   :  { %v3526_v1 = vpop.f32.mrf.mxu1 }
0x2048   :  { %v3531_v9 = vrot.slane %v3526_v1, 2 }
0x2049   :  { %v8908_v38 = vpop.f32.mrf.mxu1 }
0x204a   :  { %v3533_v60 = vadd.f32 %v3531_v9, %v11281_v58 }
0x204c   :  { %9697 = vtanh.f32 %v3533_v60  ;;  %v8254_v41 = vmul.f32 -1.442695, %v3533_v60 }
0x204e   :  { %9699 = vpow2.f32 %v8254_v41 }
0x2059   :  { %v9698_v57 = vpop.eup %9697 }
0x205a   :  { %3546 = vrot.lane.b32.xlu0 %v9698_v57, %s9897_s5 }
0x205b   :  { %v9700_v14 = vpop.eup %9699 }
0x205c   :  { %v3537_v5 = vadd.f32 1.0, %v9700_v14 }
0x205e   :  { %9701 = vrcp.f32 %v3537_v5 }
0x206b   :  { %v9702_v44 = vpop.eup %9701 }
0x206c   :  { %v3544_v40 = vmul.f32 %v9702_v44, %v3542_v31 }
0x20cc   :  { %v3547_v50 = vpop.permute.xlu0 %3546 }
0x20cd   :  { %v3549_v11 = vmul.f32 %v9702_v44, %v3547_v50 }
0x20cf   :  { %3551 = vrot.lane.b32.xlu1 %v3549_v11, %s9898_s29 }
0x2141   :  { %v3552_v63 = vpop.permute.xlu1 %3551 }
0x2142   :  { %v3554_v48 = vadd.f32 %v3552_v63, %v3544_v40 }
0x2144   :  { %9703 = vtanh.f32 %v3554_v48  ;;  %v3646_v28 = vrot.slane %v3554_v48, 6 }
0x2151   :  { %v9704_v58 = vpop.eup %9703 }
0x2152   :  { %3557 = vrot.lane.b32.xlu0 %v9704_v58, %s9897_s5 }
0x21c4   :  { %v3558_v32 = vpop.permute.xlu0 %3557 }
0x21c5   :  { %v3560_v61 = vmul.f32 %v9702_v44, %v3558_v32 }
0x21c7   :  { %v3562_v20 = vrot.slane %v3560_v61, 6 }
0x21c9   :  { %3563 = vrot.lane.b32.xlu1 %v3562_v20, %s9898_s29 }
0x223b   :  { %v3564_v3 = vpop.permute.xlu1 %3563 }
0x223c   :  { %8918 = vmatmul.mubr.msk.f32.vlgmr.msra.gmra.mxu0 %vm2294_vm2, %v3564_v3 }
0x223d   :  { %8932 = vmatpush3.msra.mxu0 %v11301_v55  ;;  %8939 = vmatprep.mubr.msk.f32.mxu0 %vm9896_vm1, %v12862_v4 }
0x223e   :  { %8933 = vmatprep.subr.mxu0 %v12862_v4 }
0x223f   :  { %8934 = vmatpush3.msra.mxu0 %v11326_v25 }
0x2240   :  { %8935 = vmatprep.subr.mxu0 %v12862_v4 }
0x2241   :  { %8936 = vmatpush3.msra.mxu0 %v11349_v54 }
0x2242   :  { %8937 = vmatprep.subr.mxu0 %v12862_v4 }
0x2243   :  { %8938 = vmatpush3.msra.mxu0 %v11372_v0 }
0x2244   :  { %8953 = vmatprep.subr.mxu0 %v12862_v4 }
0x22fc   :  { %v3633_v52 = vpop.f32.mrf.mxu0 }
0x22fd   :  { %v3637_v27 = vadd.f32 %v3633_v52, %v11283_v16 }
0x22fe   :  { %v8919_v21 = vpop.f32.mrf.mxu0 }
0x22ff   :  { %9705 = vtanh.f32 %v3637_v27  ;;  %v8256_v36 = vmul.f32 -1.442695, %v3637_v27 }
0x2301   :  { %9707 = vpow2.f32 %v8256_v36 }
0x230c   :  { %v9706_v30 = vpop.eup %9705 }
0x230d   :  { %3650 = vrot.lane.b32.xlu0 %v9706_v30, %s9897_s5 }
0x230e   :  { %v9708_v46 = vpop.eup %9707 }
0x230f   :  { %v3641_v53 = vadd.f32 1.0, %v9708_v46 }
0x2311   :  { %9709 = vrcp.f32 %v3641_v53  ;;  %v11545_v53 = vld [vmem:[%s12735_s4 + $0x18] sm:$0xff] }
0x231e   :  { %v9710_v10 = vpop.eup %9709 }
0x231f   :  { %v3648_v26 = vmul.f32 %v9710_v10, %v3646_v28 }
0x237f   :  { %v3651_v2 = vpop.permute.xlu0 %3650 }
0x2380   :  { %v3653_v23 = vmul.f32 %v9710_v10, %v3651_v2 }
0x2382   :  { %3655 = vrot.lane.b32.xlu1 %v3653_v23, %s9898_s29 }
0x23f4   :  { %v3656_v45 = vpop.permute.xlu1 %3655 }
0x23f5   :  { %v3658_v7 = vadd.f32 %v3656_v45, %v3648_v26 }
0x23f7   :  { %9711 = vtanh.f32 %v3658_v7  ;;  %v3752_v35 = vrot.slane %v3658_v7, 6 }
0x2404   :  { %v9712_v13 = vpop.eup %9711 }
0x2405   :  { %3661 = vrot.lane.b32.xlu0 %v9712_v13, %s9897_s5 }
0x2477   :  { %v3662_v42 = vpop.permute.xlu0 %3661 }
0x2478   :  { %v3664_v17 = vmul.f32 %v9710_v10, %v3662_v42 }
0x247a   :  { %3666 = vrot.lane.b32.xlu1 %v3664_v17, %s9898_s29 }
0x24ec   :  { %v3667_v62 = vpop.permute.xlu1 %3666 }
0x24ed   :  { %8929 = vmatmul.mubr.msk.f32.vlgmr.msra.gmra.mxu1 %vm2294_vm2, %v3667_v62 }
0x24ee   :  { %8943 = vmatpush3.msra.mxu1 %v11301_v55  ;;  %8950 = vmatprep.mubr.msk.f32.mxu1 %vm9896_vm1, %v12862_v4 }
0x24ef   :  { %8944 = vmatprep.subr.mxu1 %v12862_v4 }
0x24f0   :  { %8945 = vmatpush3.msra.mxu1 %v11326_v25 }
0x24f1   :  { %8946 = vmatprep.subr.mxu1 %v12862_v4 }
0x24f2   :  { %8947 = vmatpush3.msra.mxu1 %v11349_v54 }
0x24f3   :  { %8948 = vmatprep.subr.mxu1 %v12862_v4 }
0x24f4   :  { %8949 = vmatpush3.msra.mxu1 %v11372_v0 }
0x24f5   :  { %8964 = vmatprep.subr.mxu1 %v12862_v4 }
0x25ad   :  { %v3736_v15 = vpop.f32.mrf.mxu1 }
0x25ae   :  { %v3741_v49 = vrot.slane %v3736_v15, 6 }
0x25af   :  { %v8930_v39 = vpop.f32.mrf.mxu1 }
0x25b0   :  { %v3743_v12 = vadd.f32 %v3741_v49, %v11283_v16 }
0x25b2   :  { %9713 = vtanh.f32 %v3743_v12  ;;  %v8258_v33 = vmul.f32 -1.442695, %v3743_v12 }
0x25b4   :  { %9715 = vpow2.f32 %v8258_v33 }
0x25bf   :  { %v9714_v34 = vpop.eup %9713 }
0x25c0   :  { %3756 = vrot.lane.b32.xlu0 %v9714_v34, %s9897_s5 }
0x25c1   :  { %v9716_v37 = vpop.eup %9715 }
0x25c2   :  { %v3747_v29 = vadd.f32 1.0, %v9716_v37 }
0x25c4   :  { %9717 = vrcp.f32 %v3747_v29  ;;  %v11570_v29 = vld [vmem:[%s12735_s4 + $0x10] sm:$0xff] }
0x25d1   :  { %v9718_v56 = vpop.eup %9717 }
0x25d2   :  { %v3754_v22 = vmul.f32 %v9718_v56, %v3752_v35 }
0x2632   :  { %v3757_v47 = vpop.permute.xlu0 %3756 }
0x2633   :  { %v3759_v8 = vmul.f32 %v9718_v56, %v3757_v47 }
0x2635   :  { %3761 = vrot.lane.b32.xlu1 %v3759_v8, %s9898_s29 }
0x26a7   :  { %v3762_v1 = vpop.permute.xlu1 %3761 }
0x26a8   :  { %v3764_v9 = vadd.f32 %v3762_v1, %v3754_v22 }
0x26aa   :  { %9719 = vtanh.f32 %v3764_v9  ;;  %v3859_v61 = vrot.slane %v3764_v9, 6 }
0x26b7   :  { %v9720_v38 = vpop.eup %9719 }
0x26b8   :  { %3767 = vrot.lane.b32.xlu0 %v9720_v38, %s9897_s5 }
0x272a   :  { %v3768_v60 = vpop.permute.xlu0 %3767 }
0x272b   :  { %v3770_v57 = vmul.f32 %v9718_v56, %v3768_v60 }
0x272d   :  { %v3772_v41 = vrot.slane %v3770_v57, 2 }
0x272f   :  { %3773 = vrot.lane.b32.xlu1 %v3772_v41, %s9898_s29 }
0x27a1   :  { %v3774_v14 = vpop.permute.xlu1 %3773 }
0x27a2   :  { %8940 = vmatmul.mubr.msk.f32.vlgmr.msra.gmra.mxu0 %vm2294_vm2, %v3774_v14 }
0x27a3   :  { %8954 = vmatpush3.msra.mxu0 %v11301_v55  ;;  %8961 = vmatprep.mubr.msk.f32.mxu0 %vm9896_vm1, %v12862_v4 }
0x27a4   :  { %8955 = vmatprep.subr.mxu0 %v12862_v4 }
0x27a5   :  { %8956 = vmatpush3.msra.mxu0 %v11326_v25 }
0x27a6   :  { %8957 = vmatprep.subr.mxu0 %v12862_v4 }
0x27a7   :  { %8958 = vmatpush3.msra.mxu0 %v11349_v54 }
0x27a8   :  { %8959 = vmatprep.subr.mxu0 %v12862_v4 }
0x27a9   :  { %8960 = vmatpush3.msra.mxu0 %v11372_v0 }
0x27aa   :  { %8975 = vmatprep.subr.mxu0 %v12862_v4 }
0x2862   :  { %v3843_v5 = vpop.f32.mrf.mxu0 }
0x2863   :  { %v3848_v44 = vrot.slane %v3843_v5, 4 }
0x2864   :  { %v8941_v55 = vpop.f32.mrf.mxu0 }
0x2865   :  { %v3850_v50 = vadd.f32 %v3848_v44, %v11283_v16 }
0x2867   :  { %9721 = vtanh.f32 %v3850_v50  ;;  %v8260_v31 = vmul.f32 -1.442695, %v3850_v50 }
0x2869   :  { %9723 = vpow2.f32 %v8260_v31  ;;  %v11593_v31 = vld [vmem:[%s12735_s4 + $0x8] sm:$0xff] }
0x2874   :  { %v9722_v11 = vpop.eup %9721 }
0x2875   :  { %3863 = vrot.lane.b32.xlu0 %v9722_v11, %s9897_s5 }
0x2876   :  { %v9724_v40 = vpop.eup %9723 }
0x2877   :  { %v3854_v63 = vadd.f32 1.0, %v9724_v40 }
0x2879   :  { %9725 = vrcp.f32 %v3854_v63 }
0x2886   :  { %v9726_v48 = vpop.eup %9725 }
0x2887   :  { %v3861_v20 = vmul.f32 %v9726_v48, %v3859_v61 }
0x28e7   :  { %v3864_v58 = vpop.permute.xlu0 %3863 }
0x28e8   :  { %v3866_v32 = vmul.f32 %v9726_v48, %v3864_v58 }
0x28ea   :  { %3868 = vrot.lane.b32.xlu1 %v3866_v32, %s9898_s29 }
0x295c   :  { %v3869_v3 = vpop.permute.xlu1 %3868 }
0x295d   :  { %v3871_v52 = vadd.f32 %v3869_v3, %v3861_v20 }
0x295f   :  { %9727 = vtanh.f32 %v3871_v52  ;;  %v3966_v62 = vrot.slane %v3871_v52, 6 }
0x296c   :  { %v9728_v27 = vpop.eup %9727 }
0x296d   :  { %3874 = vrot.lane.b32.xlu0 %v9728_v27, %s9897_s5 }
0x29df   :  { %v3875_v21 = vpop.permute.xlu0 %3874 }
0x29e0   :  { %v3877_v30 = vmul.f32 %v9726_v48, %v3875_v21 }
0x29e2   :  { %v3879_v36 = vrot.slane %v3877_v30, 4 }
0x29e4   :  { %3880 = vrot.lane.b32.xlu1 %v3879_v36, %s9898_s29 }
0x2a56   :  { %v3881_v46 = vpop.permute.xlu1 %3880 }
0x2a57   :  { %8951 = vmatmul.mubr.msk.f32.vlgmr.msra.gmra.mxu1 %vm2294_vm2, %v3881_v46 }
0x2a58   :  { %8965 = vmatpush3.msra.mxu1 %v11545_v53  ;;  %8972 = vmatprep.mubr.msk.f32.mxu1 %vm9896_vm1, %v12862_v4 }
0x2a59   :  { %8966 = vmatprep.subr.mxu1 %v12862_v4 }
0x2a5a   :  { %8967 = vmatpush3.msra.mxu1 %v11326_v25 }
0x2a5b   :  { %8968 = vmatprep.subr.mxu1 %v12862_v4 }
0x2a5c   :  { %8969 = vmatpush3.msra.mxu1 %v11349_v54 }
0x2a5d   :  { %8970 = vmatprep.subr.mxu1 %v12862_v4 }
0x2a5e   :  { %8971 = vmatpush3.msra.mxu1 %v11372_v0 }
0x2a5f   :  { %8986 = vmatprep.subr.mxu1 %v12862_v4 }
0x2b17   :  { %v3950_v10 = vpop.f32.mrf.mxu1 }
0x2b18   :  { %v3955_v2 = vrot.slane %v3950_v10, 2 }
0x2b19   :  { %v8952_v23 = vpop.f32.mrf.mxu1 }
0x2b1a   :  { %v3957_v28 = vadd.f32 %v3955_v2, %v11283_v16 }
0x2b1c   :  { %9729 = vtanh.f32 %v3957_v28  ;;  %v8262_v25 = vmul.f32 -1.442695, %v3957_v28 }
0x2b1e   :  { %9731 = vpow2.f32 %v8262_v25  ;;  %v11616_v25 = vld [vmem:[%s12735_s4] sm:$0xff] }
0x2b29   :  { %v9730_v26 = vpop.eup %9729 }
0x2b2a   :  { %3970 = vrot.lane.b32.xlu0 %v9730_v26, %s9897_s5 }
0x2b2b   :  { %v9732_v45 = vpop.eup %9731 }
0x2b2c   :  { %v3961_v7 = vadd.f32 1.0, %v9732_v45 }
0x2b2e   :  { %9733 = vrcp.f32 %v3961_v7 }
0x2b3b   :  { %v9734_v13 = vpop.eup %9733 }
0x2b3c   :  { %v3968_v15 = vmul.f32 %v9734_v13, %v3966_v62 }
0x2b9c   :  { %v3971_v42 = vpop.permute.xlu0 %3970 }
0x2b9d   :  { %v3973_v17 = vmul.f32 %v9734_v13, %v3971_v42 }
0x2b9f   :  { %3975 = vrot.lane.b32.xlu1 %v3973_v17, %s9898_s29 }
0x2c11   :  { %v3976_v49 = vpop.permute.xlu1 %3975 }
0x2c12   :  { %v3978_v39 = vadd.f32 %v3976_v49, %v3968_v15 }
0x2c14   :  { %9735 = vtanh.f32 %v3978_v39  ;;  %v4070_v57 = vrot.slane %v3978_v39, 6 }
0x2c21   :  { %v9736_v16 = vpop.eup %9735 }
0x2c22   :  { %3981 = vrot.lane.b32.xlu0 %v9736_v16, %s9897_s5 }
0x2c94   :  { %v3982_v12 = vpop.permute.xlu0 %3981 }
0x2c95   :  { %v3984_v34 = vmul.f32 %v9734_v13, %v3982_v12 }
0x2c97   :  { %v3986_v33 = vrot.slane %v3984_v34, 6 }
0x2c99   :  { %3987 = vrot.lane.b32.xlu1 %v3986_v33, %s9898_s29 }
0x2d0b   :  { %v3988_v37 = vpop.permute.xlu1 %3987 }
0x2d0c   :  { %8962 = vmatmul.mubr.msk.f32.vlgmr.msra.gmra.mxu0 %vm2294_vm2, %v3988_v37 }
0x2d0d   :  { %8976 = vmatpush3.msra.mxu0 %v11545_v53  ;;  %8983 = vmatprep.mubr.msk.f32.mxu0 %vm9896_vm1, %v12862_v4 }
0x2d0e   :  { %8977 = vmatprep.subr.mxu0 %v12862_v4 }
0x2d0f   :  { %8978 = vmatpush3.msra.mxu0 %v11570_v29 }
0x2d10   :  { %8979 = vmatprep.subr.mxu0 %v12862_v4 }
0x2d11   :  { %8980 = vmatpush3.msra.mxu0 %v11349_v54 }
0x2d12   :  { %8981 = vmatprep.subr.mxu0 %v12862_v4 }
0x2d13   :  { %8982 = vmatpush3.msra.mxu0 %v11372_v0 }
0x2d14   :  { %8997 = vmatprep.subr.mxu0 %v12862_v4 }
0x2dcc   :  { %v4057_v56 = vpop.f32.mrf.mxu0 }
0x2dcd   :  { %v4061_v47 = vadd.f32 %v4057_v56, %v11285_v59 }
0x2dce   :  { %v8963_v8 = vpop.f32.mrf.mxu0 }
0x2dcf   :  { %9737 = vtanh.f32 %v4061_v47  ;;  %v8264_v22 = vmul.f32 -1.442695, %v4061_v47 }
0x2dd1   :  { %9739 = vpow2.f32 %v8264_v22 }
0x2ddc   :  { %v9738_v35 = vpop.eup %9737 }
0x2ddd   :  { %4074 = vrot.lane.b32.xlu0 %v9738_v35, %s9897_s5 }
0x2dde   :  { %v9740_v1 = vpop.eup %9739 }
0x2ddf   :  { %v4065_v9 = vadd.f32 1.0, %v9740_v1 }
0x2de1   :  { %9741 = vrcp.f32 %v4065_v9 }
0x2dee   :  { %v9742_v54 = vpop.eup %9741 }
0x2def   :  { %v4072_v41 = vmul.f32 %v9742_v54, %v4070_v57 }
0x2e4f   :  { %v4075_v38 = vpop.permute.xlu0 %4074 }
0x2e50   :  { %v4077_v60 = vmul.f32 %v9742_v54, %v4075_v38 }
0x2e52   :  { %4079 = vrot.lane.b32.xlu1 %v4077_v60, %s9898_s29 }
0x2ec4   :  { %v4080_v14 = vpop.permute.xlu1 %4079 }
0x2ec5   :  { %v4082_v5 = vadd.f32 %v4080_v14, %v4072_v41 }
0x2ec7   :  { %9743 = vtanh.f32 %v4082_v5 }
0x2ed4   :  { %v9744_v44 = vpop.eup %9743 }
0x2ed5   :  { %4085 = vrot.lane.b32.xlu0 %v9744_v44, %s9897_s5 }
0x2f47   :  { %v4086_v55 = vpop.permute.xlu0 %4085 }
0x2f48   :  { %v4088_v50 = vmul.f32 %v9742_v54, %v4086_v55 }
0x2f4a   :  { %4090 = vrot.lane.b32.xlu1 %v4088_v50, %s9898_s29 }
0x2fbc   :  { %v4091_v11 = vpop.permute.xlu1 %4090 }
0x2fbd   :  { %8973 = vmatmul.mubr.msk.f32.vlgmr.msra.gmra.mxu1 %vm2294_vm2, %v4091_v11 }
0x2fbe   :  { %8987 = vmatpush3.msra.mxu1 %v11545_v53  ;;  %8994 = vmatprep.mubr.msk.f32.mxu1 %vm9896_vm1, %v12862_v4 }
0x2fbf   :  { %8988 = vmatprep.subr.mxu1 %v12862_v4 }
0x2fc0   :  { %8989 = vmatpush3.msra.mxu1 %v11570_v29 }
0x2fc1   :  { %8990 = vmatprep.subr.mxu1 %v12862_v4 }
0x2fc2   :  { %8991 = vmatpush3.msra.mxu1 %v11593_v31 }
0x2fc3   :  { %8992 = vmatprep.subr.mxu1 %v12862_v4 }
0x2fc4   :  { %8993 = vmatpush3.msra.mxu1 %v11372_v0  ;;  %v4176_v0 = vrot.slane %v4082_v5, 6 }
0x2fc5   :  { %9008 = vmatprep.subr.mxu1 %v12862_v4 }
0x307d   :  { %v4160_v40 = vpop.f32.mrf.mxu1 }
0x307e   :  { %v4165_v63 = vrot.slane %v4160_v40, 6 }
0x307f   :  { %v8974_v48 = vpop.f32.mrf.mxu1 }
0x3080   :  { %v4167_v58 = vadd.f32 %v4165_v63, %v11285_v59 }
0x3082   :  { %9745 = vtanh.f32 %v4167_v58  ;;  %v8266_v61 = vmul.f32 -1.442695, %v4167_v58 }
0x3084   :  { %9747 = vpow2.f32 %v8266_v61 }
0x308f   :  { %v9746_v32 = vpop.eup %9745 }
0x3090   :  { %4180 = vrot.lane.b32.xlu0 %v9746_v32, %s9897_s5 }
0x3091   :  { %v9748_v20 = vpop.eup %9747 }
0x3092   :  { %v4171_v3 = vadd.f32 1.0, %v9748_v20 }
0x3094   :  { %9749 = vrcp.f32 %v4171_v3 }
0x30a1   :  { %v9750_v52 = vpop.eup %9749 }
0x30a2   :  { %v4178_v30 = vmul.f32 %v9750_v52, %v4176_v0 }
0x3102   :  { %v4181_v27 = vpop.permute.xlu0 %4180 }
0x3103   :  { %v4183_v21 = vmul.f32 %v9750_v52, %v4181_v27 }
0x3105   :  { %4185 = vrot.lane.b32.xlu1 %v4183_v21, %s9898_s29 }
0x3177   :  { %v4186_v36 = vpop.permute.xlu1 %4185 }
0x3178   :  { %v4188_v46 = vadd.f32 %v4186_v36, %v4178_v30 }
0x317a   :  { %9751 = vtanh.f32 %v4188_v46  ;;  %v4283_v34 = vrot.slane %v4188_v46, 6 }
0x3187   :  { %v9752_v10 = vpop.eup %9751 }
0x3188   :  { %4191 = vrot.lane.b32.xlu0 %v9752_v10, %s9897_s5 }
0x31fa   :  { %v4192_v2 = vpop.permute.xlu0 %4191 }
0x31fb   :  { %v4194_v23 = vmul.f32 %v9750_v52, %v4192_v2 }
0x31fd   :  { %v4196_v28 = vrot.slane %v4194_v23, 2 }
0x31ff   :  { %4197 = vrot.lane.b32.xlu1 %v4196_v28, %s9898_s29 }
0x3271   :  { %v4198_v26 = vpop.permute.xlu1 %4197 }
0x3272   :  { %8984 = vmatmul.mubr.msk.f32.vlgmr.msra.gmra.mxu0 %vm2294_vm2, %v4198_v26 }
0x3273   :  { %8998 = vmatpush3.msra.mxu0 %v11545_v53  ;;  %9005 = vmatprep.mubr.msk.f32.mxu0 %vm9896_vm1, %v12862_v4 }
0x3274   :  { %8999 = vmatprep.subr.mxu0 %v12862_v4 }
0x3275   :  { %9000 = vmatpush3.msra.mxu0 %v11570_v29 }
0x3276   :  { %9001 = vmatprep.subr.mxu0 %v12862_v4 }
0x3277   :  { %9002 = vmatpush3.msra.mxu0 %v11593_v31 }
0x3278   :  { %9003 = vmatprep.subr.mxu0 %v12862_v4 }
0x3279   :  { %9004 = vmatpush3.msra.mxu0 %v11616_v25 }
0x327a   :  { %9019 = vmatprep.subr.mxu0 %v12862_v4 }
0x3332   :  { %v4267_v45 = vpop.f32.mrf.mxu0 }
0x3333   :  { %v4272_v7 = vrot.slane %v4267_v45, 4 }
0x3334   :  { %v8985_v13 = vpop.f32.mrf.mxu0 }
0x3335   :  { %v4274_v42 = vadd.f32 %v4272_v7, %v11285_v59 }
0x3337   :  { %9753 = vtanh.f32 %v4274_v42  ;;  %v8268_v62 = vmul.f32 -1.442695, %v4274_v42 }
0x3339   :  { %9755 = vpow2.f32 %v8268_v62 }
0x3344   :  { %v9754_v17 = vpop.eup %9753 }
0x3345   :  { %4287 = vrot.lane.b32.xlu0 %v9754_v17, %s9897_s5 }
0x3346   :  { %v9756_v15 = vpop.eup %9755 }
0x3347   :  { %v4278_v49 = vadd.f32 1.0, %v9756_v15 }
0x3349   :  { %9757 = vrcp.f32 %v4278_v49 }
0x3356   :  { %v9758_v39 = vpop.eup %9757 }
0x3357   :  { %v4285_v33 = vmul.f32 %v9758_v39, %v4283_v34 }
0x33b7   :  { %v4288_v16 = vpop.permute.xlu0 %4287 }
0x33b8   :  { %v4290_v12 = vmul.f32 %v9758_v39, %v4288_v16 }
0x33ba   :  { %4292 = vrot.lane.b32.xlu1 %v4290_v12, %s9898_s29 }
0x342c   :  { %v4293_v37 = vpop.permute.xlu1 %4292 }
0x342d   :  { %v4295_v56 = vadd.f32 %v4293_v37, %v4285_v33 }
0x342f   :  { %9759 = vtanh.f32 %v4295_v56  ;;  %v4390_v11 = vrot.slane %v4295_v56, 6 }
0x343c   :  { %v9760_v47 = vpop.eup %9759 }
0x343d   :  { %4298 = vrot.lane.b32.xlu0 %v9760_v47, %s9897_s5 }
0x34af   :  { %v4299_v8 = vpop.permute.xlu0 %4298 }
0x34b0   :  { %v4301_v35 = vmul.f32 %v9758_v39, %v4299_v8 }
0x34b2   :  { %v4303_v22 = vrot.slane %v4301_v35, 4 }
0x34b4   :  { %4304 = vrot.lane.b32.xlu1 %v4303_v22, %s9898_s29 }
0x3526   :  { %v4305_v1 = vpop.permute.xlu1 %4304 }
0x3527   :  { %8995 = vmatmul.mubr.msk.f32.vlgmr.msra.gmra.mxu1 %vm2294_vm2, %v4305_v1 }
0x3528   :  { %9009 = vmatpush3.msra.mxu1 %v11545_v53  ;;  %9016 = vmatprep.mubr.msk.f32.mxu1 %vm9896_vm1, %v12862_v4 }
0x3529   :  { %9010 = vmatprep.subr.mxu1 %v12862_v4 }
0x352a   :  { %9011 = vmatpush3.msra.mxu1 %v11570_v29 }
0x352b   :  { %9012 = vmatprep.subr.mxu1 %v12862_v4 }
0x352c   :  { %9013 = vmatpush3.msra.mxu1 %v11593_v31 }
0x352d   :  { %9014 = vmatprep.subr.mxu1 %v12862_v4 }
0x352e   :  { %9015 = vmatpush3.msra.mxu1 %v11616_v25 }
0x352f   :  { %9030 = vmatprep.subr.mxu1 %v12862_v4 }
0x35e7   :  { %v4374_v9 = vpop.f32.mrf.mxu1 }
0x35e8   :  { %v4379_v54 = vrot.slane %v4374_v9, 2 }
0x35e9   :  { %v8996_v38 = vpop.f32.mrf.mxu1 }
0x35ea   :  { %v4381_v60 = vadd.f32 %v4379_v54, %v11285_v59 }
0x35ec   :  { %9761 = vtanh.f32 %v4381_v60  ;;  %v8270_v41 = vmul.f32 -1.442695, %v4381_v60 }
0x35ee   :  { %9763 = vpow2.f32 %v8270_v41 }
0x35f9   :  { %v9762_v57 = vpop.eup %9761 }
0x35fa   :  { %4394 = vrot.lane.b32.xlu0 %v9762_v57, %s9897_s5 }
0x35fb   :  { %v9764_v14 = vpop.eup %9763 }
0x35fc   :  { %v4385_v5 = vadd.f32 1.0, %v9764_v14 }
0x35fe   :  { %9765 = vrcp.f32 %v4385_v5 }
0x360b   :  { %v9766_v44 = vpop.eup %9765 }
0x360c   :  { %v4392_v40 = vmul.f32 %v9766_v44, %v4390_v11 }
0x366c   :  { %v4395_v55 = vpop.permute.xlu0 %4394 }
0x366d   :  { %v4397_v50 = vmul.f32 %v9766_v44, %v4395_v55 }
0x366f   :  { %4399 = vrot.lane.b32.xlu1 %v4397_v50, %s9898_s29 }
0x36e1   :  { %v4400_v63 = vpop.permute.xlu1 %4399 }
0x36e2   :  { %v4402_v48 = vadd.f32 %v4400_v63, %v4392_v40 }
0x36e4   :  { %9767 = vtanh.f32 %v4402_v48  ;;  %v4494_v23 = vrot.slane %v4402_v48, 6 }
0x36f1   :  { %v9768_v59 = vpop.eup %9767 }
0x36f2   :  { %4405 = vrot.lane.b32.xlu0 %v9768_v59, %s9897_s5 }
0x3764   :  { %v4406_v58 = vpop.permute.xlu0 %4405 }
0x3765   :  { %v4408_v32 = vmul.f32 %v9766_v44, %v4406_v58 }
0x3767   :  { %v4410_v61 = vrot.slane %v4408_v32, 6 }
0x3769   :  { %4411 = vrot.lane.b32.xlu1 %v4410_v61, %s9898_s29 }
0x37db   :  { %v4412_v20 = vpop.permute.xlu1 %4411 }
0x37dc   :  { %9006 = vmatmul.mubr.msk.f32.vlgmr.msra.gmra.mxu0 %vm2294_vm2, %v4412_v20 }
0x37dd   :  { %9020 = vmatpush3.msra.mxu0 %v11545_v53  ;;  %9027 = vmatprep.mubr.msk.f32.mxu0 %vm9896_vm1, %v12862_v4 }
0x37de   :  { %9021 = vmatprep.subr.mxu0 %v12862_v4 }
0x37df   :  { %9022 = vmatpush3.msra.mxu0 %v11570_v29 }
0x37e0   :  { %9023 = vmatprep.subr.mxu0 %v12862_v4 }
0x37e1   :  { %9024 = vmatpush3.msra.mxu0 %v11593_v31 }
0x37e2   :  { %9025 = vmatprep.subr.mxu0 %v12862_v4 }
0x37e3   :  { %9026 = vmatpush3.msra.mxu0 %v11616_v25 }
0x37e4   :  { %9041 = vmatprep.subr.mxu0 %v12862_v4 }
0x389c   :  { %v4481_v3 = vpop.f32.mrf.mxu0 }
0x389d   :  { %v4485_v52 = vadd.f32 %v4481_v3, %v11288_v18 }
0x389e   :  { %v9007_v27 = vpop.f32.mrf.mxu0 }
0x389f   :  { %9769 = vtanh.f32 %v4485_v52  ;;  %v8272_v0 = vmul.f32 -1.442695, %v4485_v52 }
0x38a1   :  { %9771 = vpow2.f32 %v8272_v0 }
0x38ac   :  { %v9770_v21 = vpop.eup %9769 }
0x38ad   :  { %4498 = vrot.lane.b32.xlu0 %v9770_v21, %s9897_s5 }
0x38ae   :  { %v9772_v30 = vpop.eup %9771 }
0x38af   :  { %v4489_v36 = vadd.f32 1.0, %v9772_v30 }
0x38b1   :  { %9773 = vrcp.f32 %v4489_v36 }
0x38be   :  { %v9774_v46 = vpop.eup %9773 }
0x38bf   :  { %v4496_v28 = vmul.f32 %v9774_v46, %v4494_v23 }
0x391f   :  { %v4499_v10 = vpop.permute.xlu0 %4498 }
0x3920   :  { %v4501_v2 = vmul.f32 %v9774_v46, %v4499_v10 }
0x3922   :  { %4503 = vrot.lane.b32.xlu1 %v4501_v2, %s9898_s29 }
0x3994   :  { %v4504_v26 = vpop.permute.xlu1 %4503 }
0x3995   :  { %v4506_v45 = vadd.f32 %v4504_v26, %v4496_v28 }
0x3997   :  { %9775 = vtanh.f32 %v4506_v45  ;;  %v4600_v8 = vrot.slane %v4506_v45, 6 }
0x39a4   :  { %v9776_v7 = vpop.eup %9775 }
0x39a5   :  { %4509 = vrot.lane.b32.xlu0 %v9776_v7, %s9897_s5 }
0x3a17   :  { %v4510_v13 = vpop.permute.xlu0 %4509 }
0x3a18   :  { %v4512_v42 = vmul.f32 %v9774_v46, %v4510_v13 }
0x3a1a   :  { %4514 = vrot.lane.b32.xlu1 %v4512_v42, %s9898_s29 }
0x3a8c   :  { %v4515_v17 = vpop.permute.xlu1 %4514 }
0x3a8d   :  { %9017 = vmatmul.mubr.msk.f32.vlgmr.msra.gmra.mxu1 %vm2294_vm2, %v4515_v17 }
0x3a8e   :  { %9031 = vmatpush3.msra.mxu1 %v11545_v53  ;;  %9038 = vmatprep.mubr.msk.f32.mxu1 %vm9896_vm1, %v12862_v4 }
0x3a8f   :  { %9032 = vmatprep.subr.mxu1 %v12862_v4 }
0x3a90   :  { %9033 = vmatpush3.msra.mxu1 %v11570_v29 }
0x3a91   :  { %9034 = vmatprep.subr.mxu1 %v12862_v4 }
0x3a92   :  { %9035 = vmatpush3.msra.mxu1 %v11593_v31 }
0x3a93   :  { %9036 = vmatprep.subr.mxu1 %v12862_v4 }
0x3a94   :  { %9037 = vmatpush3.msra.mxu1 %v11616_v25 }
0x3a95   :  { %9052 = vmatprep.subr.mxu1 %v12862_v4 }
0x3b4d   :  { %v4584_v62 = vpop.f32.mrf.mxu1 }
0x3b4e   :  { %v4589_v15 = vrot.slane %v4584_v62, 6 }
0x3b4f   :  { %v9018_v49 = vpop.f32.mrf.mxu1 }
0x3b50   :  { %v4591_v39 = vadd.f32 %v4589_v15, %v11288_v18 }
0x3b52   :  { %9777 = vtanh.f32 %v4591_v39  ;;  %v8274_v12 = vmul.f32 -1.442695, %v4591_v39 }
0x3b54   :  { %9779 = vpow2.f32 %v8274_v12 }
0x3b5f   :  { %v9778_v16 = vpop.eup %9777 }
0x3b60   :  { %4604 = vrot.lane.b32.xlu0 %v9778_v16, %s9897_s5 }
0x3b61   :  { %v9780_v34 = vpop.eup %9779 }
0x3b62   :  { %v4595_v33 = vadd.f32 1.0, %v9780_v34 }
0x3b64   :  { %9781 = vrcp.f32 %v4595_v33 }
0x3b71   :  { %v9782_v37 = vpop.eup %9781 }
0x3b72   :  { %v4602_v35 = vmul.f32 %v9782_v37, %v4600_v8 }
0x3bd2   :  { %v4605_v56 = vpop.permute.xlu0 %4604 }
0x3bd3   :  { %v4607_v47 = vmul.f32 %v9782_v37, %v4605_v56 }
0x3bd5   :  { %4609 = vrot.lane.b32.xlu1 %v4607_v47, %s9898_s29 }
0x3c47   :  { %v4610_v22 = vpop.permute.xlu1 %4609 }
0x3c48   :  { %v4612_v1 = vadd.f32 %v4610_v22, %v4602_v35 }
0x3c4a   :  { %9783 = vtanh.f32 %v4612_v1  ;;  %v4707_v58 = vrot.slane %v4612_v1, 6 }
0x3c57   :  { %v9784_v9 = vpop.eup %9783 }
0x3c58   :  { %4615 = vrot.lane.b32.xlu0 %v9784_v9, %s9897_s5 }
0x3cca   :  { %v4616_v54 = vpop.permute.xlu0 %4615 }
0x3ccb   :  { %v4618_v38 = vmul.f32 %v9782_v37, %v4616_v54 }
0x3ccd   :  { %v4620_v60 = vrot.slane %v4618_v38, 2 }
0x3ccf   :  { %4621 = vrot.lane.b32.xlu1 %v4620_v60, %s9898_s29 }
0x3d41   :  { %v4622_v57 = vpop.permute.xlu1 %4621 }
0x3d42   :  { %9028 = vmatmul.mubr.msk.f32.vlgmr.msra.gmra.mxu0 %vm2294_vm2, %v4622_v57 }
0x3d43   :  { %9042 = vmatpush3.msra.mxu0 %v11545_v53  ;;  %9049 = vmatprep.mubr.msk.f32.mxu0 %vm9896_vm1, %v12862_v4 }
0x3d44   :  { %9043 = vmatprep.subr.mxu0 %v12862_v4 }
0x3d45   :  { %9044 = vmatpush3.msra.mxu0 %v11570_v29 }
0x3d46   :  { %9045 = vmatprep.subr.mxu0 %v12862_v4 }
0x3d47   :  { %9046 = vmatpush3.msra.mxu0 %v11593_v31 }
0x3d48   :  { %9047 = vmatprep.subr.mxu0 %v12862_v4 }
0x3d49   :  { %9048 = vmatpush3.msra.mxu0 %v11616_v25 }
0x3d4a   :  { %9063 = vmatprep.subr.mxu0 %v12862_v4 }
0x3e02   :  { %v4691_v41 = vpop.f32.mrf.mxu0 }
0x3e03   :  { %v4696_v14 = vrot.slane %v4691_v41, 4 }
0x3e04   :  { %v9029_v5 = vpop.f32.mrf.mxu0 }
0x3e05   :  { %v4698_v44 = vadd.f32 %v4696_v14, %v11288_v18 }
0x3e07   :  { %9785 = vtanh.f32 %v4698_v44  ;;  %v8276_v50 = vmul.f32 -1.442695, %v4698_v44 }
0x3e09   :  { %9787 = vpow2.f32 %v8276_v50 }
0x3e14   :  { %v9786_v55 = vpop.eup %9785 }
0x3e15   :  { %4711 = vrot.lane.b32.xlu0 %v9786_v55, %s9897_s5 }
0x3e16   :  { %v9788_v11 = vpop.eup %9787 }
0x3e17   :  { %v4702_v40 = vadd.f32 1.0, %v9788_v11 }
0x3e19   :  { %9789 = vrcp.f32 %v4702_v40 }
0x3e26   :  { %v9790_v63 = vpop.eup %9789 }
0x3e27   :  { %v4709_v32 = vmul.f32 %v9790_v63, %v4707_v58 }
0x3e87   :  { %v4712_v48 = vpop.permute.xlu0 %4711 }
0x3e88   :  { %v4714_v59 = vmul.f32 %v9790_v63, %v4712_v48 }
0x3e8a   :  { %4716 = vrot.lane.b32.xlu1 %v4714_v59, %s9898_s29 }
0x3efc   :  { %v4717_v61 = vpop.permute.xlu1 %4716 }
0x3efd   :  { %v4719_v20 = vadd.f32 %v4717_v61, %v4709_v32 }
0x3eff   :  { %9791 = vtanh.f32 %v4719_v20  ;;  %v4814_v42 = vrot.slane %v4719_v20, 6 }
0x3f0c   :  { %v9792_v3 = vpop.eup %9791 }
0x3f0d   :  { %4722 = vrot.lane.b32.xlu0 %v9792_v3, %s9897_s5 }
0x3f7f   :  { %v4723_v52 = vpop.permute.xlu0 %4722 }
0x3f80   :  { %v4725_v27 = vmul.f32 %v9790_v63, %v4723_v52 }
0x3f82   :  { %v4727_v21 = vrot.slane %v4725_v27, 4 }
0x3f84   :  { %4728 = vrot.lane.b32.xlu1 %v4727_v21, %s9898_s29 }
0x3ff6   :  { %v4729_v0 = vpop.permute.xlu1 %4728 }
0x3ff7   :  { %9039 = vmatmul.mubr.msk.f32.vlgmr.msra.gmra.mxu1 %vm2294_vm2, %v4729_v0 }
0x3ff8   :  { %9053 = vmatpush3.msra.mxu1 %v11545_v53  ;;  %9060 = vmatprep.mubr.msk.f32.mxu1 %vm9896_vm1, %v12862_v4 }
0x3ff9   :  { %9054 = vmatprep.subr.mxu1 %v12862_v4 }
0x3ffa   :  { %9055 = vmatpush3.msra.mxu1 %v11570_v29 }
0x3ffb   :  { %9056 = vmatprep.subr.mxu1 %v12862_v4 }
0x3ffc   :  { %9057 = vmatpush3.msra.mxu1 %v11593_v31 }
0x3ffd   :  { %9058 = vmatprep.subr.mxu1 %v12862_v4 }
0x3ffe   :  { %9059 = vmatpush3.msra.mxu1 %v11616_v25 }
0x3fff   :  { %9074 = vmatprep.subr.mxu1 %v12862_v4 }
0x40b7   :  { %v4798_v30 = vpop.f32.mrf.mxu1 }
0x40b8   :  { %v4803_v36 = vrot.slane %v4798_v30, 2 }
0x40b9   :  { %v9040_v46 = vpop.f32.mrf.mxu1 }
0x40ba   :  { %v4805_v10 = vadd.f32 %v4803_v36, %v11288_v18 }
0x40bc   :  { %9793 = vtanh.f32 %v4805_v10  ;;  %v8278_v23 = vmul.f32 -1.442695, %v4805_v10 }
0x40be   :  { %9795 = vpow2.f32 %v8278_v23 }
0x40c9   :  { %v9794_v2 = vpop.eup %9793 }
0x40ca   :  { %4818 = vrot.lane.b32.xlu0 %v9794_v2, %s9897_s5 }
0x40cb   :  { %v9796_v28 = vpop.eup %9795 }
0x40cc   :  { %v4809_v26 = vadd.f32 1.0, %v9796_v28 }
0x40ce   :  { %9797 = vrcp.f32 %v4809_v26 }
0x40db   :  { %v9798_v45 = vpop.eup %9797 }
0x40dc   :  { %v4816_v17 = vmul.f32 %v9798_v45, %v4814_v42 }
0x413c   :  { %v4819_v7 = vpop.permute.xlu0 %4818 }
0x413d   :  { %v4821_v13 = vmul.f32 %v9798_v45, %v4819_v7 }
0x413f   :  { %4823 = vrot.lane.b32.xlu1 %v4821_v13, %s9898_s29 }
0x41b1   :  { %v4824_v62 = vpop.permute.xlu1 %4823 }
0x41b2   :  { %v4826_v15 = vadd.f32 %v4824_v62, %v4816_v17 }
0x41b4   :  { %9799 = vtanh.f32 %v4826_v15  ;;  %v4918_v54 = vrot.slane %v4826_v15, 6 }
0x41c1   :  { %v9800_v18 = vpop.eup %9799 }
0x41c2   :  { %4829 = vrot.lane.b32.xlu0 %v9800_v18, %s9897_s5 }
0x4234   :  { %v4830_v49 = vpop.permute.xlu0 %4829 }
0x4235   :  { %v4832_v39 = vmul.f32 %v9798_v45, %v4830_v49 }
0x4237   :  { %v4834_v16 = vrot.slane %v4832_v39, 6 }
0x4239   :  { %4835 = vrot.lane.b32.xlu1 %v4834_v16, %s9898_s29 }
0x42ab   :  { %v4836_v12 = vpop.permute.xlu1 %4835 }
0x42ac   :  { %9050 = vmatmul.mubr.msk.f32.vlgmr.msra.gmra.mxu0 %vm2294_vm2, %v4836_v12 }
0x42ad   :  { %9064 = vmatpush3.msra.mxu0 %v11545_v53  ;;  %9071 = vmatprep.mubr.msk.f32.mxu0 %vm9896_vm1, %v12862_v4 }
0x42ae   :  { %9065 = vmatprep.subr.mxu0 %v12862_v4 }
0x42af   :  { %9066 = vmatpush3.msra.mxu0 %v11570_v29 }
0x42b0   :  { %9067 = vmatprep.subr.mxu0 %v12862_v4 }
0x42b1   :  { %9068 = vmatpush3.msra.mxu0 %v11593_v31 }
0x42b2   :  { %9069 = vmatprep.subr.mxu0 %v12862_v4 }
0x42b3   :  { %9070 = vmatpush3.msra.mxu0 %v11616_v25 }
0x42b4   :  { %9085 = vmatprep.subr.mxu0 %v12862_v4 }
0x436c   :  { %v4905_v34 = vpop.f32.mrf.mxu0 }
0x436d   :  { %v4909_v33 = vadd.f32 %v4905_v34, %v11290_v19 }
0x436e   :  { %v9051_v37 = vpop.f32.mrf.mxu0 }
0x436f   :  { %9801 = vtanh.f32 %v4909_v33  ;;  %v8280_v47 = vmul.f32 -1.442695, %v4909_v33 }
0x4371   :  { %9803 = vpow2.f32 %v8280_v47 }
0x437c   :  { %v9802_v56 = vpop.eup %9801 }
0x437d   :  { %4922 = vrot.lane.b32.xlu0 %v9802_v56, %s9897_s5 }
0x437e   :  { %v9804_v8 = vpop.eup %9803 }
0x437f   :  { %v4913_v35 = vadd.f32 1.0, %v9804_v8 }
0x4381   :  { %9805 = vrcp.f32 %v4913_v35 }
0x438e   :  { %v9806_v22 = vpop.eup %9805 }
0x438f   :  { %v4920_v38 = vmul.f32 %v9806_v22, %v4918_v54 }
0x43ef   :  { %v4923_v1 = vpop.permute.xlu0 %4922 }
0x43f0   :  { %v4925_v9 = vmul.f32 %v9806_v22, %v4923_v1 }
0x43f2   :  { %4927 = vrot.lane.b32.xlu1 %v4925_v9, %s9898_s29 }
0x4464   :  { %v4928_v60 = vpop.permute.xlu1 %4927 }
0x4465   :  { %v4930_v57 = vadd.f32 %v4928_v60, %v4920_v38 }
0x4467   :  { %9807 = vtanh.f32 %v4930_v57  ;;  %v5024_v3 = vrot.slane %v4930_v57, 6 }
0x4474   :  { %v9808_v41 = vpop.eup %9807 }
0x4475   :  { %4933 = vrot.lane.b32.xlu0 %v9808_v41, %s9897_s5 }
0x44e7   :  { %v4934_v14 = vpop.permute.xlu0 %4933 }
0x44e8   :  { %v4936_v5 = vmul.f32 %v9806_v22, %v4934_v14 }
0x44ea   :  { %4938 = vrot.lane.b32.xlu1 %v4936_v5, %s9898_s29 }
0x455c   :  { %v4939_v44 = vpop.permute.xlu1 %4938 }
0x455d   :  { %9061 = vmatmul.mubr.msk.f32.vlgmr.msra.gmra.mxu1 %vm2294_vm2, %v4939_v44 }
0x455e   :  { %9075 = vmatpush3.msra.mxu1 %v11545_v53  ;;  %9082 = vmatprep.mubr.msk.f32.mxu1 %vm9896_vm1, %v12862_v4 }
0x455f   :  { %9076 = vmatprep.subr.mxu1 %v12862_v4 }
0x4560   :  { %9077 = vmatpush3.msra.mxu1 %v11570_v29 }
0x4561   :  { %9078 = vmatprep.subr.mxu1 %v12862_v4 }
0x4562   :  { %9079 = vmatpush3.msra.mxu1 %v11593_v31 }
0x4563   :  { %9080 = vmatprep.subr.mxu1 %v12862_v4 }
0x4564   :  { %9081 = vmatpush3.msra.mxu1 %v11616_v25 }
0x4565   :  { %9096 = vmatprep.subr.mxu1 %v12862_v4 }
0x461d   :  { %v5008_v55 = vpop.f32.mrf.mxu1 }
0x461e   :  { %v5013_v50 = vrot.slane %v5008_v55, 6 }
0x461f   :  { %v9062_v11 = vpop.f32.mrf.mxu1 }
0x4620   :  { %v5015_v40 = vadd.f32 %v5013_v50, %v11290_v19 }
0x4622   :  { %9809 = vtanh.f32 %v5015_v40  ;;  %v8282_v48 = vmul.f32 -1.442695, %v5015_v40 }
0x4624   :  { %9811 = vpow2.f32 %v8282_v48 }
0x462f   :  { %v9810_v63 = vpop.eup %9809 }
0x4630   :  { %5028 = vrot.lane.b32.xlu0 %v9810_v63, %s9897_s5 }
0x4631   :  { %v9812_v59 = vpop.eup %9811 }
0x4632   :  { %v5019_v58 = vadd.f32 1.0, %v9812_v59 }
0x4634   :  { %9813 = vrcp.f32 %v5019_v58 }
0x4641   :  { %v9814_v32 = vpop.eup %9813 }
0x4642   :  { %v5026_v52 = vmul.f32 %v9814_v32, %v5024_v3 }
0x46a2   :  { %v5029_v61 = vpop.permute.xlu0 %5028 }
0x46a3   :  { %v5031_v20 = vmul.f32 %v9814_v32, %v5029_v61 }
0x46a5   :  { %5033 = vrot.lane.b32.xlu1 %v5031_v20, %s9898_s29 }
0x4717   :  { %v5034_v27 = vpop.permute.xlu1 %5033 }
0x4718   :  { %v5036_v21 = vadd.f32 %v5034_v27, %v5026_v52 }
0x471a   :  { %9815 = vtanh.f32 %v5036_v21  ;;  %v5131_v18 = vrot.slane %v5036_v21, 6 }
0x4727   :  { %v9816_v0 = vpop.eup %9815 }
0x4728   :  { %5039 = vrot.lane.b32.xlu0 %v9816_v0, %s9897_s5 }
0x479a   :  { %v5040_v30 = vpop.permute.xlu0 %5039 }
0x479b   :  { %v5042_v36 = vmul.f32 %v9814_v32, %v5040_v30 }
0x479d   :  { %v5044_v46 = vrot.slane %v5042_v36, 2 }
0x479f   :  { %5045 = vrot.lane.b32.xlu1 %v5044_v46, %s9898_s29 }
0x4811   :  { %v5046_v10 = vpop.permute.xlu1 %5045 }
0x4812   :  { %9072 = vmatmul.mubr.msk.f32.vlgmr.msra.gmra.mxu0 %vm2294_vm2, %v5046_v10 }
0x4813   :  { %9086 = vmatpush3.msra.mxu0 %v11545_v53  ;;  %9093 = vmatprep.mubr.msk.f32.mxu0 %vm9896_vm1, %v12862_v4 }
0x4814   :  { %9087 = vmatprep.subr.mxu0 %v12862_v4 }
0x4815   :  { %9088 = vmatpush3.msra.mxu0 %v11570_v29 }
0x4816   :  { %9089 = vmatprep.subr.mxu0 %v12862_v4 }
0x4817   :  { %9090 = vmatpush3.msra.mxu0 %v11593_v31 }
0x4818   :  { %9091 = vmatprep.subr.mxu0 %v12862_v4 }
0x4819   :  { %9092 = vmatpush3.msra.mxu0 %v11616_v25 }
0x481a   :  { %9107 = vmatprep.subr.mxu0 %v12862_v4 }
0x48d2   :  { %v5115_v2 = vpop.f32.mrf.mxu0 }
0x48d3   :  { %v5120_v23 = vrot.slane %v5115_v2, 4 }
0x48d4   :  { %v9073_v28 = vpop.f32.mrf.mxu0 }
0x48d5   :  { %v5122_v26 = vadd.f32 %v5120_v23, %v11290_v19  ;;  %v9893_v28 = vld [vmem:[%s12735_s4 + $0x18] sm:$0xff] }
0x48d7   :  { %9817 = vtanh.f32 %v5122_v26  ;;  %v8284_v7 = vmul.f32 -1.442695, %v5122_v26 }
0x48d9   :  { %9819 = vpow2.f32 %v8284_v7 }
0x48e4   :  { %v9818_v45 = vpop.eup %9817 }
0x48e5   :  { %5135 = vrot.lane.b32.xlu0 %v9818_v45, %s9897_s5 }
0x48e6   :  { %v9820_v13 = vpop.eup %9819 }
0x48e7   :  { %v5126_v42 = vadd.f32 1.0, %v9820_v13 }
0x48e9   :  { %9821 = vrcp.f32 %v5126_v42 }
0x48f6   :  { %v9822_v17 = vpop.eup %9821 }
0x48f7   :  { %v5133_v49 = vmul.f32 %v9822_v17, %v5131_v18 }
0x4957   :  { %v5136_v62 = vpop.permute.xlu0 %5135 }
0x4958   :  { %v5138_v15 = vmul.f32 %v9822_v17, %v5136_v62 }
0x495a   :  { %5140 = vrot.lane.b32.xlu1 %v5138_v15, %s9898_s29 }
0x49cc   :  { %v5141_v39 = vpop.permute.xlu1 %5140 }
0x49cd   :  { %v5143_v16 = vadd.f32 %v5141_v39, %v5133_v49 }
0x49cf   :  { %9823 = vtanh.f32 %v5143_v16  ;;  %v5238_v14 = vrot.slane %v5143_v16, 6 }
0x49dc   :  { %v9824_v12 = vpop.eup %9823 }
0x49dd   :  { %5146 = vrot.lane.b32.xlu0 %v9824_v12, %s9897_s5 }
0x4a4f   :  { %v5147_v34 = vpop.permute.xlu0 %5146 }
0x4a50   :  { %v5149_v33 = vmul.f32 %v9822_v17, %v5147_v34 }
0x4a52   :  { %v5151_v37 = vrot.slane %v5149_v33, 4 }
0x4a54   :  { %5152 = vrot.lane.b32.xlu1 %v5151_v37, %s9898_s29 }
0x4ac6   :  { %v5153_v56 = vpop.permute.xlu1 %5152 }
0x4ac7   :  { %9083 = vmatmul.mubr.msk.f32.vlgmr.msra.gmra.mxu1 %vm2294_vm2, %v5153_v56  ;;  %v12868_v56 = vmov 0  }
0x4ac8   :  { %9097 = vmatpush3.msra.mxu1 %v11545_v53  ;;  %9104 = vmatprep.mubr.msk.f32.mxu1 %vm9896_vm1, %v12862_v4 }
0x4ac9   :  { %9098 = vmatprep.subr.mxu1 %v12862_v4 }
0x4aca   :  { %9099 = vmatpush3.msra.mxu1 %v11570_v29 }
0x4acb   :  { %9100 = vmatprep.subr.mxu1 %v12862_v4 }
0x4acc   :  { %9101 = vmatpush3.msra.mxu1 %v11593_v31 }
0x4acd   :  { %9102 = vmatprep.subr.mxu1 %v12862_v4 }
0x4ace   :  { %9103 = vmatpush3.msra.mxu1 %v11616_v25 }
0x4acf   :  { %9118 = vmatprep.subr.mxu1 %v12862_v4 }
0x4b87   :  { %v5222_v47 = vpop.f32.mrf.mxu1 }
0x4b88   :  { %v5227_v8 = vrot.slane %v5222_v47, 2 }
0x4b89   :  { %v9084_v35 = vpop.f32.mrf.mxu1 }
0x4b8a   :  { %v5229_v22 = vadd.f32 %v5227_v8, %v11290_v19 }
0x4b8c   :  { %9825 = vtanh.f32 %v5229_v22  ;;  %v8286_v9 = vmul.f32 -1.442695, %v5229_v22 }
0x4b8e   :  { %9827 = vpow2.f32 %v8286_v9 }
0x4b99   :  { %v9826_v1 = vpop.eup %9825 }
0x4b9a   :  { %5242 = vrot.lane.b32.xlu0 %v9826_v1, %s9897_s5 }
0x4b9b   :  { %v9828_v54 = vpop.eup %9827 }
0x4b9c   :  { %v5233_v38 = vadd.f32 1.0, %v9828_v54 }
0x4b9e   :  { %9829 = vrcp.f32 %v5233_v38 }
0x4bab   :  { %v9830_v60 = vpop.eup %9829 }
0x4bac   :  { %v5240_v5 = vmul.f32 %v9830_v60, %v5238_v14 }
0x4c0c   :  { %v5243_v57 = vpop.permute.xlu0 %5242 }
0x4c0d   :  { %v5245_v41 = vmul.f32 %v9830_v60, %v5243_v57 }
0x4c0f   :  { %5247 = vrot.lane.b32.xlu1 %v5245_v41, %s9898_s29 }
0x4c81   :  { %v5248_v44 = vpop.permute.xlu1 %5247 }
0x4c82   :  { %v5250_v55 = vadd.f32 %v5248_v44, %v5240_v5 }
0x4c84   :  { %9831 = vtanh.f32 %v5250_v55  ;;  %v5342_v21 = vrot.slane %v5250_v55, 6 }
0x4c91   :  { %v9832_v19 = vpop.eup %9831 }
0x4c92   :  { %5253 = vrot.lane.b32.xlu0 %v9832_v19, %s9897_s5 }
0x4d04   :  { %v5254_v50 = vpop.permute.xlu0 %5253 }
0x4d05   :  { %v5256_v11 = vmul.f32 %v9830_v60, %v5254_v50 }
0x4d07   :  { %v5258_v40 = vrot.slane %v5256_v11, 6 }
0x4d09   :  { %5259 = vrot.lane.b32.xlu1 %v5258_v40, %s9898_s29 }
0x4d7b   :  { %v5260_v63 = vpop.permute.xlu1 %5259 }
0x4d7c   :  { %9094 = vmatmul.mubr.msk.f32.vlgmr.msra.gmra.mxu0 %vm2294_vm2, %v5260_v63 }
0x4d7d   :  { %9108 = vmatpush3.msra.mxu0 %v11545_v53  ;;  %9115 = vmatprep.mubr.msk.f32.mxu0 %vm9896_vm1, %v12862_v4 }
0x4d7e   :  { %9109 = vmatprep.subr.mxu0 %v12862_v4 }
0x4d7f   :  { %9110 = vmatpush3.msra.mxu0 %v11570_v29 }
0x4d80   :  { %9111 = vmatprep.subr.mxu0 %v12862_v4 }
0x4d81   :  { %9112 = vmatpush3.msra.mxu0 %v11593_v31 }
0x4d82   :  { %9113 = vmatprep.subr.mxu0 %v12862_v4 }
0x4d83   :  { %9114 = vmatpush3.msra.mxu0 %v11616_v25 }
0x4e3c   :  { %v5329_v48 = vpop.f32.mrf.mxu0 }
0x4e3d   :  { %v5333_v59 = vadd.f32 %v5329_v48, %v11292_v43 }
0x4e3e   :  { %v9095_v58 = vpop.f32.mrf.mxu0 }
0x4e3f   :  { %9833 = vtanh.f32 %v5333_v59  ;;  %v8288_v32 = vmul.f32 -1.442695, %v5333_v59 }
0x4e41   :  { %9835 = vpow2.f32 %v8288_v32 }
0x4e4c   :  { %v9834_v53 = vpop.eup %9833 }
0x4e4d   :  { %5346 = vrot.lane.b32.xlu0 %v9834_v53, %s9897_s5 }
0x4e4e   :  { %v9836_v61 = vpop.eup %9835 }
0x4e4f   :  { %v5337_v20 = vadd.f32 1.0, %v9836_v61 }
0x4e51   :  { %9837 = vrcp.f32 %v5337_v20 }
0x4e5e   :  { %v9838_v3 = vpop.eup %9837 }
0x4e5f   :  { %v5344_v0 = vmul.f32 %v9838_v3, %v5342_v21 }
0x4ebf   :  { %v5347_v52 = vpop.permute.xlu0 %5346 }
0x4ec0   :  { %v5349_v27 = vmul.f32 %v9838_v3, %v5347_v52 }
0x4ec2   :  { %5351 = vrot.lane.b32.xlu1 %v5349_v27, %s9898_s29 }
0x4f34   :  { %v5352_v30 = vpop.permute.xlu1 %5351 }
0x4f35   :  { %v5354_v36 = vadd.f32 %v5352_v30, %v5344_v0 }
0x4f37   :  { %9839 = vtanh.f32 %v5354_v36 }
0x4f44   :  { %v9840_v46 = vpop.eup %9839 }
0x4f45   :  { %5357 = vrot.lane.b32.xlu0 %v9840_v46, %s9897_s5 }
0x4fb7   :  { %v5358_v10 = vpop.permute.xlu0 %5357 }
0x4fb8   :  { %v5360_v2 = vmul.f32 %v9838_v3, %v5358_v10  ;;  %v5694_v10 = vld [vmem:[%s12738_s6 + $0x60] sm:$0xff] }
0x4fba   :  { %5362 = vrot.lane.b32.xlu1 %v5360_v2, %s9898_s29  ;;  %v5691_v2 = vld [vmem:[%s12738_s6 + $0x48] sm:$0xff] }
0x502c   :  { %v5363_v23 = vpop.permute.xlu1 %5362 }
0x502d   :  { %9105 = vmatmul.mubr.msk.f32.vlgmr.msra.gmra.mxu1 %vm2294_vm2, %v5363_v23 }
0x502e   :  { %9119 = vmatpush3.msra.mxu1 %v9893_v28  ;;  %9126 = vmatprep.mubr.msk.f32.mxu1 %vm9896_vm1, %v12862_v4 }
0x502f   :  { %9120 = vmatprep.subr.mxu1 %v12862_v4 }
0x5030   :  { %9121 = vmatpush3.msra.mxu1 %v11570_v29 }
0x5031   :  { %9122 = vmatprep.subr.mxu1 %v12862_v4 }
0x5032   :  { %9123 = vmatpush3.msra.mxu1 %v11593_v31 }
0x5033   :  { %9124 = vmatprep.subr.mxu1 %v12862_v4  ;;  %v5448_v4 = vrot.slane %v5354_v36, 6 }
0x5034   :  { %9125 = vmatpush3.msra.mxu1 %v11616_v25 }
0x50ed   :  { %v5432_v26 = vpop.f32.mrf.mxu1 }
0x50ee   :  { %v5437_v45 = vrot.slane %v5432_v26, 6  ;;  %v5695_v26 = vld [vmem:[%s12738_s6 + $0x68] sm:$0xff] }
0x50ef   :  { %v9106_v7 = vpop.f32.mrf.mxu1 }
0x50f0   :  { %v5439_v13 = vadd.f32 %v5437_v45, %v11292_v43  ;;  %v5682_v45 = vld [vmem:[%s12738_s6] sm:$0xff] }
0x50f1   :  { %v5686_v7 = vld [vmem:[%s12738_s6 + $0x20] sm:$0xff] }
0x50f2   :  { %9841 = vtanh.f32 %v5439_v13  ;;  %v8290_v17 = vmul.f32 -1.442695, %v5439_v13  ;;  %v8305_v13 = vcombine.low %v5691_v2, %v5695_v26 }
0x50f4   :  { %9843 = vpow2.f32 %v8290_v17  ;;  %v8296_v17 = vcombine.high %v5682_v45, %v5686_v7 }
0x50ff   :  { %v9842_v42 = vpop.eup %9841 }
0x5100   :  { %5452 = vrot.lane.b32.xlu0 %v9842_v42, %s9897_s5  ;;  %v8306_v42 = vcombine.high %v5691_v2, %v5695_v26  ;;  %v9266_v2 = vld [vmem:[%s12739_s8 + $0x224] ss:$16 sps:$4 sm:$0xff]  }
0x5101   :  { %v9844_v29 = vpop.eup %9843  ;;  %v9269_v26 = vld [vmem:[%s12739_s8 + $0x4] ss:$16 sps:$4 sm:$0xff]  }
0x5102   :  { %v5443_v62 = vadd.f32 1.0, %v9844_v29  ;;  %v5683_v29 = vld [vmem:[%s12738_s6 + $0x8] sm:$0xff]  ;;  %5880 = vmatprep.subr.bf16.mxu1 %v8306_v42  ;;  %v9275_v42 = vld [vmem:[%s12739_s8 + $0x1e4] ss:$16 sps:$4 sm:$0xff]  }
0x5104   :  { %9845 = vrcp.f32 %v5443_v62  ;;  %v5687_v62 = vld [vmem:[%s12738_s6 + $0x28] sm:$0xff] }
0x5111   :  { %v9846_v15 = vpop.eup %9845 }
0x5112   :  { %v5450_v25 = vmul.f32 %v9846_v15, %v5448_v4  ;;  %v8297_v4 = vcombine.low %v5683_v29, %v5687_v62 }
0x5172   :  { %v5453_v31 = vpop.permute.xlu0 %5452 }
0x5173   :  { %v5455_v18 = vmul.f32 %v9846_v15, %v5453_v31  ;;  %v8295_v31 = vcombine.low %v5682_v45, %v5686_v7  ;;  %v9272_v45 = vld [vmem:[%s12739_s8 + $0x204] ss:$16 sps:$4 sm:$0xff]   ;;  %v9267_v7 = vld [vmem:[%s12739_s8] ss:$16 sps:$4 sm:$0xff]  }
0x5175   :  { %5457 = vrot.lane.b32.xlu1 %v5455_v18, %s9898_s29 }
0x51e7   :  { %v5458_v49 = vpop.permute.xlu1 %5457 }
0x51e8   :  { %v5460_v39 = vadd.f32 %v5458_v49, %v5450_v25  ;;  %v5692_v25 = vld [vmem:[%s12738_s6 + $0x50] sm:$0xff] }
0x51e9   :  { %v5696_v49 = vld [vmem:[%s12738_s6 + $0x70] sm:$0xff] }
0x51ea   :  { %9847 = vtanh.f32 %v5460_v39  ;;  %v5555_v14 = vrot.slane %v5460_v39, 6  ;;  %v5693_v39 = vld [vmem:[%s12738_s6 + $0x58] sm:$0xff] }
0x51f7   :  { %v9848_v16 = vpop.eup %9847 }
0x51f8   :  { %5463 = vrot.lane.b32.xlu0 %v9848_v16, %s9897_s5  ;;  %v8308_v16 = vcombine.high %v5692_v25, %v5696_v49 }
0x526a   :  { %v5464_v12 = vpop.permute.xlu0 %5463 }
0x526b   :  { %v5466_v34 = vmul.f32 %v9846_v15, %v5464_v12  ;;  %v8298_v15 = vcombine.high %v5683_v29, %v5687_v62  ;;  %v5697_v12 = vld [vmem:[%s12738_s6 + $0x78] sm:$0xff]  ;;  %v9273_v29 = vld [vmem:[%s12739_s8 + $0x1e0] ss:$16 sps:$4 sm:$0xff]  }
0x526c   :  { %v9276_v62 = vld [vmem:[%s12739_s8 + $0x3e0] ss:$16 sps:$4 sm:$0xff]  }
0x526d   :  { %v5468_v33 = vrot.slane %v5466_v34, 2  ;;  %v8307_v34 = vcombine.low %v5692_v25, %v5696_v49  ;;  %v9287_v25 = vld [vmem:[%s12739_s8 + $0x1a4] ss:$16 sps:$4 sm:$0xff]  }
0x526e   :  { %v9290_v49 = vld [vmem:[%s12739_s8 + $0x3a4] ss:$16 sps:$4 sm:$0xff]  }
0x526f   :  { %5469 = vrot.lane.b32.xlu1 %v5468_v33, %s9898_s29  ;;  %v8309_v33 = vcombine.low %v5693_v39, %v5697_v12 }
0x52e1   :  { %v5470_v37 = vpop.permute.xlu1 %5469 }
0x52e2   :  { %9116 = vmatmul.mubr.msk.f32.vlgmr.msra.gmra.mxu0 %vm2294_vm2, %v5470_v37  ;;  %v8310_v37 = vcombine.high %v5693_v39, %v5697_v12  ;;  %v9285_v39 = vld [vmem:[%s12739_s8 + $0x1a0] ss:$16 sps:$4 sm:$0xff]   ;;  %v9293_v12 = vld [vmem:[%s12739_s8 + $0x184] ss:$16 sps:$4 sm:$0xff]  }
0x52e3   :  { %5859 = vmatprep.mubr.bf16.mxu0 %v12868_v56 }
0x53a2   :  { %v5539_v47 = vpop.f32.mrf.mxu0 }
0x53a3   :  { %v5544_v8 = vrot.slane %v5539_v47, 4 }
0x53a4   :  { %v9117_v35 = vpop.f32.mrf.mxu0 }
0x53a5   :  { %v5546_v22 = vadd.f32 %v5544_v8, %v11292_v43 }
0x53a7   :  { %9849 = vtanh.f32 %v5546_v22  ;;  %v8292_v9 = vmul.f32 -1.442695, %v5546_v22 }
0x53a9   :  { %9851 = vpow2.f32 %v8292_v9  ;;  %v5688_v9 = vld [vmem:[%s12738_s6 + $0x30] sm:$0xff] }
0x53b4   :  { %v9850_v1 = vpop.eup %9849 }
0x53b5   :  { %5559 = vrot.lane.b32.xlu0 %v9850_v1, %s9897_s5  ;;  %v5684_v1 = vld [vmem:[%s12738_s6 + $0x10] sm:$0xff] }
0x53b6   :  { %v9852_v54 = vpop.eup %9851 }
0x53b7   :  { %v5550_v38 = vadd.f32 1.0, %v9852_v54  ;;  %v5685_v54 = vld [vmem:[%s12738_s6 + $0x18] sm:$0xff] }
0x53b9   :  { %9853 = vrcp.f32 %v5550_v38  ;;  %v5689_v38 = vld [vmem:[%s12738_s6 + $0x38] sm:$0xff] }
0x53c6   :  { %v9854_v60 = vpop.eup %9853 }
0x53c7   :  { %v5557_v5 = vmul.f32 %v9854_v60, %v5555_v14  ;;  %v8299_v14 = vcombine.low %v5684_v1, %v5688_v9 }
0x5427   :  { %v5560_v57 = vpop.permute.xlu0 %5559 }
0x5428   :  { %v5562_v41 = vmul.f32 %v9854_v60, %v5560_v57  ;;  %v8302_v57 = vcombine.high %v5685_v54, %v5689_v38 }
0x542a   :  { %5564 = vrot.lane.b32.xlu1 %v5562_v41, %s9898_s29 }
0x549c   :  { %v5565_v44 = vpop.permute.xlu1 %5564 }
0x549d   :  { %v5567_v55 = vadd.f32 %v5565_v44, %v5557_v5  ;;  %v8301_v5 = vcombine.low %v5685_v54, %v5689_v38  ;;  %v9227_v44 = vld [vmem:[%s12739_s8 + $0xe4] ss:$16 sps:$4 sm:$0xff]   ;;  %v9303_v54 = vld [vmem:[%s12739_s8 + $0x140] ss:$16 sps:$4 sm:$0xff]  }
0x549e   :  { %v9306_v38 = vld [vmem:[%s12739_s8 + $0x340] ss:$16 sps:$4 sm:$0xff]  }
0x549f   :  { %9855 = vtanh.f32 %v5567_v55  ;;  %v5662_v0 = vrot.slane %v5567_v55, 6  ;;  %v9230_v55 = vld [vmem:[%s12739_s8 + $0x2e4] ss:$16 sps:$4 sm:$0xff]  }
0x54ac   :  { %v9856_v19 = vpop.eup %9855 }
0x54ad   :  { %5570 = vrot.lane.b32.xlu0 %v9856_v19, %s9897_s5  ;;  %v9225_v19 = vld [vmem:[%s12739_s8 + $0xe0] ss:$16 sps:$4 sm:$0xff]  }
0x551f   :  { %v5571_v50 = vpop.permute.xlu0 %5570 }
0x5520   :  { %v5573_v11 = vmul.f32 %v9854_v60, %v5571_v50  ;;  %v8300_v60 = vcombine.high %v5684_v1, %v5688_v9  ;;  %v9228_v50 = vld [vmem:[%s12739_s8 + $0x2e0] ss:$16 sps:$4 sm:$0xff]   ;;  %v9305_v1 = vld [vmem:[%s12739_s8 + $0x144] ss:$16 sps:$4 sm:$0xff]  }
0x5521   :  { %v9308_v9 = vld [vmem:[%s12739_s8 + $0x344] ss:$16 sps:$4 sm:$0xff]  }
0x5522   :  { %v5575_v40 = vrot.slane %v5573_v11, 4  ;;  %v9233_v11 = vld [vmem:[%s12739_s8 + $0xc4] ss:$16 sps:$4 sm:$0xff]  }
0x5524   :  { %5576 = vrot.lane.b32.xlu1 %v5575_v40, %s9898_s29  ;;  %v9231_v40 = vld [vmem:[%s12739_s8 + $0xc0] ss:$16 sps:$4 sm:$0xff]  }
0x5596   :  { %v5577_v63 = vpop.permute.xlu1 %5576 }
0x5597   :  { %9127 = vmatmul.mubr.msk.f32.vlgmr.msra.gmra.mxu1 %vm2294_vm2, %v5577_v63  ;;  %v9234_v63 = vld [vmem:[%s12739_s8 + $0x2c0] ss:$16 sps:$4 sm:$0xff]  }
0x5598   :  { %5900 = vmatprep.mubr.bf16.mxu1 %v12868_v56  ;;  %5881 = vmatpush1.bf16.msra.mxu1 %v8305_v13  ;;  %v9270_v13 = vld [vmem:[%s12739_s8 + $0x200] ss:$16 sps:$4 sm:$0xff]  }
0x5599   :  { %5882 = vmatprep.subr.bf16.mxu1 %v8298_v15  ;;  %v9281_v15 = vld [vmem:[%s12739_s8 + $0x1c4] ss:$16 sps:$4 sm:$0xff]  }
0x559c   :  { %5883 = vmatpush1.bf16.msra.mxu1 %v8297_v4  ;;  %v9282_v4 = vld [vmem:[%s12739_s8 + $0x3c0] ss:$16 sps:$4 sm:$0xff]  }
0x559d   :  { %5962 = vmatprep.subr.bf16.mxu1 %v8310_v37  ;;  %v9294_v37 = vld [vmem:[%s12739_s8 + $0x380] ss:$16 sps:$4 sm:$0xff]  }
0x5657   :  { %v5646_v48 = vpop.f32.mrf.mxu1 }
0x5658   :  { %v5651_v59 = vrot.slane %v5646_v48, 2  ;;  %v9239_v48 = vld [vmem:[%s12739_s8 + $0xa4] ss:$16 sps:$4 sm:$0xff]  }
0x5659   :  { %v9128_v58 = vpop.f32.mrf.mxu1 }
0x565a   :  { %v5653_v53 = vadd.f32 %v5651_v59, %v11292_v43  ;;  %v5690_v43 = vld [vmem:[%s12738_s6 + $0x40] sm:$0xff] }
0x565b   :  { %v8303_v23 = vcombine.low %v5690_v43, %v5694_v10  ;;  %v8304_v28 = vcombine.high %v5690_v43, %v5694_v10  ;;  %v9242_v59 = vld [vmem:[%s12739_s8 + $0x2a4] ss:$16 sps:$4 sm:$0xff]   ;;  %v9237_v58 = vld [vmem:[%s12739_s8 + $0xa0] ss:$16 sps:$4 sm:$0xff]  }
0x565c   :  { %9857 = vtanh.f32 %v5653_v53  ;;  %v8294_v61 = vmul.f32 -1.442695, %v5653_v53  ;;  %v9240_v53 = vld [vmem:[%s12739_s8 + $0x2a0] ss:$16 sps:$4 sm:$0xff]   ;;  %v9263_v10 = vld [vmem:[%s12739_s8 + $0x24] ss:$16 sps:$4 sm:$0xff]  }
0x565d   :  { %5839 = vmatprep.subr.bf16.mxu0 %v8304_v28  ;;  %v9258_v43 = vld [vmem:[%s12739_s8 + $0x240] ss:$16 sps:$4 sm:$0xff]  }
0x565e   :  { %9859 = vpow2.f32 %v8294_v61  ;;  %5840 = vmatpush1.bf16.msra.mxu0 %v8303_v23  ;;  %v9248_v61 = vld [vmem:[%s12739_s8 + $0x284] ss:$16 sps:$4 sm:$0xff]   ;;  %v9261_v23 = vld [vmem:[%s12739_s8 + $0x20] ss:$16 sps:$4 sm:$0xff]  }
0x565f   :  { %5841 = vmatprep.subr.bf16.mxu0 %v8296_v17  ;;  %v9264_v28 = vld [vmem:[%s12739_s8 + $0x220] ss:$16 sps:$4 sm:$0xff]   ;;  %v9278_v17 = vld [vmem:[%s12739_s8 + $0x3e4] ss:$16 sps:$4 sm:$0xff]  }
0x5662   :  { %5842 = vmatpush1.bf16.msra.mxu0 %v8295_v31  ;;  %v9284_v31 = vld [vmem:[%s12739_s8 + $0x3c4] ss:$16 sps:$4 sm:$0xff]  }
0x5663   :  { %5921 = vmatprep.subr.bf16.mxu0 %v8308_v16  ;;  %v9288_v16 = vld [vmem:[%s12739_s8 + $0x3a0] ss:$16 sps:$4 sm:$0xff]  }
0x5669   :  { %v9858_v32 = vpop.eup %9857 }
0x566a   :  { %5666 = vrot.lane.b32.xlu0 %v9858_v32, %s9897_s5  ;;  %v9245_v32 = vld [vmem:[%s12739_s8 + $0x84] ss:$16 sps:$4 sm:$0xff]  }
0x566b   :  { %v9860_v20 = vpop.eup %9859 }
0x566c   :  { %v5657_v3 = vadd.f32 1.0, %v9860_v20  ;;  %v9243_v20 = vld [vmem:[%s12739_s8 + $0x80] ss:$16 sps:$4 sm:$0xff]  }
0x566e   :  { %9861 = vrcp.f32 %v5657_v3  ;;  %v9246_v3 = vld [vmem:[%s12739_s8 + $0x280] ss:$16 sps:$4 sm:$0xff]  }
0x567b   :  { %v9862_v52 = vpop.eup %9861 }
0x567c   :  { %v5664_v30 = vmul.f32 %v9862_v52, %v5662_v0  ;;  %v9252_v0 = vld [vmem:[%s12739_s8 + $0x260] ss:$16 sps:$4 sm:$0xff]  }
0x56dc   :  { %v5667_v27 = vpop.permute.xlu0 %5666 }
0x56dd   :  { %v5669_v21 = vmul.f32 %v9862_v52, %v5667_v27  ;;  %v9254_v27 = vld [vmem:[%s12739_s8 + $0x264] ss:$16 sps:$4 sm:$0xff]  }
0x56df   :  { %5671 = vrot.lane.b32.xlu1 %v5669_v21, %s9898_s29  ;;  %v9249_v21 = vld [vmem:[%s12739_s8 + $0x60] ss:$16 sps:$4 sm:$0xff]  }
0x5751   :  { %v5672_v36 = vpop.permute.xlu1 %5671 }
0x5752   :  { %v5674_v46 = vadd.f32 %v5672_v36, %v5664_v30  ;;  %v9257_v30 = vld [vmem:[%s12739_s8 + $0x44] ss:$16 sps:$4 sm:$0xff]  }
0x5753   :  { %v9260_v36 = vld [vmem:[%s12739_s8 + $0x244] ss:$16 sps:$4 sm:$0xff]  }
0x5754   :  { %9863 = vtanh.f32 %v5674_v46  ;;  %v9255_v46 = vld [vmem:[%s12739_s8 + $0x40] ss:$16 sps:$4 sm:$0xff]  }
0x5761   :  { %v9864_v18 = vpop.eup %9863 }
0x5762   :  { %5677 = vrot.lane.b32.xlu0 %v9864_v18, %s9897_s5  ;;  %v9279_v18 = vld [vmem:[%s12739_s8 + $0x1c0] ss:$16 sps:$4 sm:$0xff]  }
0x57d4   :  { %v5678_v47 = vpop.permute.xlu0 %5677 }
0x57d5   :  { %v5680_v8 = vmul.f32 %v9862_v52, %v5678_v47  ;;  %v9251_v52 = vld [vmem:[%s12739_s8 + $0x64] ss:$16 sps:$4 sm:$0xff]  }
0x57d6   :  { %v9299_v47 = vld [vmem:[%s12739_s8 + $0x164] ss:$16 sps:$4 sm:$0xff]  }
0x57d7   :  { %v5681_v35 = vpack.c.bf16 %v5680_v8, %v5680_v8  ;;  %v9302_v8 = vld [vmem:[%s12739_s8 + $0x364] ss:$16 sps:$4 sm:$0xff]  }
0x57d9   :  { %v5741_v22 = vrot.slane %v5681_v35, 3  ;;  %v9297_v35 = vld [vmem:[%s12739_s8 + $0x160] ss:$16 sps:$4 sm:$0xff]  }
0x57db   :  { %5742 = vrot.lane.b32.xlu1 %v5741_v22, %s9898_s29  ;;  %v9300_v22 = vld [vmem:[%s12739_s8 + $0x360] ss:$16 sps:$4 sm:$0xff]  }
0x584d   :  { %v5743_v41 = vpop.permute.xlu1 %5742 }
0x584e   :  { %8311 = vmatmul.mubr.msk.bf16.vlgmr.msra.gmra.mxu0 %vm2294_vm2, %v5743_v41  ;;  %8312 = vmatmul.mubr.msk.bf16.vlgmr.msra.gmra.mxu1 %vm2294_vm2, %v5743_v41 }
0x584f   :  { %5922 = vmatpush1.bf16.msra.mxu0 %v8307_v34  ;;  %5963 = vmatpush1.bf16.msra.mxu1 %v8309_v33  ;;  %v9296_v34 = vld [vmem:[%s12739_s8 + $0x384] ss:$16 sps:$4 sm:$0xff]   ;;  %v9291_v33 = vld [vmem:[%s12739_s8 + $0x180] ss:$16 sps:$4 sm:$0xff]  }
0x5850   :  { %5923 = vmatprep.subr.bf16.mxu0 %v8300_v60  ;;  %5964 = vmatprep.subr.bf16.mxu1 %v8302_v57  ;;  %v9311_v60 = vld [vmem:[%s12739_s8 + $0x124] ss:$16 sps:$4 sm:$0xff]  }
0x5851   :  { %5941 = vmatprep.mubr.bf16.mxu0 %v12868_v56  ;;  %5982 = vmatprep.mubr.bf16.mxu1 %v12868_v56  ;;  %v9236_v56 = vld [vmem:[%s12739_s8 + $0x2c4] ss:$16 sps:$4 sm:$0xff]  }
0x5852   :  { %v9314_v57 = vld [vmem:[%s12739_s8 + $0x324] ss:$16 sps:$4 sm:$0xff]  }
0x5853   :  { %5924 = vmatpush1.bf16.msra.mxu0 %v8299_v14  ;;  %5965 = vmatpush1.bf16.msra.mxu1 %v8301_v5  ;;  %v9312_v14 = vld [vmem:[%s12739_s8 + $0x320] ss:$16 sps:$4 sm:$0xff]   ;;  %v9317_v5 = vld [vmem:[%s12739_s8 + $0x104] ss:$16 sps:$4 sm:$0xff]  }
0x5854   :  { %7565 = vmatprep.subr.bf16.mxu0 %v9227_v44  ;;  %7606 = vmatprep.subr.bf16.mxu1 %v9230_v55  ;;  %v9320_v44 = vld [vmem:[%s12739_s8 + $0x304] ss:$16 sps:$4 sm:$0xff]   ;;  %v9315_v55 = vld [vmem:[%s12739_s8 + $0x100] ss:$16 sps:$4 sm:$0xff]  }
0x5856   :  { %8313 = vmatmul.mubr.msk.bf16.vlgmr.msra.gmra.mxu0 %vm2294_vm2, %v5743_v41  ;;  %8314 = vmatmul.mubr.msk.bf16.vlgmr.msra.gmra.mxu1 %vm2294_vm2, %v5743_v41  ;;  %v9309_v41 = vld [vmem:[%s12739_s8 + $0x120] ss:$16 sps:$4 sm:$0xff]  }
0x5857   :  { %7566 = vmatpush1.bf16.msra.mxu0 %v9225_v19  ;;  %7607 = vmatpush1.bf16.msra.mxu1 %v9228_v50  ;;  %v9318_v19 = vld [vmem:[%s12739_s8 + $0x300] ss:$16 sps:$4 sm:$0xff]   ;;  %v9323_v50 = vld [vmem:[%s12739_s8 + $0x4e4] ss:$16 sps:$4 sm:$0xff]  }
0x5858   :  { %7567 = vmatprep.subr.bf16.mxu0 %v9233_v11  ;;  %7608 = vmatprep.subr.bf16.mxu1 %v9236_v56  ;;  %v9326_v11 = vld [vmem:[%s12739_s8 + $0x6e4] ss:$16 sps:$4 sm:$0xff]   ;;  %v12068_v56 = vsub.s32 2, %v11133_v6 }
0x585b   :  { %7568 = vmatpush1.bf16.msra.mxu0 %v9231_v40  ;;  %7609 = vmatpush1.bf16.msra.mxu1 %v9234_v63  ;;  %v12073_v40 = vld [vmem:[%s12740_s7] sm:$0xff]  ;;  %v12076_v63 = vsub.s32 3, %v11133_v6 }
0x585c   :  { %7569 = vmatprep.subr.bf16.mxu0 %v9239_v48  ;;  %7610 = vmatprep.subr.bf16.mxu1 %v9242_v59  ;;  %v5703_v48 = vrot.slane %v12073_v40, %v11153_v24  ;;  %v5711_v59 = vrot.slane %v12073_v40, %v12068_v56 }
0x585f   :  { %7570 = vmatpush1.bf16.msra.mxu0 %v9237_v58  ;;  %7611 = vmatpush1.bf16.msra.mxu1 %v9240_v53  ;;  %v5707_v58 = vrot.slane %v12073_v40, %v11156_v51  ;;  %v5715_v53 = vrot.slane %v12073_v40, %v12076_v63 }
0x5860   :  { %7571 = vmatprep.subr.bf16.mxu0 %v9245_v32  ;;  %7612 = vmatprep.subr.bf16.mxu1 %v9248_v61 }
0x5863   :  { %7572 = vmatpush1.bf16.msra.mxu0 %v9243_v20  ;;  %7613 = vmatpush1.bf16.msra.mxu1 %v9246_v3 }
0x5864   :  { %7573 = vmatprep.subr.bf16.mxu0 %v9251_v52  ;;  %7614 = vmatprep.subr.bf16.mxu1 %v9254_v27 }
0x5867   :  { %7574 = vmatpush1.bf16.msra.mxu0 %v9249_v21  ;;  %7615 = vmatpush1.bf16.msra.mxu1 %v9252_v0 }
0x5868   :  { %7575 = vmatprep.subr.bf16.mxu0 %v9257_v30  ;;  %7616 = vmatprep.subr.bf16.mxu1 %v9260_v36  ;;  %v5722_v30 = vsub.s32 5, %v11133_v6  ;;  %v5730_v36 = vsub.s32 7, %v11133_v6 }
0x586b   :  { %7576 = vmatpush1.bf16.msra.mxu0 %v9255_v46  ;;  %7617 = vmatpush1.bf16.msra.mxu1 %v9258_v43 }
0x586c   :  { %7577 = vmatprep.subr.bf16.mxu0 %v9263_v10  ;;  %7618 = vmatprep.subr.bf16.mxu1 %v9266_v2 }
0x586f   :  { %7578 = vmatpush1.bf16.msra.mxu0 %v9261_v23  ;;  %7619 = vmatpush1.bf16.msra.mxu1 %v9264_v28 }
0x5870   :  { %7579 = vmatprep.subr.bf16.mxu0 %v9269_v26  ;;  %7620 = vmatprep.subr.bf16.mxu1 %v9272_v45 }
0x5873   :  { %7580 = vmatpush1.bf16.msra.mxu0 %v9267_v7  ;;  %7621 = vmatpush1.bf16.msra.mxu1 %v9270_v13 }
0x5874   :  { %7581 = vmatprep.subr.bf16.mxu0 %v9275_v42  ;;  %7622 = vmatprep.subr.bf16.mxu1 %v9278_v17  ;;  %v9321_v42 = vld [vmem:[%s12739_s8 + $0x4e0] ss:$16 sps:$4 sm:$0xff]  }
0x5875   :  { %v9324_v17 = vld [vmem:[%s12739_s8 + $0x6e0] ss:$16 sps:$4 sm:$0xff]  }
0x5877   :  { %7582 = vmatpush2.bf16.msra.mxu0 %v9273_v29  ;;  %7623 = vmatpush2.bf16.msra.mxu1 %v9276_v62  ;;  %v5723_v29 = vrot.slane %v12073_v40, %v5722_v30  ;;  %v5731_v62 = vrot.slane %v12073_v40, %v5730_v36  ;;  %v9363_v30 = vld [vmem:[%s12739_s8 + $0x400] ss:$16 sps:$4 sm:$0xff]  }
0x5878   :  { %7583 = vmatprep.subr.bf16.mxu0 %v9281_v15  ;;  %7624 = vmatprep.subr.bf16.mxu1 %v9284_v31  ;;  %v9366_v36 = vld [vmem:[%s12739_s8 + $0x600] ss:$16 sps:$4 sm:$0xff]  }
0x587b   :  { %7584 = vmatpush2.bf16.msra.mxu0 %v9279_v18  ;;  %7625 = vmatpush2.bf16.msra.mxu1 %v9282_v4 }
0x587c   :  { %7585 = vmatprep.subr.bf16.mxu0 %v9287_v25  ;;  %7626 = vmatprep.subr.bf16.mxu1 %v9290_v49  ;;  %v9329_v25 = vld [vmem:[%s12739_s8 + $0x4c4] ss:$16 sps:$4 sm:$0xff]  }
0x587d   :  { %v9332_v49 = vld [vmem:[%s12739_s8 + $0x6c4] ss:$16 sps:$4 sm:$0xff]  }
0x587f   :  { %7586 = vmatpush2.bf16.msra.mxu0 %v9285_v39  ;;  %7627 = vmatpush2.bf16.msra.mxu1 %v9288_v16 }
0x5880   :  { %7587 = vmatprep.subr.bf16.mxu0 %v9293_v12  ;;  %7628 = vmatprep.subr.bf16.mxu1 %v9296_v34 }
0x5883   :  { %7588 = vmatpush2.bf16.msra.mxu0 %v9291_v33  ;;  %7629 = vmatpush2.bf16.msra.mxu1 %v9294_v37  ;;  %v9327_v33 = vld [vmem:[%s12739_s8 + $0x4c0] ss:$16 sps:$4 sm:$0xff]  }
0x5884   :  { %7589 = vmatprep.subr.bf16.mxu0 %v9299_v47  ;;  %7630 = vmatprep.subr.bf16.mxu1 %v9302_v8  ;;  %v9330_v37 = vld [vmem:[%s12739_s8 + $0x6c0] ss:$16 sps:$4 sm:$0xff]  }
0x5887   :  { %7590 = vmatpush2.bf16.msra.mxu0 %v9297_v35  ;;  %7631 = vmatpush2.bf16.msra.mxu1 %v9300_v22  ;;  %v9335_v35 = vld [vmem:[%s12739_s8 + $0x4a4] ss:$16 sps:$4 sm:$0xff]  }
0x5888   :  { %7591 = vmatprep.subr.bf16.mxu0 %v9305_v1  ;;  %7632 = vmatprep.subr.bf16.mxu1 %v9308_v9  ;;  %v9338_v22 = vld [vmem:[%s12739_s8 + $0x6a4] ss:$16 sps:$4 sm:$0xff]  }
0x588b   :  { %7592 = vmatpush2.bf16.msra.mxu0 %v9303_v54  ;;  %7633 = vmatpush2.bf16.msra.mxu1 %v9306_v38 }
0x588c   :  { %7593 = vmatprep.subr.bf16.mxu0 %v9311_v60  ;;  %7634 = vmatprep.subr.bf16.mxu1 %v9314_v57 }
0x588f   :  { %7594 = vmatpush2.bf16.msra.mxu0 %v9309_v41  ;;  %7635 = vmatpush2.bf16.msra.mxu1 %v9312_v14  ;;  %v9333_v41 = vld [vmem:[%s12739_s8 + $0x4a0] ss:$16 sps:$4 sm:$0xff]  }
0x5890   :  { %7595 = vmatprep.subr.bf16.mxu0 %v9317_v5  ;;  %7636 = vmatprep.subr.bf16.mxu1 %v9320_v44  ;;  %v9336_v14 = vld [vmem:[%s12739_s8 + $0x6a0] ss:$16 sps:$4 sm:$0xff]   ;;  %v9341_v5 = vld [vmem:[%s12739_s8 + $0x484] ss:$16 sps:$4 sm:$0xff]  }
0x5891   :  { %v9344_v44 = vld [vmem:[%s12739_s8 + $0x684] ss:$16 sps:$4 sm:$0xff]  }
0x5893   :  { %7596 = vmatpush2.bf16.msra.mxu0 %v9315_v55  ;;  %7637 = vmatpush2.bf16.msra.mxu1 %v9318_v19  ;;  %v9339_v55 = vld [vmem:[%s12739_s8 + $0x480] ss:$16 sps:$4 sm:$0xff]  }
0x5894   :  { %7647 = vmatprep.subr.bf16.mxu0 %v9323_v50  ;;  %7688 = vmatprep.subr.bf16.mxu1 %v9326_v11  ;;  %v9342_v19 = vld [vmem:[%s12739_s8 + $0x680] ss:$16 sps:$4 sm:$0xff]   ;;  %v9347_v50 = vld [vmem:[%s12739_s8 + $0x464] ss:$16 sps:$4 sm:$0xff]  }
0x5895   :  { %v9350_v11 = vld [vmem:[%s12739_s8 + $0x664] ss:$16 sps:$4 sm:$0xff]  }
0x590e   :  { %v5861_v32 = vpop.f32.mrf.mxu0  ;;  %v5902_v61 = vpop.f32.mrf.mxu1 }
0x590f   :  { %v5862_v20 = vadd.f32 %v5861_v32, %v5703_v48  ;;  %v5903_v3 = vadd.f32 %v5902_v61, %v5711_v59  ;;  %v9345_v48 = vld [vmem:[%s12739_s8 + $0x460] ss:$16 sps:$4 sm:$0xff]  }
0x5910   :  { %v5863_v52 = vpop.f32.mrf.mxu0  ;;  %v5904_v27 = vpop.f32.mrf.mxu1  ;;  %v9348_v59 = vld [vmem:[%s12739_s8 + $0x660] ss:$16 sps:$4 sm:$0xff]  }
0x5911   :  { %v5864_v21 = vadd.f32 %v5863_v52, %v5707_v58  ;;  %v5905_v0 = vadd.f32 %v5904_v27, %v5715_v53  ;;  %v5991_v46 = vmax.f32 %v5862_v20, 0.0  ;;  %v5993_v43 = vmax.f32 %v5903_v3, 0.0  ;;  %v9353_v58 = vld [vmem:[%s12739_s8 + $0x444] ss:$16 sps:$4 sm:$0xff]   ;;  %v9351_v32 = vld [vmem:[%s12739_s8 + $0x440] ss:$16 sps:$4 sm:$0xff]  }
0x5912   :  { %v5865_v10 = vpop.f32.mrf.mxu0  ;;  %v5906_v2 = vpop.f32.mrf.mxu1  ;;  %v9356_v53 = vld [vmem:[%s12739_s8 + $0x644] ss:$16 sps:$4 sm:$0xff]   ;;  %v9354_v61 = vld [vmem:[%s12739_s8 + $0x640] ss:$16 sps:$4 sm:$0xff]  }
0x5913   :  { %v5992_v23 = vmax.f32 %v5864_v21, 0.0  ;;  %v5994_v28 = vmax.f32 %v5905_v0, 0.0  ;;  %v12100_v15 = vpack.c.bf16 %v5991_v46, %v5991_v46  ;;  %v12102_v31 = vpack.c.bf16 %v5993_v43, %v5993_v43  ;;  %v9359_v20 = vld [vmem:[%s12739_s8 + $0x424] ss:$16 sps:$4 sm:$0xff]   ;;  %v9357_v52 = vld [vmem:[%s12739_s8 + $0x420] ss:$16 sps:$4 sm:$0xff]  }
0x5914   :  { %v5866_v26 = vpop.f32.mrf.mxu0  ;;  %v5907_v45 = vpop.f32.mrf.mxu1  ;;  %v9362_v3 = vld [vmem:[%s12739_s8 + $0x624] ss:$16 sps:$4 sm:$0xff]   ;;  %v9360_v27 = vld [vmem:[%s12739_s8 + $0x620] ss:$16 sps:$4 sm:$0xff]  }
0x5915   :  { %v12088_v7 = vpack.c.bf16 %v5992_v23, %v5992_v23  ;;  %v12090_v13 = vpack.c.bf16 %v5994_v28, %v5994_v28  ;;  %v9365_v21 = vld [vmem:[%s12739_s8 + $0x404] ss:$16 sps:$4 sm:$0xff]   ;;  %v9369_v10 = vld [vmem:[%s12739_s8 + $0x5e0] ss:$16 sps:$4 sm:$0xff]  }
0x5916   :  { %v12104_v18 = vpop.f32.mrf.mxu0  ;;  %v12106_v4 = vpop.f32.mrf.mxu1  ;;  %v9368_v0 = vld [vmem:[%s12739_s8 + $0x604] ss:$16 sps:$4 sm:$0xff]   ;;  %v9372_v2 = vld [vmem:[%s12739_s8 + $0x7e0] ss:$16 sps:$4 sm:$0xff]  }
0x5917   :  { %7597 = vmatprep.mubr.bf16.mxu0 %v12088_v7  ;;  %7638 = vmatprep.mubr.bf16.mxu1 %v12090_v13  ;;  %v9371_v46 = vld [vmem:[%s12739_s8 + $0x5e4] ss:$16 sps:$4 sm:$0xff]   ;;  %v9375_v26 = vld [vmem:[%s12739_s8 + $0x5c0] ss:$16 sps:$4 sm:$0xff]  }
0x5918   :  { %v5945_v39 = vpop.f32.mrf.mxu0  ;;  %v5986_v16 = vpop.f32.mrf.mxu1  ;;  %7598 = vmatmul.mubr.bf16.vlgmr.msra.gmra.mxu0 %v12100_v15  ;;  %7639 = vmatmul.mubr.bf16.vlgmr.msra.gmra.mxu1 %v12102_v31  ;;  %v9374_v43 = vld [vmem:[%s12739_s8 + $0x7e4] ss:$16 sps:$4 sm:$0xff]   ;;  %v9378_v45 = vld [vmem:[%s12739_s8 + $0x7c0] ss:$16 sps:$4 sm:$0xff]  }
0x5919   :  { %v5946_v12 = vadd.f32 %v5945_v39, %v5723_v29  ;;  %v5987_v34 = vadd.f32 %v5986_v16, %v5731_v62  ;;  %7648 = vmatpush1.bf16.msra.mxu0 %v9321_v42  ;;  %7689 = vmatpush1.bf16.msra.mxu1 %v9324_v17  ;;  %v9377_v23 = vld [vmem:[%s12739_s8 + $0x5c4] ss:$16 sps:$4 sm:$0xff]   ;;  %v9381_v29 = vld [vmem:[%s12739_s8 + $0x5a0] ss:$16 sps:$4 sm:$0xff]  }
0x591a   :  { %v5947_v47 = vpop.f32.mrf.mxu0  ;;  %v5988_v8 = vpop.f32.mrf.mxu1  ;;  %7649 = vmatprep.subr.bf16.mxu0 %v9329_v25  ;;  %7690 = vmatprep.subr.bf16.mxu1 %v9332_v49  ;;  %v9380_v28 = vld [vmem:[%s12739_s8 + $0x7c4] ss:$16 sps:$4 sm:$0xff]   ;;  %v9384_v62 = vld [vmem:[%s12739_s8 + $0x7a0] ss:$16 sps:$4 sm:$0xff]  }
0x591b   :  { %v5996_v1 = vmax.f32 %v5946_v12, 0.0  ;;  %v5998_v9 = vmax.f32 %v5987_v34, 0.0  ;;  %v9383_v42 = vld [vmem:[%s12739_s8 + $0x5a4] ss:$16 sps:$4 sm:$0xff]   ;;  %v9387_v39 = vld [vmem:[%s12739_s8 + $0x580] ss:$16 sps:$4 sm:$0xff]  }
0x591c   :  { %v5948_v54 = vpop.f32.mrf.mxu0  ;;  %v5989_v38 = vpop.f32.mrf.mxu1  ;;  %v9386_v17 = vld [vmem:[%s12739_s8 + $0x7a4] ss:$16 sps:$4 sm:$0xff]   ;;  %v9390_v16 = vld [vmem:[%s12739_s8 + $0x780] ss:$16 sps:$4 sm:$0xff]   ;;  %v5718_v47 = vsub.s32 4, %v11133_v6  ;;  %v5726_v8 = vsub.s32 6, %v11133_v6 }
0x591d   :  { %v12130_v60 = vpack.c.bf16 %v5996_v1, %v5996_v1  ;;  %v12132_v57 = vpack.c.bf16 %v5998_v9, %v5998_v9  ;;  %7650 = vmatpush1.bf16.msra.mxu0 %v9327_v33  ;;  %7691 = vmatpush1.bf16.msra.mxu1 %v9330_v37  ;;  %v9389_v25 = vld [vmem:[%s12739_s8 + $0x584] ss:$16 sps:$4 sm:$0xff]   ;;  %v9393_v33 = vld [vmem:[%s12739_s8 + $0x560] ss:$16 sps:$4 sm:$0xff]  }
0x591e   :  { %7651 = vmatprep.subr.bf16.mxu0 %v9335_v35  ;;  %7692 = vmatprep.subr.bf16.mxu1 %v9338_v22  ;;  %v9392_v49 = vld [vmem:[%s12739_s8 + $0x784] ss:$16 sps:$4 sm:$0xff]   ;;  %v9396_v37 = vld [vmem:[%s12739_s8 + $0x760] ss:$16 sps:$4 sm:$0xff]   ;;  %v5719_v9 = vrot.slane %v12073_v40, %v5718_v47  ;;  %v5727_v54 = vrot.slane %v12073_v40, %v5726_v8  ;;  %v9465_v47 = vld [vmem:[%s12739_s8 + $0x1e8] ss:$16 sps:$4 sm:$0xff]  }
0x591f   :  { %7679 = vmatprep.mubr.bf16.mxu0 %v12130_v60  ;;  %7720 = vmatprep.mubr.bf16.mxu1 %v12132_v57  ;;  %v9395_v12 = vld [vmem:[%s12739_s8 + $0x564] ss:$16 sps:$4 sm:$0xff]   ;;  %v9399_v1 = vld [vmem:[%s12739_s8 + $0x540] ss:$16 sps:$4 sm:$0xff]   ;;  %v9468_v8 = vld [vmem:[%s12739_s8 + $0x3e8] ss:$16 sps:$4 sm:$0xff]  }
0x5920   :  { %v9398_v34 = vld [vmem:[%s12739_s8 + $0x764] ss:$16 sps:$4 sm:$0xff]   ;;  %v9402_v6 = vld [vmem:[%s12739_s8 + $0x740] ss:$16 sps:$4 sm:$0xff]  }
0x5921   :  { %7652 = vmatpush1.bf16.msra.mxu0 %v9333_v41  ;;  %7693 = vmatpush1.bf16.msra.mxu1 %v9336_v14  ;;  %v9401_v35 = vld [vmem:[%s12739_s8 + $0x544] ss:$16 sps:$4 sm:$0xff]   ;;  %v9405_v14 = vld [vmem:[%s12739_s8 + $0x520] ss:$16 sps:$4 sm:$0xff]  }
0x5922   :  { %7653 = vmatprep.subr.bf16.mxu0 %v9341_v5  ;;  %7694 = vmatprep.subr.bf16.mxu1 %v9344_v44  ;;  %v9404_v22 = vld [vmem:[%s12739_s8 + $0x744] ss:$16 sps:$4 sm:$0xff]   ;;  %v9408_v40 = vld [vmem:[%s12739_s8 + $0x720] ss:$16 sps:$4 sm:$0xff]   ;;  %v5944_v5 = vadd.f32 %v12104_v18, %v5719_v9  ;;  %v5985_v44 = vadd.f32 %v12106_v4, %v5727_v54  ;;  %v9479_v9 = vld [vmem:[%s12739_s8 + $0x1ac] ss:$16 sps:$4 sm:$0xff]  }
0x5923   :  { %v9407_v38 = vld [vmem:[%s12739_s8 + $0x524] ss:$16 sps:$4 sm:$0xff]   ;;  %v9414_v18 = vld [vmem:[%s12739_s8 + $0x700] ss:$16 sps:$4 sm:$0xff]   ;;  %v9482_v54 = vld [vmem:[%s12739_s8 + $0x3ac] ss:$16 sps:$4 sm:$0xff]  }
0x5924   :  { %v9410_v41 = vld [vmem:[%s12739_s8 + $0x724] ss:$16 sps:$4 sm:$0xff]   ;;  %v5995_v4 = vmax.f32 %v5944_v5, 0.0  ;;  %v9483_v5 = vld [vmem:[%s12739_s8 + $0x188] ss:$16 sps:$4 sm:$0xff]  }
0x5925   :  { %7654 = vmatpush1.bf16.msra.mxu0 %v9339_v55  ;;  %7695 = vmatpush1.bf16.msra.mxu1 %v9342_v19  ;;  %v9413_v55 = vld [vmem:[%s12739_s8 + $0x504] ss:$16 sps:$4 sm:$0xff]  }
0x5926   :  { %7655 = vmatprep.subr.bf16.mxu0 %v9347_v50  ;;  %7696 = vmatprep.subr.bf16.mxu1 %v9350_v11  ;;  %v9416_v19 = vld [vmem:[%s12739_s8 + $0x704] ss:$16 sps:$4 sm:$0xff]   ;;  %v9411_v50 = vld [vmem:[%s12739_s8 + $0x500] ss:$16 sps:$4 sm:$0xff]   ;;  %v5997_v11 = vmax.f32 %v5985_v44, 0.0 }
0x5927   :  { %v9486_v44 = vld [vmem:[%s12739_s8 + $0x388] ss:$16 sps:$4 sm:$0xff]  }
0x5929   :  { %7656 = vmatpush1.bf16.msra.mxu0 %v9345_v48  ;;  %7697 = vmatpush1.bf16.msra.mxu1 %v9348_v59  ;;  %v9419_v48 = vld [vmem:[%s12739_s8 + $0xec] ss:$16 sps:$4 sm:$0xff]  }
0x592a   :  { %7657 = vmatprep.subr.bf16.mxu0 %v9353_v58  ;;  %7698 = vmatprep.subr.bf16.mxu1 %v9356_v53  ;;  %v9422_v59 = vld [vmem:[%s12739_s8 + $0x2ec] ss:$16 sps:$4 sm:$0xff]   ;;  %v9417_v58 = vld [vmem:[%s12739_s8 + $0xe8] ss:$16 sps:$4 sm:$0xff]   ;;  %v12313_v53 = vpack.c.bf16 %v5995_v4, %v5995_v4 }
0x592b   :  { %v9497_v4 = vld [vmem:[%s12739_s8 + $0x14c] ss:$16 sps:$4 sm:$0xff]  }
0x592d   :  { %7658 = vmatpush1.bf16.msra.mxu0 %v9351_v32  ;;  %7699 = vmatpush1.bf16.msra.mxu1 %v9354_v61  ;;  %v12315_v32 = vpack.c.bf16 %v5997_v11, %v5997_v11  ;;  %v9420_v61 = vld [vmem:[%s12739_s8 + $0x2e8] ss:$16 sps:$4 sm:$0xff]   ;;  %v9500_v11 = vld [vmem:[%s12739_s8 + $0x34c] ss:$16 sps:$4 sm:$0xff]  }
0x592e   :  { %7659 = vmatprep.subr.bf16.mxu0 %v9359_v20  ;;  %7700 = vmatprep.subr.bf16.mxu1 %v9362_v3  ;;  %v9425_v20 = vld [vmem:[%s12739_s8 + $0xcc] ss:$16 sps:$4 sm:$0xff]  }
0x592f   :  { %v9428_v3 = vld [vmem:[%s12739_s8 + $0x2cc] ss:$16 sps:$4 sm:$0xff]  }
0x5931   :  { %7660 = vmatpush1.bf16.msra.mxu0 %v9357_v52  ;;  %7701 = vmatpush1.bf16.msra.mxu1 %v9360_v27  ;;  %v9423_v52 = vld [vmem:[%s12739_s8 + $0xc8] ss:$16 sps:$4 sm:$0xff]  }
0x5932   :  { %7661 = vmatprep.subr.bf16.mxu0 %v9365_v21  ;;  %7702 = vmatprep.subr.bf16.mxu1 %v9368_v0  ;;  %v9426_v27 = vld [vmem:[%s12739_s8 + $0x2c8] ss:$16 sps:$4 sm:$0xff]   ;;  %v9431_v21 = vld [vmem:[%s12739_s8 + $0xac] ss:$16 sps:$4 sm:$0xff]  }
0x5933   :  { %v9429_v0 = vld [vmem:[%s12739_s8 + $0xa8] ss:$16 sps:$4 sm:$0xff]  }
0x5935   :  { %7662 = vmatpush1.bf16.msra.mxu0 %v9363_v30  ;;  %7703 = vmatpush1.bf16.msra.mxu1 %v9366_v36  ;;  %v9437_v30 = vld [vmem:[%s12739_s8 + $0x8c] ss:$16 sps:$4 sm:$0xff]  }
0x5936   :  { %7663 = vmatprep.subr.bf16.mxu0 %v9371_v46  ;;  %7704 = vmatprep.subr.bf16.mxu1 %v9374_v43  ;;  %v9440_v36 = vld [vmem:[%s12739_s8 + $0x28c] ss:$16 sps:$4 sm:$0xff]   ;;  %v9435_v46 = vld [vmem:[%s12739_s8 + $0x88] ss:$16 sps:$4 sm:$0xff]  }
0x5937   :  { %v9438_v43 = vld [vmem:[%s12739_s8 + $0x288] ss:$16 sps:$4 sm:$0xff]  }
0x5939   :  { %7664 = vmatpush2.bf16.msra.mxu0 %v9369_v10  ;;  %7705 = vmatpush2.bf16.msra.mxu1 %v9372_v2  ;;  %v9443_v10 = vld [vmem:[%s12739_s8 + $0x6c] ss:$16 sps:$4 sm:$0xff]  }
0x593a   :  { %7665 = vmatprep.subr.bf16.mxu0 %v9377_v23  ;;  %7706 = vmatprep.subr.bf16.mxu1 %v9380_v28  ;;  %v9446_v2 = vld [vmem:[%s12739_s8 + $0x26c] ss:$16 sps:$4 sm:$0xff]   ;;  %v9441_v23 = vld [vmem:[%s12739_s8 + $0x68] ss:$16 sps:$4 sm:$0xff]  }
0x593b   :  { %v9444_v28 = vld [vmem:[%s12739_s8 + $0x268] ss:$16 sps:$4 sm:$0xff]  }
0x593d   :  { %7666 = vmatpush2.bf16.msra.mxu0 %v9375_v26  ;;  %7707 = vmatpush2.bf16.msra.mxu1 %v9378_v45  ;;  %v9449_v26 = vld [vmem:[%s12739_s8 + $0x4c] ss:$16 sps:$4 sm:$0xff]  }
0x593e   :  { %7667 = vmatprep.subr.bf16.mxu0 %v9383_v42  ;;  %7708 = vmatprep.subr.bf16.mxu1 %v9386_v17  ;;  %v9452_v45 = vld [vmem:[%s12739_s8 + $0x24c] ss:$16 sps:$4 sm:$0xff]   ;;  %v9447_v42 = vld [vmem:[%s12739_s8 + $0x48] ss:$16 sps:$4 sm:$0xff]  }
0x593f   :  { %v9450_v17 = vld [vmem:[%s12739_s8 + $0x248] ss:$16 sps:$4 sm:$0xff]  }
0x5941   :  { %7668 = vmatpush2.bf16.msra.mxu0 %v9381_v29  ;;  %7709 = vmatpush2.bf16.msra.mxu1 %v9384_v62  ;;  %v9455_v29 = vld [vmem:[%s12739_s8 + $0x2c] ss:$16 sps:$4 sm:$0xff]  }
0x5942   :  { %7669 = vmatprep.subr.bf16.mxu0 %v9389_v25  ;;  %7710 = vmatprep.subr.bf16.mxu1 %v9392_v49  ;;  %v9458_v62 = vld [vmem:[%s12739_s8 + $0x22c] ss:$16 sps:$4 sm:$0xff]   ;;  %v9453_v25 = vld [vmem:[%s12739_s8 + $0x28] ss:$16 sps:$4 sm:$0xff]  }
0x5943   :  { %v9456_v49 = vld [vmem:[%s12739_s8 + $0x228] ss:$16 sps:$4 sm:$0xff]  }
0x5945   :  { %7670 = vmatpush2.bf16.msra.mxu0 %v9387_v39  ;;  %7711 = vmatpush2.bf16.msra.mxu1 %v9390_v16  ;;  %v9461_v39 = vld [vmem:[%s12739_s8 + $0xc] ss:$16 sps:$4 sm:$0xff]  }
0x5946   :  { %7671 = vmatprep.subr.bf16.mxu0 %v9395_v12  ;;  %7712 = vmatprep.subr.bf16.mxu1 %v9398_v34  ;;  %v9464_v16 = vld [vmem:[%s12739_s8 + $0x20c] ss:$16 sps:$4 sm:$0xff]   ;;  %v9459_v12 = vld [vmem:[%s12739_s8 + $0x8] ss:$16 sps:$4 sm:$0xff]  }
0x5947   :  { %v9462_v34 = vld [vmem:[%s12739_s8 + $0x208] ss:$16 sps:$4 sm:$0xff]  }
0x5949   :  { %7672 = vmatpush2.bf16.msra.mxu0 %v9393_v33  ;;  %7713 = vmatpush2.bf16.msra.mxu1 %v9396_v37  ;;  %v9467_v33 = vld [vmem:[%s12739_s8 + $0x1ec] ss:$16 sps:$4 sm:$0xff]  }
0x594a   :  { %7673 = vmatprep.subr.bf16.mxu0 %v9401_v35  ;;  %7714 = vmatprep.subr.bf16.mxu1 %v9404_v22  ;;  %v9470_v37 = vld [vmem:[%s12739_s8 + $0x3ec] ss:$16 sps:$4 sm:$0xff]  }
0x594b   :  { %v9473_v35 = vld [vmem:[%s12739_s8 + $0x1cc] ss:$16 sps:$4 sm:$0xff]  }
0x594c   :  { %v9476_v22 = vld [vmem:[%s12739_s8 + $0x3cc] ss:$16 sps:$4 sm:$0xff]  }
0x594d   :  { %7674 = vmatpush2.bf16.msra.mxu0 %v9399_v1  ;;  %7715 = vmatpush2.bf16.msra.mxu1 %v9402_v6  ;;  %v9471_v1 = vld [vmem:[%s12739_s8 + $0x1c8] ss:$16 sps:$4 sm:$0xff]  }
0x594e   :  { %7675 = vmatprep.subr.bf16.mxu0 %v9407_v38  ;;  %7716 = vmatprep.subr.bf16.mxu1 %v9410_v41  ;;  %v9474_v6 = vld [vmem:[%s12739_s8 + $0x3c8] ss:$16 sps:$4 sm:$0xff]  }
0x594f   :  { %v9477_v38 = vld [vmem:[%s12739_s8 + $0x1a8] ss:$16 sps:$4 sm:$0xff]  }
0x5950   :  { %v9480_v41 = vld [vmem:[%s12739_s8 + $0x3a8] ss:$16 sps:$4 sm:$0xff]  }
0x5951   :  { %7676 = vmatpush2.bf16.msra.mxu0 %v9405_v14  ;;  %7717 = vmatpush2.bf16.msra.mxu1 %v9408_v40  ;;  %v9485_v14 = vld [vmem:[%s12739_s8 + $0x18c] ss:$16 sps:$4 sm:$0xff]  }
0x5952   :  { %7677 = vmatprep.subr.bf16.mxu0 %v9413_v55  ;;  %7718 = vmatprep.subr.bf16.mxu1 %v9416_v19  ;;  %v9488_v40 = vld [vmem:[%s12739_s8 + $0x38c] ss:$16 sps:$4 sm:$0xff]  }
0x5953   :  { %v9491_v55 = vld [vmem:[%s12739_s8 + $0x16c] ss:$16 sps:$4 sm:$0xff]  }
0x5954   :  { %v9494_v19 = vld [vmem:[%s12739_s8 + $0x36c] ss:$16 sps:$4 sm:$0xff]  }
0x5955   :  { %7678 = vmatpush2.bf16.msra.mxu0 %v9411_v50  ;;  %7719 = vmatpush2.bf16.msra.mxu1 %v9414_v18  ;;  %v9489_v50 = vld [vmem:[%s12739_s8 + $0x168] ss:$16 sps:$4 sm:$0xff]  }
0x5956   :  { %7729 = vmatprep.subr.bf16.mxu0 %v9419_v48  ;;  %7770 = vmatprep.subr.bf16.mxu1 %v9422_v59  ;;  %v9492_v18 = vld [vmem:[%s12739_s8 + $0x368] ss:$16 sps:$4 sm:$0xff]  }
0x5957   :  { %v9495_v48 = vld [vmem:[%s12739_s8 + $0x148] ss:$16 sps:$4 sm:$0xff]  }
0x5958   :  { %7680 = vmatmul.mubr.bf16.vlgmr.msra.gmra.mxu0 %v12313_v53  ;;  %7721 = vmatmul.mubr.bf16.vlgmr.msra.gmra.mxu1 %v12315_v32  ;;  %v9498_v59 = vld [vmem:[%s12739_s8 + $0x348] ss:$16 sps:$4 sm:$0xff]  }
0x5959   :  { %7730 = vmatpush1.bf16.msra.mxu0 %v9417_v58  ;;  %7761 = vmatprep.mubr.bf16.mxu0 %v12088_v7  ;;  %v9434_v7 = vld [vmem:[%s12739_s8 + $0x2ac] ss:$16 sps:$4 sm:$0xff]  }
0x595a   :  { %7771 = vmatpush1.bf16.msra.mxu1 %v9420_v61  ;;  %7802 = vmatprep.mubr.bf16.mxu1 %v12090_v13  ;;  %v9432_v13 = vld [vmem:[%s12739_s8 + $0x2a8] ss:$16 sps:$4 sm:$0xff]   ;;  %v9503_v58 = vld [vmem:[%s12739_s8 + $0x12c] ss:$16 sps:$4 sm:$0xff]  }
0x595b   :  { %7731 = vmatprep.subr.bf16.mxu0 %v9425_v20  ;;  %7772 = vmatprep.subr.bf16.mxu1 %v9428_v3  ;;  %v9506_v61 = vld [vmem:[%s12739_s8 + $0x32c] ss:$16 sps:$4 sm:$0xff]   ;;  %v9501_v20 = vld [vmem:[%s12739_s8 + $0x128] ss:$16 sps:$4 sm:$0xff]  }
0x595c   :  { %v9504_v3 = vld [vmem:[%s12739_s8 + $0x328] ss:$16 sps:$4 sm:$0xff]  }
0x595d   :  { %7732 = vmatpush1.bf16.msra.mxu0 %v9423_v52  ;;  %v9509_v52 = vld [vmem:[%s12739_s8 + $0x10c] ss:$16 sps:$4 sm:$0xff]  }
0x595e   :  { %7773 = vmatpush1.bf16.msra.mxu1 %v9426_v27  ;;  %7733 = vmatprep.subr.bf16.mxu0 %v9431_v21  ;;  %v9512_v27 = vld [vmem:[%s12739_s8 + $0x30c] ss:$16 sps:$4 sm:$0xff]   ;;  %v9507_v21 = vld [vmem:[%s12739_s8 + $0x108] ss:$16 sps:$4 sm:$0xff]  }
0x595f   :  { %7774 = vmatprep.subr.bf16.mxu1 %v9434_v7  ;;  %v9510_v7 = vld [vmem:[%s12739_s8 + $0x308] ss:$16 sps:$4 sm:$0xff]  }
0x5961   :  { %7734 = vmatpush1.bf16.msra.mxu0 %v9429_v0  ;;  %v9515_v0 = vld [vmem:[%s12739_s8 + $0x4ec] ss:$16 sps:$4 sm:$0xff]  }
0x5962   :  { %7775 = vmatpush1.bf16.msra.mxu1 %v9432_v13  ;;  %7735 = vmatprep.subr.bf16.mxu0 %v9437_v30  ;;  %v9518_v13 = vld [vmem:[%s12739_s8 + $0x6ec] ss:$16 sps:$4 sm:$0xff]   ;;  %v9513_v30 = vld [vmem:[%s12739_s8 + $0x4e8] ss:$16 sps:$4 sm:$0xff]  }
0x5963   :  { %7776 = vmatprep.subr.bf16.mxu1 %v9440_v36  ;;  %v9516_v36 = vld [vmem:[%s12739_s8 + $0x6e8] ss:$16 sps:$4 sm:$0xff]  }
0x5965   :  { %7736 = vmatpush1.bf16.msra.mxu0 %v9435_v46  ;;  %v9521_v46 = vld [vmem:[%s12739_s8 + $0x4cc] ss:$16 sps:$4 sm:$0xff]  }
0x5966   :  { %7777 = vmatpush1.bf16.msra.mxu1 %v9438_v43  ;;  %7737 = vmatprep.subr.bf16.mxu0 %v9443_v10  ;;  %v9524_v43 = vld [vmem:[%s12739_s8 + $0x6cc] ss:$16 sps:$4 sm:$0xff]   ;;  %v9519_v10 = vld [vmem:[%s12739_s8 + $0x4c8] ss:$16 sps:$4 sm:$0xff]  }
0x5967   :  { %7778 = vmatprep.subr.bf16.mxu1 %v9446_v2  ;;  %v9522_v2 = vld [vmem:[%s12739_s8 + $0x6c8] ss:$16 sps:$4 sm:$0xff]  }
0x5969   :  { %7738 = vmatpush1.bf16.msra.mxu0 %v9441_v23  ;;  %v9528_v23 = vld [vmem:[%s12739_s8 + $0x6a8] ss:$16 sps:$4 sm:$0xff]  }
0x596a   :  { %7779 = vmatpush1.bf16.msra.mxu1 %v9444_v28  ;;  %7739 = vmatprep.subr.bf16.mxu0 %v9449_v26  ;;  %v9536_v28 = vld [vmem:[%s12739_s8 + $0x68c] ss:$16 sps:$4 sm:$0xff]   ;;  %v9531_v26 = vld [vmem:[%s12739_s8 + $0x488] ss:$16 sps:$4 sm:$0xff]  }
0x596b   :  { %7780 = vmatprep.subr.bf16.mxu1 %v9452_v45  ;;  %v9534_v45 = vld [vmem:[%s12739_s8 + $0x688] ss:$16 sps:$4 sm:$0xff]  }
0x596d   :  { %7740 = vmatpush1.bf16.msra.mxu0 %v9447_v42  ;;  %v9539_v42 = vld [vmem:[%s12739_s8 + $0x46c] ss:$16 sps:$4 sm:$0xff]  }
0x596e   :  { %7781 = vmatpush1.bf16.msra.mxu1 %v9450_v17  ;;  %7741 = vmatprep.subr.bf16.mxu0 %v9455_v29  ;;  %v9542_v17 = vld [vmem:[%s12739_s8 + $0x66c] ss:$16 sps:$4 sm:$0xff]   ;;  %v9537_v29 = vld [vmem:[%s12739_s8 + $0x468] ss:$16 sps:$4 sm:$0xff]  }
0x596f   :  { %7782 = vmatprep.subr.bf16.mxu1 %v9458_v62  ;;  %v9540_v62 = vld [vmem:[%s12739_s8 + $0x668] ss:$16 sps:$4 sm:$0xff]  }
0x5971   :  { %7742 = vmatpush1.bf16.msra.mxu0 %v9453_v25  ;;  %v9545_v25 = vld [vmem:[%s12739_s8 + $0x44c] ss:$16 sps:$4 sm:$0xff]  }
0x5972   :  { %7783 = vmatpush1.bf16.msra.mxu1 %v9456_v49  ;;  %7743 = vmatprep.subr.bf16.mxu0 %v9461_v39  ;;  %v9548_v49 = vld [vmem:[%s12739_s8 + $0x64c] ss:$16 sps:$4 sm:$0xff]   ;;  %v9543_v39 = vld [vmem:[%s12739_s8 + $0x448] ss:$16 sps:$4 sm:$0xff]  }
0x5973   :  { %7784 = vmatprep.subr.bf16.mxu1 %v9464_v16  ;;  %v9546_v16 = vld [vmem:[%s12739_s8 + $0x648] ss:$16 sps:$4 sm:$0xff]  }
0x5975   :  { %7744 = vmatpush1.bf16.msra.mxu0 %v9459_v12  ;;  %v9551_v12 = vld [vmem:[%s12739_s8 + $0x42c] ss:$16 sps:$4 sm:$0xff]  }
0x5976   :  { %7785 = vmatpush1.bf16.msra.mxu1 %v9462_v34  ;;  %7745 = vmatprep.subr.bf16.mxu0 %v9467_v33  ;;  %v9554_v34 = vld [vmem:[%s12739_s8 + $0x62c] ss:$16 sps:$4 sm:$0xff]   ;;  %v9549_v33 = vld [vmem:[%s12739_s8 + $0x428] ss:$16 sps:$4 sm:$0xff]  }
0x5977   :  { %7786 = vmatprep.subr.bf16.mxu1 %v9470_v37  ;;  %v9552_v37 = vld [vmem:[%s12739_s8 + $0x628] ss:$16 sps:$4 sm:$0xff]  }
0x5979   :  { %7746 = vmatpush2.bf16.msra.mxu0 %v9465_v47  ;;  %v9557_v47 = vld [vmem:[%s12739_s8 + $0x40c] ss:$16 sps:$4 sm:$0xff]  }
0x597a   :  { %7787 = vmatpush2.bf16.msra.mxu1 %v9468_v8  ;;  %7747 = vmatprep.subr.bf16.mxu0 %v9473_v35  ;;  %v9560_v8 = vld [vmem:[%s12739_s8 + $0x60c] ss:$16 sps:$4 sm:$0xff]   ;;  %v9555_v35 = vld [vmem:[%s12739_s8 + $0x408] ss:$16 sps:$4 sm:$0xff]  }
0x597b   :  { %7788 = vmatprep.subr.bf16.mxu1 %v9476_v22  ;;  %v9558_v22 = vld [vmem:[%s12739_s8 + $0x608] ss:$16 sps:$4 sm:$0xff]  }
0x597d   :  { %7748 = vmatpush2.bf16.msra.mxu0 %v9471_v1  ;;  %v9563_v1 = vld [vmem:[%s12739_s8 + $0x5ec] ss:$16 sps:$4 sm:$0xff]  }
0x597e   :  { %7789 = vmatpush2.bf16.msra.mxu1 %v9474_v6  ;;  %7749 = vmatprep.subr.bf16.mxu0 %v9479_v9  ;;  %v9566_v6 = vld [vmem:[%s12739_s8 + $0x7ec] ss:$16 sps:$4 sm:$0xff]   ;;  %v9561_v9 = vld [vmem:[%s12739_s8 + $0x5e8] ss:$16 sps:$4 sm:$0xff]  }
0x597f   :  { %7790 = vmatprep.subr.bf16.mxu1 %v9482_v54  ;;  %v9564_v54 = vld [vmem:[%s12739_s8 + $0x7e8] ss:$16 sps:$4 sm:$0xff]  }
0x5981   :  { %7750 = vmatpush2.bf16.msra.mxu0 %v9477_v38  ;;  %v9569_v38 = vld [vmem:[%s12739_s8 + $0x5cc] ss:$16 sps:$4 sm:$0xff]  }
0x5982   :  { %7791 = vmatpush2.bf16.msra.mxu1 %v9480_v41  ;;  %7751 = vmatprep.subr.bf16.mxu0 %v9485_v14  ;;  %v9572_v41 = vld [vmem:[%s12739_s8 + $0x7cc] ss:$16 sps:$4 sm:$0xff]   ;;  %v9567_v14 = vld [vmem:[%s12739_s8 + $0x5c8] ss:$16 sps:$4 sm:$0xff]  }
0x5983   :  { %7792 = vmatprep.subr.bf16.mxu1 %v9488_v40  ;;  %v9570_v40 = vld [vmem:[%s12739_s8 + $0x7c8] ss:$16 sps:$4 sm:$0xff]  }
0x5985   :  { %7752 = vmatpush2.bf16.msra.mxu0 %v9483_v5  ;;  %v9575_v5 = vld [vmem:[%s12739_s8 + $0x5ac] ss:$16 sps:$4 sm:$0xff]  }
0x5986   :  { %7793 = vmatpush2.bf16.msra.mxu1 %v9486_v44  ;;  %7753 = vmatprep.subr.bf16.mxu0 %v9491_v55  ;;  %v9578_v44 = vld [vmem:[%s12739_s8 + $0x7ac] ss:$16 sps:$4 sm:$0xff]   ;;  %v9573_v55 = vld [vmem:[%s12739_s8 + $0x5a8] ss:$16 sps:$4 sm:$0xff]  }
0x5987   :  { %7794 = vmatprep.subr.bf16.mxu1 %v9494_v19  ;;  %v9576_v19 = vld [vmem:[%s12739_s8 + $0x7a8] ss:$16 sps:$4 sm:$0xff]  }
0x5989   :  { %7754 = vmatpush2.bf16.msra.mxu0 %v9489_v50  ;;  %v9581_v50 = vld [vmem:[%s12739_s8 + $0x58c] ss:$16 sps:$4 sm:$0xff]  }
0x598a   :  { %7795 = vmatpush2.bf16.msra.mxu1 %v9492_v18  ;;  %7755 = vmatprep.subr.bf16.mxu0 %v9497_v4  ;;  %v9584_v18 = vld [vmem:[%s12739_s8 + $0x78c] ss:$16 sps:$4 sm:$0xff]   ;;  %v9579_v4 = vld [vmem:[%s12739_s8 + $0x588] ss:$16 sps:$4 sm:$0xff]  }
0x598b   :  { %7796 = vmatprep.subr.bf16.mxu1 %v9500_v11  ;;  %v9582_v11 = vld [vmem:[%s12739_s8 + $0x788] ss:$16 sps:$4 sm:$0xff]  }
0x598d   :  { %7756 = vmatpush2.bf16.msra.mxu0 %v9495_v48  ;;  %v9587_v48 = vld [vmem:[%s12739_s8 + $0x56c] ss:$16 sps:$4 sm:$0xff]  }
0x598e   :  { %7797 = vmatpush2.bf16.msra.mxu1 %v9498_v59  ;;  %7757 = vmatprep.subr.bf16.mxu0 %v9503_v58  ;;  %v9590_v59 = vld [vmem:[%s12739_s8 + $0x76c] ss:$16 sps:$4 sm:$0xff]   ;;  %v9585_v58 = vld [vmem:[%s12739_s8 + $0x568] ss:$16 sps:$4 sm:$0xff]  }
0x598f   :  { %7798 = vmatprep.subr.bf16.mxu1 %v9506_v61  ;;  %v9588_v61 = vld [vmem:[%s12739_s8 + $0x768] ss:$16 sps:$4 sm:$0xff]  }
0x5991   :  { %7758 = vmatpush2.bf16.msra.mxu0 %v9501_v20  ;;  %v9593_v20 = vld [vmem:[%s12739_s8 + $0x54c] ss:$16 sps:$4 sm:$0xff]  }
0x5992   :  { %7799 = vmatpush2.bf16.msra.mxu1 %v9504_v3  ;;  %7759 = vmatprep.subr.bf16.mxu0 %v9509_v52  ;;  %v9596_v3 = vld [vmem:[%s12739_s8 + $0x74c] ss:$16 sps:$4 sm:$0xff]   ;;  %v9591_v52 = vld [vmem:[%s12739_s8 + $0x548] ss:$16 sps:$4 sm:$0xff]  }
0x5993   :  { %7800 = vmatprep.subr.bf16.mxu1 %v9512_v27  ;;  %v9594_v27 = vld [vmem:[%s12739_s8 + $0x748] ss:$16 sps:$4 sm:$0xff]  }
0x5995   :  { %7760 = vmatpush2.bf16.msra.mxu0 %v9507_v21  ;;  %v9599_v21 = vld [vmem:[%s12739_s8 + $0x52c] ss:$16 sps:$4 sm:$0xff]  }
0x5996   :  { %7801 = vmatpush2.bf16.msra.mxu1 %v9510_v7  ;;  %7811 = vmatprep.subr.bf16.mxu0 %v9515_v0  ;;  %v9602_v7 = vld [vmem:[%s12739_s8 + $0x72c] ss:$16 sps:$4 sm:$0xff]   ;;  %v9597_v0 = vld [vmem:[%s12739_s8 + $0x528] ss:$16 sps:$4 sm:$0xff]  }
0x5997   :  { %7852 = vmatprep.subr.bf16.mxu1 %v9518_v13  ;;  %v9600_v13 = vld [vmem:[%s12739_s8 + $0x728] ss:$16 sps:$4 sm:$0xff]  }
0x5998   :  { %7762 = vmatmul.mubr.bf16.vlgmr.msra.gmra.mxu0 %v12100_v15  ;;  %v9527_v15 = vld [vmem:[%s12739_s8 + $0x4ac] ss:$16 sps:$4 sm:$0xff]  }
0x5999   :  { %7803 = vmatmul.mubr.bf16.vlgmr.msra.gmra.mxu1 %v12102_v31  ;;  %7812 = vmatpush1.bf16.msra.mxu0 %v9513_v30  ;;  %v9530_v31 = vld [vmem:[%s12739_s8 + $0x6ac] ss:$16 sps:$4 sm:$0xff]  }
0x599a   :  { %7843 = vmatprep.mubr.bf16.mxu0 %v12130_v60  ;;  %7853 = vmatpush1.bf16.msra.mxu1 %v9516_v36  ;;  %v9525_v60 = vld [vmem:[%s12739_s8 + $0x4a8] ss:$16 sps:$4 sm:$0xff]   ;;  %v9605_v30 = vld [vmem:[%s12739_s8 + $0x50c] ss:$16 sps:$4 sm:$0xff]  }
0x599b   :  { %7884 = vmatprep.mubr.bf16.mxu1 %v12132_v57  ;;  %7813 = vmatprep.subr.bf16.mxu0 %v9521_v46  ;;  %v9533_v57 = vld [vmem:[%s12739_s8 + $0x48c] ss:$16 sps:$4 sm:$0xff]   ;;  %v9603_v46 = vld [vmem:[%s12739_s8 + $0x508] ss:$16 sps:$4 sm:$0xff]  }
0x599c   :  { %7854 = vmatprep.subr.bf16.mxu1 %v9524_v43  ;;  %v9608_v36 = vld [vmem:[%s12739_s8 + $0x70c] ss:$16 sps:$4 sm:$0xff]   ;;  %v9606_v43 = vld [vmem:[%s12739_s8 + $0x708] ss:$16 sps:$4 sm:$0xff]  }
0x599d   :  { %7814 = vmatpush1.bf16.msra.mxu0 %v9519_v10  ;;  %v12703_v10 = vld [vmem:[%s12741_s9] sm:$0xf] }
0x599e   :  { %7855 = vmatpush1.bf16.msra.mxu1 %v9522_v2  ;;  %7815 = vmatprep.subr.bf16.mxu0 %v9527_v15  ;;  %v6268_v2 = vrot.slane %v12703_v10, %v11153_v24  ;;  %v6272_v15 = vrot.slane %v12703_v10, %v11156_v51 }
0x599f   :  { %7856 = vmatprep.subr.bf16.mxu1 %v9530_v31 }
0x59a1   :  { %7816 = vmatpush1.bf16.msra.mxu0 %v9525_v60 }
0x59a2   :  { %7857 = vmatpush1.bf16.msra.mxu1 %v9528_v23  ;;  %7817 = vmatprep.subr.bf16.mxu0 %v9533_v57 }
0x59a3   :  { %7858 = vmatprep.subr.bf16.mxu1 %v9536_v28 }
0x59a5   :  { %7818 = vmatpush1.bf16.msra.mxu0 %v9531_v26 }
0x59a6   :  { %7859 = vmatpush1.bf16.msra.mxu1 %v9534_v45  ;;  %7819 = vmatprep.subr.bf16.mxu0 %v9539_v42 }
0x59a7   :  { %7860 = vmatprep.subr.bf16.mxu1 %v9542_v17 }
0x59a9   :  { %7820 = vmatpush1.bf16.msra.mxu0 %v9537_v29 }
0x59aa   :  { %7861 = vmatpush1.bf16.msra.mxu1 %v9540_v62  ;;  %7821 = vmatprep.subr.bf16.mxu0 %v9545_v25 }
0x59ab   :  { %7862 = vmatprep.subr.bf16.mxu1 %v9548_v49 }
0x59ad   :  { %7822 = vmatpush1.bf16.msra.mxu0 %v9543_v39 }
0x59ae   :  { %7863 = vmatpush1.bf16.msra.mxu1 %v9546_v16  ;;  %7823 = vmatprep.subr.bf16.mxu0 %v9551_v12 }
0x59af   :  { %7864 = vmatprep.subr.bf16.mxu1 %v9554_v34 }
0x59b1   :  { %7824 = vmatpush1.bf16.msra.mxu0 %v9549_v33 }
0x59b2   :  { %7865 = vmatpush1.bf16.msra.mxu1 %v9552_v37  ;;  %7825 = vmatprep.subr.bf16.mxu0 %v9557_v47 }
0x59b3   :  { %7866 = vmatprep.subr.bf16.mxu1 %v9560_v8 }
0x59b5   :  { %7826 = vmatpush1.bf16.msra.mxu0 %v9555_v35 }
0x59b6   :  { %7867 = vmatpush1.bf16.msra.mxu1 %v9558_v22  ;;  %7827 = vmatprep.subr.bf16.mxu0 %v9563_v1 }
0x59b7   :  { %7868 = vmatprep.subr.bf16.mxu1 %v9566_v6 }
0x59b9   :  { %7828 = vmatpush2.bf16.msra.mxu0 %v9561_v9 }
0x59ba   :  { %7869 = vmatpush2.bf16.msra.mxu1 %v9564_v54  ;;  %7829 = vmatprep.subr.bf16.mxu0 %v9569_v38 }
0x59bb   :  { %7870 = vmatprep.subr.bf16.mxu1 %v9572_v41  ;;  %v7917_v41 = vld [vmem:[%s12742_s10] sm:$0xf] }
0x59bd   :  { %7830 = vmatpush2.bf16.msra.mxu0 %v9567_v14  ;;  %v7922_v14 = vrot.slane %v7917_v41, %v11153_v24 }
0x59be   :  { %7871 = vmatpush2.bf16.msra.mxu1 %v9570_v40  ;;  %7831 = vmatprep.subr.bf16.mxu0 %v9575_v5  ;;  %v7926_v40 = vrot.slane %v7917_v41, %v11156_v51 }
0x59bf   :  { %7872 = vmatprep.subr.bf16.mxu1 %v9578_v44 }
0x59c1   :  { %7832 = vmatpush2.bf16.msra.mxu0 %v9573_v55 }
0x59c2   :  { %7873 = vmatpush2.bf16.msra.mxu1 %v9576_v19  ;;  %7833 = vmatprep.subr.bf16.mxu0 %v9581_v50 }
0x59c3   :  { %7874 = vmatprep.subr.bf16.mxu1 %v9584_v18 }
0x59c5   :  { %7834 = vmatpush2.bf16.msra.mxu0 %v9579_v4 }
0x59c6   :  { %7875 = vmatpush2.bf16.msra.mxu1 %v9582_v11  ;;  %7835 = vmatprep.subr.bf16.mxu0 %v9587_v48  ;;  %v17_v11 = vstv %s12743_s11 }
0x59c7   :  { %7876 = vmatprep.subr.bf16.mxu1 %v9590_v59  ;;  %18 = vst [vmem:[#allocation2] sm:$0x1] %v17_v11 }
0x59c9   :  { %7836 = vmatpush2.bf16.msra.mxu0 %v9585_v58 }
0x59ca   :  { %7877 = vmatpush2.bf16.msra.mxu1 %v9588_v61  ;;  %7837 = vmatprep.subr.bf16.mxu0 %v9593_v20 }
0x59cb   :  { %7878 = vmatprep.subr.bf16.mxu1 %v9596_v3 }
0x59cd   :  { %7838 = vmatpush2.bf16.msra.mxu0 %v9591_v52  ;;  %v6276_v52 = vrot.slane %v12703_v10, %v12068_v56 }
0x59ce   :  { %7879 = vmatpush2.bf16.msra.mxu1 %v9594_v27  ;;  %7839 = vmatprep.subr.bf16.mxu0 %v9599_v21  ;;  %v6280_v27 = vrot.slane %v12703_v10, %v12076_v63 }
0x59cf   :  { %7880 = vmatprep.subr.bf16.mxu1 %v9602_v7 }
0x59d1   :  { %7840 = vmatpush2.bf16.msra.mxu0 %v9597_v0 }
0x59d2   :  { %7881 = vmatpush2.bf16.msra.mxu1 %v9600_v13  ;;  %7841 = vmatprep.subr.bf16.mxu0 %v9605_v30 }
0x59d3   :  { %7882 = vmatprep.subr.bf16.mxu1 %v9608_v36 }
0x59d5   :  { %7842 = vmatpush2.bf16.msra.mxu0 %v9603_v46 }
0x59d6   :  { %7883 = vmatpush2.bf16.msra.mxu1 %v9606_v43 }
0x59d8   :  { %7844 = vmatmul.mubr.bf16.vlgmr.msra.gmra.mxu0 %v12313_v53  ;;  %v7599_v31 = vpop.f32.mrf.mxu0  ;;  %v7640_v60 = vpop.f32.mrf.mxu1 }
0x59d9   :  { %7885 = vmatmul.mubr.bf16.vlgmr.msra.gmra.mxu1 %v12315_v32  ;;  %v7600_v23 = vadd.f32 %v7599_v31, %v6268_v2 }
0x59da   :  { %v7601_v57 = vpop.f32.mrf.mxu0  ;;  %v7642_v28 = vpop.f32.mrf.mxu1 }
0x59db   :  { %v7641_v26 = vadd.f32 %v7640_v60, %v7600_v23  ;;  %v7602_v45 = vadd.f32 %v7601_v57, %v6272_v15 }
0x59dc   :  { %v7603_v42 = vpop.f32.mrf.mxu0  ;;  %v7644_v17 = vpop.f32.mrf.mxu1 }
0x59dd   :  { %v7643_v29 = vadd.f32 %v7642_v28, %v7602_v45 }
0x59de   :  { %v7604_v62 = vpop.f32.mrf.mxu0  ;;  %v7645_v25 = vpop.f32.mrf.mxu1 }
0x59df   :  { %v7930_v25 = vrot.slane %v7917_v41, %v12068_v56 }
0x5a18   :  { %v7681_v49 = vpop.f32.mrf.mxu0  ;;  %v7722_v39 = vpop.f32.mrf.mxu1 }
0x5a19   :  { %v7682_v16 = vadd.f32 %v7681_v49, %v7641_v26  ;;  %v7934_v49 = vrot.slane %v7917_v41, %v12076_v63 }
0x5a1a   :  { %v7683_v12 = vpop.f32.mrf.mxu0  ;;  %v7724_v34 = vpop.f32.mrf.mxu1 }
0x5a1b   :  { %v7723_v53 = vadd.f32 %v7722_v39, %v7682_v16  ;;  %v7684_v33 = vadd.f32 %v7683_v12, %v7643_v29 }
0x5a1c   :  { %v7685_v37 = vpop.f32.mrf.mxu0  ;;  %v7726_v47 = vpop.f32.mrf.mxu1 }
0x5a1d   :  { %v8571_v32 = vmul.f32 -1.442695, %v7723_v53  ;;  %v7725_v8 = vadd.f32 %v7724_v34, %v7684_v33 }
0x5a1e   :  { %v7686_v35 = vpop.f32.mrf.mxu0  ;;  %v7727_v22 = vpop.f32.mrf.mxu1 }
0x5a1f   :  { %9865 = vpow2.f32 %v8571_v32  ;;  %v8572_v1 = vmul.f32 -1.442695, %v7725_v8  ;;  %v8575_v32 = vld [vmem:[#allocation2] ss:$0 sm:$0xff] }
0x5a21   :  { %9867 = vpow2.f32 %v8572_v1 }
0x5a2c   :  { %v9866_v6 = vpop.eup %9865 }
0x5a2d   :  { %v7905_v9 = vadd.f32 1.0, %v9866_v6 }
0x5a2e   :  { %v9868_v54 = vpop.eup %9867 }
0x5a2f   :  { %9869 = vrcp.f32 %v7905_v9  ;;  %v7906_v38 = vadd.f32 1.0, %v9868_v54 }
0x5a31   :  { %9871 = vrcp.f32 %v7906_v38 }
0x5a3c   :  { %v9870_v5 = vpop.eup %9869 }
0x5a3d   :  { %v7939_v44 = vmul.f32 %v9870_v5, %v7922_v14 }
0x5a3e   :  { %v9872_v55 = vpop.eup %9871 }
0x5a3f   :  { %v7940_v19 = vmul.f32 %v9872_v55, %v7926_v40  ;;  %v7944_v50 = vsel %vm7943_vm3, %v7939_v44, 0.0 }
0x5a41   :  { %v7945_v18 = vsel %vm7943_vm3, %v7940_v19, 0.0 }
0x5a42   :  { %v7946_v4 = vadd.f32 %v7945_v18, %v7944_v50 }
0x5a58   :  { %v7763_v48 = vpop.f32.mrf.mxu0 }
0x5a59   :  { %v7804_v59 = vpop.f32.mrf.mxu1  ;;  %v7764_v21 = vadd.f32 %v7763_v48, %v6276_v52 }
0x5a5a   :  { %v7765_v24 = vpop.f32.mrf.mxu0 }
0x5a5b   :  { %v7806_v58 = vpop.f32.mrf.mxu1  ;;  %v7766_v7 = vadd.f32 %v7765_v24, %v6280_v27  ;;  %v7805_v0 = vadd.f32 %v7804_v59, %v7764_v21 }
0x5a5c   :  { %v7767_v51 = vpop.f32.mrf.mxu0 }
0x5a5d   :  { %v7808_v61 = vpop.f32.mrf.mxu1  ;;  %v7807_v30 = vadd.f32 %v7806_v58, %v7766_v7 }
0x5a5e   :  { %v7768_v20 = vpop.f32.mrf.mxu0 }
0x5a5f   :  { %v7809_v3 = vpop.f32.mrf.mxu1 }
0x5a98   :  { %v7845_v13 = vpop.f32.mrf.mxu0 }
0x5a99   :  { %v7846_v36 = vadd.f32 %v7845_v13, %v7805_v0  ;;  %v7886_v46 = vpop.f32.mrf.mxu1 }
0x5a9a   :  { %v7847_v43 = vpop.f32.mrf.mxu0 }
0x5a9b   :  { %v7887_v2 = vadd.f32 %v7886_v46, %v7846_v36  ;;  %v7848_v15 = vadd.f32 %v7847_v43, %v7807_v30  ;;  %v7888_v31 = vpop.f32.mrf.mxu1 }
0x5a9c   :  { %v7849_v60 = vpop.f32.mrf.mxu0 }
0x5a9d   :  { %v8573_v23 = vmul.f32 -1.442695, %v7887_v2  ;;  %v7889_v57 = vadd.f32 %v7888_v31, %v7848_v15  ;;  %v7890_v28 = vpop.f32.mrf.mxu1 }
0x5a9e   :  { %v7850_v26 = vpop.f32.mrf.mxu0 }
0x5a9f   :  { %9873 = vpow2.f32 %v8573_v23  ;;  %v8574_v45 = vmul.f32 -1.442695, %v7889_v57  ;;  %v7891_v42 = vpop.f32.mrf.mxu1 }
0x5aa1   :  { %9875 = vpow2.f32 %v8574_v45 }
0x5aac   :  { %v9874_v10 = vpop.eup %9873 }
0x5aad   :  { %v7907_v17 = vadd.f32 1.0, %v9874_v10 }
0x5aae   :  { %v9876_v29 = vpop.eup %9875 }
0x5aaf   :  { %9877 = vrcp.f32 %v7907_v17  ;;  %v7908_v62 = vadd.f32 1.0, %v9876_v29 }
0x5ab1   :  { %9879 = vrcp.f32 %v7908_v62 }
0x5abc   :  { %v9878_v39 = vpop.eup %9877 }
0x5abd   :  { %v7941_v16 = vmul.f32 %v9878_v39, %v7930_v25 }
0x5abe   :  { %v9880_v12 = vpop.eup %9879 }
0x5abf   :  { %v7942_v34 = vmul.f32 %v9880_v12, %v7934_v49  ;;  %v7947_v53 = vsel %vm7943_vm3, %v7941_v16, 0.0 }
0x5ac0   :  { %v7948_v33 = vadd.f32 %v7947_v53, %v7946_v4 }
0x5ac1   :  { %v7949_v37 = vsel %vm7943_vm3, %v7942_v34, 0.0 }
0x5ac2   :  { %v7950_v47 = vadd.f32 %v7949_v37, %v7948_v33 }
0x5ac4   :  { %7951 = vadd.xlane.f32.xlu0 %v7950_v47 }
0x5b4d   :  { %v7952_v8 = vpop.xlane.xlu0 %7951 }
0x5b4e   :  { %v7960_v35 = vadd.f32 %v8575_v32, %v7952_v8 }
0x5b50   :  { %v8576_v22 = vmul.f32 -1.442695, %v7960_v35 }
0x5b52   :  { %9881 = vpow2.f32 %v8576_v22 }
0x5b5f   :  { %v9882_v1 = vpop.eup %9881 }
0x5b60   :  { %v7964_v56 = vadd.f32 1.0, %v9882_v1 }
0x5b62   :  { %9883 = vrcp.f32 %v7964_v56 }
0x5b6f   :  { %v9884_v63 = vpop.eup %9883 }
0x5b70   :  { %7968 = vst.msk [vmem:[%s12744_s12] sm:$0x3] %vm7967_vm4, %v9884_v63 }

</bundles_post_ra>
